<compile_context>
chip_gen: v7x
topology: tpu7x:2x2x1
jax: 0.10.0
libtpu: 0.0.40
codegen_flags: <defaults>
</compile_context>

<pallas_src>
import functools

import jax
import jax.numpy as jnp
from jax.experimental import pallas as pl
from jax.experimental.pallas import tpu as pltpu

EPS = 1e-5        # nn.BatchNorm1d default eps
KS = 5            # Conv1d kernel_size
POOL = 3          # MaxPool1d kernel_size
COUT = 5          # all conv layers have 5 output channels
TAP_ROWS = 8      # sublane-aligned row stride per conv tap in the stacked RHS
N_BLOCKS = 4


# ----------------------------- in-kernel helpers ----------------------------- #

def _phase_select(nrows, n_a, n_b, stride, off_a, off_b):
    """0/1 selection matrix S (nrows, n_a + n_b), generated in-kernel with iota.

    Column j < n_a picks row stride*j + off_a; column j >= n_a picks
    stride*(j - n_a) + off_b. Used to turn the 3-tap max into MaxPool1d(3,2)
    output split directly into the even/odd phases the next conv needs.
    """
    ncols = n_a + n_b
    r = jax.lax.broadcasted_iota(jnp.int32, (nrows, ncols), 0)
    c = jax.lax.broadcasted_iota(jnp.int32, (nrows, ncols), 1)
    tgt = jnp.where(c < n_a, stride * c + off_a, stride * (c - n_a) + off_b)
    return jnp.where(r == tgt, 1.0, 0.0).astype(jnp.float32)


# --------------------------------- the kernel -------------------------------- #

def fused_kernel(*refs, blocks, B, n_mlp):
    """refs = xe, xo, 4x(w_stack, bias, gamma, beta), n_mlp x (W_t, b), out, xs_scratch."""
    xe_ref, xo_ref = refs[0], refs[1]
    conv_refs = refs[2:2 + 4 * len(blocks)]
    mlp_refs = refs[2 + 4 * len(blocks):2 + 4 * len(blocks) + 2 * n_mlp]
    o_ref = refs[2 + 4 * len(blocks) + 2 * n_mlp]
    xs_ref = refs[-1]

    # Zero the stacked-RHS scratch once: padded tap rows stay exactly 0 so the
    # zero-padded weight columns never multiply uninitialized VMEM.
    xs_ref[...] = jnp.zeros_like(xs_ref)

    # Current block input per batch as (even, odd) phase pairs, channel-major (C, L).
    x_even = [xe_ref[b] for b in range(B)]
    x_odd = [xo_ref[b] for b in range(B)]
    p_last = None

    for bi, (cin, lout, lp, n_e, n_o, lpad) in enumerate(blocks):
        w_ref, b_ref, g_ref, beta_ref = conv_refs[4 * bi:4 * bi + 4]

        # ---- Stack all 5 taps (rows, 8-aligned) x all batches (cols, 128-aligned)
        # of the stride-2 conv input; the whole block's conv is ONE MXU matmul.
        for b in range(B):
            for k in range(KS):
                src = x_even[b] if k % 2 == 0 else x_odd[b]   # x[:, 2j+k]
                off = k // 2
                xs_ref[pl.ds(k * TAP_ROWS, cin), pl.ds(b * lpad, lout)] = (
                    src[:, off:off + lout])

        y = jnp.dot(w_ref[...], xs_ref[:, 0:B * lpad],
                    preferred_element_type=jnp.float32) + b_ref[...]

        # ---- BatchNorm1d training-mode batch stats over (B, lout); two-pass variance
        # (padded columns between batch segments are excluded from the stats).
        n = float(B * lout)
        s1 = jnp.zeros((COUT, 1), jnp.float32)
        for b in range(B):
            s1 = s1 + jnp.sum(y[:, b * lpad:b * lpad + lout], axis=1, keepdims=True)
        mean = s1 / n
        yc = y - mean
        s2 = jnp.zeros((COUT, 1), jnp.float32)
        for b in range(B):
            seg = yc[:, b * lpad:b * lpad + lout]
            s2 = s2 + jnp.sum(seg * seg, axis=1, keepdims=True)
        scale = g_ref[...] * jax.lax.rsqrt(s2 / n + EPS)
        yn = jnp.maximum(yc * scale + beta_ref[...], 0.0)          # BN affine + ReLU

        # ---- MaxPool1d(3,2): 3-tap shifted max, then stride-2 window selection via an
        # iota-generated 0/1 matmul; for blocks 1-3 it emits the even/odd phases the
        # next conv consumes, for the last block the contiguous pooled output.
        last = bi == len(blocks) - 1
        if last:
            sel = _phase_select(lout - 2, lp, 0, 2, 0, 0)
        else:
            sel = _phase_select(lout - 2, n_e, n_o, 4, 0, 2)
        nxt_e, nxt_o, p_out = [], [], []
        for b in range(B):
            seg = yn[:, b * lpad:b * lpad + lout]
            m = jnp.maximum(jnp.maximum(seg[:, 0:lout - 2], seg[:, 1:lout - 1]),
                            seg[:, 2:lout])
            pb = jnp.dot(m, sel, preferred_element_type=jnp.float32)
            if last:
                p_out.append(pb)                                  # (COUT, lp)
            else:
                nxt_e.append(pb[:, 0:n_e])
                nxt_o.append(pb[:, n_e:n_e + n_o])
        x_even, x_odd, p_last = nxt_e, nxt_o, p_out

    # ---- Flatten + fused 8-layer MLP (all weights VMEM resident). Flatten is folded
    # into the first layer's per-channel dots, so no in-kernel reshape is needed.
    w0 = mlp_refs[0][...]                              # (COUT*lp4, hidden)
    for b in range(B):
        p = p_last[b]                                  # (COUT, lp4), row-major (c, l)
        lpf = p.shape[1]
        h = mlp_refs[1][...]                           # (1, hidden) bias seeds the acc
        for c in range(COUT):
            h = h + jnp.dot(p[c:c + 1, :], w0[c * lpf:(c + 1) * lpf, :],
                            preferred_element_type=jnp.float32)
        h = jnp.maximum(h, 0.0)
        for i in range(1, n_mlp):
            h = jnp.dot(h, mlp_refs[2 * i][...],
                        preferred_element_type=jnp.float32) + mlp_refs[2 * i + 1][...]
            if i < n_mlp - 1:
                h = jnp.maximum(h, 0.0)
        o_ref[b] = h                                   # o_ref: (B, 1, feature)


# ------------------------------- host-side wrapper --------------------------- #

def _block_dims(K, input_size):
    """Static per-block dims: (cin, lout, lp, n_even, n_odd, lane-padded lout)."""
    dims = []
    L, cin = input_size, K
    for _ in range(N_BLOCKS):
        lout = (L - KS) // 2 + 1
        lp = (lout - POOL) // 2 + 1
        assert lout >= POOL and lp >= 1, "input_size too small for 4 encoder blocks"
        n_e = (lp + 1) // 2
        n_o = lp // 2
        lpad = -(-lout // 128) * 128
        dims.append((cin, lout, lp, n_e, n_o, lpad))
        L, cin = lp, COUT
    return tuple(dims)


def team_model_forward(pparams, x):
    """x: (B, K, input_size) NCL float32 -> (B, feature_size). One pallas_call."""
    convs, linears = pparams
    B, K, L = x.shape
    blocks = _block_dims(K, L)

    # Initial even/odd deinterleave of x (single cheap XLA strided slice, ~1x traffic);
    # every later deinterleave happens inside the fused kernel.
    xe = x[:, :, 0::2]
    xo = x[:, :, 1::2]

    args = [xe, xo]
    for blk in convs:
        args.extend(blk)
    for lin in linears:
        args.extend(lin)

    feature = linears[-1][0].shape[1]
    n_mlp = len(linears)
    xs_cols = B * blocks[0][5]                         # block 1 has the widest RHS

    out = pl.pallas_call(
        functools.partial(fused_kernel, blocks=blocks, B=B, n_mlp=n_mlp),
        out_shape=jax.ShapeDtypeStruct((B, 1, feature), jnp.float32),
        in_specs=[pl.BlockSpec(memory_space=pltpu.MemorySpace.VMEM)] * len(args),
        out_specs=pl.BlockSpec(memory_space=pltpu.MemorySpace.VMEM),
        scratch_shapes=[pltpu.VMEM((KS * TAP_ROWS, xs_cols), jnp.float32)],
    )(*args)
    return out.reshape(B, feature)


# ------------------------------ parameters ----------------------------------- #

def init_params(key, K, input_size, hidden_size, feature_size):
    """Deterministic synthetic parameters in PyTorch layouts (matching TeamModel)."""
    keys = jax.random.split(key, 20)
    convs = []
    conv_io = [(COUT, K)] + [(COUT, COUT)] * 3
    for i, (co, ci) in enumerate(conv_io):
        w = jax.random.normal(keys[i], (co, ci, KS), jnp.float32) / jnp.sqrt(ci * float(KS))
        b = jnp.zeros((co,), jnp.float32)
        gamma = jnp.ones((co,), jnp.float32)           # BatchNorm1d default affine init
        beta = jnp.zeros((co,), jnp.float32)
        convs.append((w, b, gamma, beta))

    flat = COUT * _block_dims(K, input_size)[-1][2]    # LazyLinear in-features = C * L
    dims = [flat] + [hidden_size] * 7 + [feature_size]
    linears = []
    for i in range(8):
        fin, fout = dims[i], dims[i + 1]
        w = jax.random.normal(keys[4 + i], (fout, fin), jnp.float32) / jnp.sqrt(float(fin))
        bb = 0.01 * jax.random.normal(keys[12 + i], (fout,), jnp.float32)
        linears.append((w, bb))
    return convs, linears


def prepare_params(params):
    """One-time layout prep (runs outside the jitted forward):
    conv W (Cout,Cin,ks) -> tap-stacked, 8-row-padded (Cout, ks*8) with zeros for
    c >= Cin; bias/gamma/beta -> (Cout,1); linear W (fout,fin) -> (fin,fout); b -> (1,fout)."""
    convs, linears = params
    pconvs = []
    for (w, b, g, beta) in convs:
        co, ci, ks = w.shape
        w_pad = jnp.pad(jnp.transpose(w, (0, 2, 1)),           # (co, ks, ci)
                        ((0, 0), (0, 0), (0, TAP_ROWS - ci))   # pad channel dim to 8
                        ).reshape(co, ks * TAP_ROWS)           # [o, k*8 + c] = W[o,c,k]
        pconvs.append((w_pad, b.reshape(co, 1), g.reshape(co, 1), beta.reshape(co, 1)))
    plins = [(w.T, bb.reshape(1, -1)) for (w, bb) in linears]
    return pconvs, plins


# ------------------------------ pure-JAX reference --------------------------- #

def reference_forward(params, x):
    convs, linears = params
    h = x
    for (w, b, g, beta) in convs:
        B, Cin, L = h.shape
        Cout, _, ks = w.shape
        lout = (L - ks) // 2 + 1
        idx = (jnp.arange(lout) * 2)[:, None] + jnp.arange(ks)[None, :]
        patches = h[:, :, idx]                                  # (B, Cin, lout, ks)
        y = jnp.einsum('bcjk,ock->boj', patches, w) + b[None, :, None]
        mean = jnp.mean(y, axis=(0, 2), keepdims=True)
        var = jnp.mean((y - mean) ** 2, axis=(0, 2), keepdims=True)
        y = (y - mean) * jax.lax.rsqrt(var + EPS) * g[None, :, None] + beta[None, :, None]
        y = jnp.maximum(y, 0.0)
        lp = (lout - 3) // 2 + 1
        h = jnp.maximum(jnp.maximum(y[:, :, 0:2 * lp - 1:2], y[:, :, 1:2 * lp:2]),
                        y[:, :, 2:2 * lp + 1:2])
    h = h.reshape(h.shape[0], -1)
    for i, (w, bb) in enumerate(linears):
        h = h @ w.T + bb
        if i < len(linears) - 1:
            h = jnp.maximum(h, 0.0)
    return h


if __name__ == "__main__":
    # Smallest input_size surviving 4x (conv stride 2 + pool stride 2) downsampling is
    # ~681; 1024 gives a final encoder length of 2 and flatten = 5 * 2 = 10.
    K, input_size, hidden_size, feature_size = 4, 1024, 32, 8
    batch = 2

    key = jax.random.PRNGKey(0)
    pkey, xkey = jax.random.split(key)
    params = init_params(pkey, K, input_size, hidden_size, feature_size)
    pparams = prepare_params(params)                   # layout prep hoisted (runs once)
    x = jax.random.normal(xkey, (batch, K, input_size), jnp.float32)

    fwd = jax.jit(team_model_forward)
    out = jax.block_until_ready(fwd(pparams, x))
    assert out.shape == (batch, feature_size), out.shape
    assert bool(jnp.all(jnp.isfinite(out)))

    # Scale-relative check vs the pure-JAX reference (tightened from 1e-1; remaining
    # slack covers XLA-vs-Mosaic default MXU precision differences on f32 operands).
    ref = reference_forward(params, x)
    err = float(jnp.max(jnp.abs(out - ref)) / (jnp.max(jnp.abs(ref)) + 1e-6))
    assert err < 5e-2, f"mismatch vs reference: {err}"

    print("KERNEL_OK")
</pallas_src>

<mosaic_0001>
module attributes {stable_mosaic.version = 11 : i64} {
  func.func @fused_kernel(%arg0: memref<2x4x512xf32, #tpu.memory_space<vmem>>, %arg1: memref<2x4x512xf32, #tpu.memory_space<vmem>>, %arg2: memref<5x40xf32, #tpu.memory_space<vmem>>, %arg3: memref<5x1xf32, #tpu.memory_space<vmem>>, %arg4: memref<5x1xf32, #tpu.memory_space<vmem>>, %arg5: memref<5x1xf32, #tpu.memory_space<vmem>>, %arg6: memref<5x40xf32, #tpu.memory_space<vmem>>, %arg7: memref<5x1xf32, #tpu.memory_space<vmem>>, %arg8: memref<5x1xf32, #tpu.memory_space<vmem>>, %arg9: memref<5x1xf32, #tpu.memory_space<vmem>>, %arg10: memref<5x40xf32, #tpu.memory_space<vmem>>, %arg11: memref<5x1xf32, #tpu.memory_space<vmem>>, %arg12: memref<5x1xf32, #tpu.memory_space<vmem>>, %arg13: memref<5x1xf32, #tpu.memory_space<vmem>>, %arg14: memref<5x40xf32, #tpu.memory_space<vmem>>, %arg15: memref<5x1xf32, #tpu.memory_space<vmem>>, %arg16: memref<5x1xf32, #tpu.memory_space<vmem>>, %arg17: memref<5x1xf32, #tpu.memory_space<vmem>>, %arg18: memref<10x32xf32, #tpu.memory_space<vmem>>, %arg19: memref<1x32xf32, #tpu.memory_space<vmem>>, %arg20: memref<32x32xf32, #tpu.memory_space<vmem>>, %arg21: memref<1x32xf32, #tpu.memory_space<vmem>>, %arg22: memref<32x32xf32, #tpu.memory_space<vmem>>, %arg23: memref<1x32xf32, #tpu.memory_space<vmem>>, %arg24: memref<32x32xf32, #tpu.memory_space<vmem>>, %arg25: memref<1x32xf32, #tpu.memory_space<vmem>>, %arg26: memref<32x32xf32, #tpu.memory_space<vmem>>, %arg27: memref<1x32xf32, #tpu.memory_space<vmem>>, %arg28: memref<32x32xf32, #tpu.memory_space<vmem>>, %arg29: memref<1x32xf32, #tpu.memory_space<vmem>>, %arg30: memref<32x32xf32, #tpu.memory_space<vmem>>, %arg31: memref<1x32xf32, #tpu.memory_space<vmem>>, %arg32: memref<32x8xf32, #tpu.memory_space<vmem>>, %arg33: memref<1x8xf32, #tpu.memory_space<vmem>>, %arg34: memref<2x1x8xf32, #tpu.memory_space<vmem>>, %arg35: memref<40x1024xf32, #tpu.memory_space<vmem>>) attributes {dimension_semantics = [], scalar_prefetch = 0 : i64, scratch_operands = 1 : i64, tpu.core_type = #tpu.core_type<tc>} {
    %cst = arith.constant 0.000000e+00 : f32
    %0 = vector.broadcast %cst : f32 to vector<40x1024xf32>
    %c0 = arith.constant 0 : index
    %c0_0 = arith.constant 0 : index
    %1 = vector.load %arg35[%c0, %c0_0] : memref<40x1024xf32, #tpu.memory_space<vmem>>, vector<40x1024xf32>
    tpu.vector_store %arg35[%c0, %c0_0], %0 {strides = array<i32>} : memref<40x1024xf32, #tpu.memory_space<vmem>>, vector<40x1024xf32>,
    %c0_1 = arith.constant 0 : index
    %c0_2 = arith.constant 0 : index
    %c0_3 = arith.constant 0 : index
    %2 = vector.load %arg0[%c0_1, %c0_2, %c0_3] : memref<2x4x512xf32, #tpu.memory_space<vmem>>, vector<1x4x512xf32>
    %3 = vector.shape_cast %2 : vector<1x4x512xf32> to vector<4x512xf32>
    %c1 = arith.constant 1 : index
    %c0_4 = arith.constant 0 : index
    %c0_5 = arith.constant 0 : index
    %4 = vector.load %arg0[%c1, %c0_4, %c0_5] : memref<2x4x512xf32, #tpu.memory_space<vmem>>, vector<1x4x512xf32>
    %5 = vector.shape_cast %4 : vector<1x4x512xf32> to vector<4x512xf32>
    %c0_6 = arith.constant 0 : index
    %c0_7 = arith.constant 0 : index
    %c0_8 = arith.constant 0 : index
    %6 = vector.load %arg1[%c0_6, %c0_7, %c0_8] : memref<2x4x512xf32, #tpu.memory_space<vmem>>, vector<1x4x512xf32>
    %7 = vector.shape_cast %6 : vector<1x4x512xf32> to vector<4x512xf32>
    %c1_9 = arith.constant 1 : index
    %c0_10 = arith.constant 0 : index
    %c0_11 = arith.constant 0 : index
    %8 = vector.load %arg1[%c1_9, %c0_10, %c0_11] : memref<2x4x512xf32, #tpu.memory_space<vmem>>, vector<1x4x512xf32>
    %9 = vector.shape_cast %8 : vector<1x4x512xf32> to vector<4x512xf32>
    %10 = vector.extract_strided_slice %3 {offsets = [0, 0], sizes = [4, 510], strides = [1, 1]} : vector<4x512xf32> to vector<4x510xf32>
    %c0_12 = arith.constant 0 : index
    %c0_13 = arith.constant 0 : index
    %11 = vector.load %arg35[%c0_12, %c0_13] : memref<40x1024xf32, #tpu.memory_space<vmem>>, vector<4x510xf32>
    tpu.vector_store %arg35[%c0_12, %c0_13], %10 {strides = array<i32>} : memref<40x1024xf32, #tpu.memory_space<vmem>>, vector<4x510xf32>,
    %12 = vector.extract_strided_slice %7 {offsets = [0, 0], sizes = [4, 510], strides = [1, 1]} : vector<4x512xf32> to vector<4x510xf32>
    %c8 = arith.constant 8 : index
    %c0_14 = arith.constant 0 : index
    %13 = vector.load %arg35[%c8, %c0_14] : memref<40x1024xf32, #tpu.memory_space<vmem>>, vector<4x510xf32>
    tpu.vector_store %arg35[%c8, %c0_14], %12 {strides = array<i32>} : memref<40x1024xf32, #tpu.memory_space<vmem>>, vector<4x510xf32>,
    %14 = vector.extract_strided_slice %3 {offsets = [0, 1], sizes = [4, 510], strides = [1, 1]} : vector<4x512xf32> to vector<4x510xf32>
    %c16 = arith.constant 16 : index
    %c0_15 = arith.constant 0 : index
    %15 = vector.load %arg35[%c16, %c0_15] : memref<40x1024xf32, #tpu.memory_space<vmem>>, vector<4x510xf32>
    tpu.vector_store %arg35[%c16, %c0_15], %14 {strides = array<i32>} : memref<40x1024xf32, #tpu.memory_space<vmem>>, vector<4x510xf32>,
    %16 = vector.extract_strided_slice %7 {offsets = [0, 1], sizes = [4, 510], strides = [1, 1]} : vector<4x512xf32> to vector<4x510xf32>
    %c24 = arith.constant 24 : index
    %c0_16 = arith.constant 0 : index
    %17 = vector.load %arg35[%c24, %c0_16] : memref<40x1024xf32, #tpu.memory_space<vmem>>, vector<4x510xf32>
    tpu.vector_store %arg35[%c24, %c0_16], %16 {strides = array<i32>} : memref<40x1024xf32, #tpu.memory_space<vmem>>, vector<4x510xf32>,
    %18 = vector.extract_strided_slice %3 {offsets = [0, 2], sizes = [4, 510], strides = [1, 1]} : vector<4x512xf32> to vector<4x510xf32>
    %c32 = arith.constant 32 : index
    %c0_17 = arith.constant 0 : index
    %19 = vector.load %arg35[%c32, %c0_17] : memref<40x1024xf32, #tpu.memory_space<vmem>>, vector<4x510xf32>
    tpu.vector_store %arg35[%c32, %c0_17], %18 {strides = array<i32>} : memref<40x1024xf32, #tpu.memory_space<vmem>>, vector<4x510xf32>,
    %20 = vector.extract_strided_slice %5 {offsets = [0, 0], sizes = [4, 510], strides = [1, 1]} : vector<4x512xf32> to vector<4x510xf32>
    %c0_18 = arith.constant 0 : index
    %c512 = arith.constant 512 : index
    %21 = vector.load %arg35[%c0_18, %c512] : memref<40x1024xf32, #tpu.memory_space<vmem>>, vector<4x510xf32>
    tpu.vector_store %arg35[%c0_18, %c512], %20 {strides = array<i32>} : memref<40x1024xf32, #tpu.memory_space<vmem>>, vector<4x510xf32>,
    %22 = vector.extract_strided_slice %9 {offsets = [0, 0], sizes = [4, 510], strides = [1, 1]} : vector<4x512xf32> to vector<4x510xf32>
    %c8_19 = arith.constant 8 : index
    %c512_20 = arith.constant 512 : index
    %23 = vector.load %arg35[%c8_19, %c512_20] : memref<40x1024xf32, #tpu.memory_space<vmem>>, vector<4x510xf32>
    tpu.vector_store %arg35[%c8_19, %c512_20], %22 {strides = array<i32>} : memref<40x1024xf32, #tpu.memory_space<vmem>>, vector<4x510xf32>,
    %24 = vector.extract_strided_slice %5 {offsets = [0, 1], sizes = [4, 510], strides = [1, 1]} : vector<4x512xf32> to vector<4x510xf32>
    %c16_21 = arith.constant 16 : index
    %c512_22 = arith.constant 512 : index
    %25 = vector.load %arg35[%c16_21, %c512_22] : memref<40x1024xf32, #tpu.memory_space<vmem>>, vector<4x510xf32>
    tpu.vector_store %arg35[%c16_21, %c512_22], %24 {strides = array<i32>} : memref<40x1024xf32, #tpu.memory_space<vmem>>, vector<4x510xf32>,
    %26 = vector.extract_strided_slice %9 {offsets = [0, 1], sizes = [4, 510], strides = [1, 1]} : vector<4x512xf32> to vector<4x510xf32>
    %c24_23 = arith.constant 24 : index
    %c512_24 = arith.constant 512 : index
    %27 = vector.load %arg35[%c24_23, %c512_24] : memref<40x1024xf32, #tpu.memory_space<vmem>>, vector<4x510xf32>
    tpu.vector_store %arg35[%c24_23, %c512_24], %26 {strides = array<i32>} : memref<40x1024xf32, #tpu.memory_space<vmem>>, vector<4x510xf32>,
    %28 = vector.extract_strided_slice %5 {offsets = [0, 2], sizes = [4, 510], strides = [1, 1]} : vector<4x512xf32> to vector<4x510xf32>
    %c32_25 = arith.constant 32 : index
    %c512_26 = arith.constant 512 : index
    %29 = vector.load %arg35[%c32_25, %c512_26] : memref<40x1024xf32, #tpu.memory_space<vmem>>, vector<4x510xf32>
    tpu.vector_store %arg35[%c32_25, %c512_26], %28 {strides = array<i32>} : memref<40x1024xf32, #tpu.memory_space<vmem>>, vector<4x510xf32>,
    %c0_27 = arith.constant 0 : index
    %c0_28 = arith.constant 0 : index
    %30 = vector.load %arg2[%c0_27, %c0_28] : memref<5x40xf32, #tpu.memory_space<vmem>>, vector<5x40xf32>
    %c0_29 = arith.constant 0 : index
    %c0_30 = arith.constant 0 : index
    %31 = vector.load %arg35[%c0_29, %c0_30] : memref<40x1024xf32, #tpu.memory_space<vmem>>, vector<40x1024xf32>
    %cst_31 = arith.constant dense<0.000000e+00> : vector<5x1024xf32>
    %32 = tpu.matmul %30, %31, %cst_31 {dimension_numbers = #tpu.dot_dimension_numbers<[1], [0], [0], [1], [0, 0, 1, 1], [], []>} : vector<5x40xf32>, vector<40x1024xf32>, vector<5x1024xf32> -> vector<5x1024xf32>
    %c0_32 = arith.constant 0 : index
    %c0_33 = arith.constant 0 : index
    %33 = vector.load %arg3[%c0_32, %c0_33] : memref<5x1xf32, #tpu.memory_space<vmem>>, vector<5x1xf32>
    %34 = vector.broadcast %33 : vector<5x1xf32> to vector<5x1024xf32>
    %35 = arith.addf %32, %34 : vector<5x1024xf32>
    %cst_34 = arith.constant 0.000000e+00 : f32
    %36 = vector.broadcast %cst_34 : f32 to vector<5x1xf32>
    %37 = vector.extract_strided_slice %35 {offsets = [0, 0], sizes = [5, 510], strides = [1, 1]} : vector<5x1024xf32> to vector<5x510xf32>
    %cst_35 = arith.constant dense<0.000000e+00> : vector<5xf32>
    %38 = vector.multi_reduction <add>, %37, %cst_35 [1] : vector<5x510xf32> to vector<5xf32>
    %39 = vector.shape_cast %38 : vector<5xf32> to vector<5x1xf32>
    %40 = arith.addf %36, %39 : vector<5x1xf32>
    %41 = vector.extract_strided_slice %35 {offsets = [0, 512], sizes = [5, 510], strides = [1, 1]} : vector<5x1024xf32> to vector<5x510xf32>
    %cst_36 = arith.constant dense<0.000000e+00> : vector<5xf32>
    %42 = vector.multi_reduction <add>, %41, %cst_36 [1] : vector<5x510xf32> to vector<5xf32>
    %43 = vector.shape_cast %42 : vector<5xf32> to vector<5x1xf32>
    %44 = arith.addf %40, %43 : vector<5x1xf32>
    %cst_37 = arith.constant 1.020000e+03 : f32
    %45 = vector.broadcast %cst_37 : f32 to vector<5x1xf32>
    %46 = arith.divf %44, %45 : vector<5x1xf32>
    %47 = vector.broadcast %46 : vector<5x1xf32> to vector<5x1024xf32>
    %48 = arith.subf %35, %47 : vector<5x1024xf32>
    %cst_38 = arith.constant 0.000000e+00 : f32
    %49 = vector.broadcast %cst_38 : f32 to vector<5x1xf32>
    %50 = vector.extract_strided_slice %48 {offsets = [0, 0], sizes = [5, 510], strides = [1, 1]} : vector<5x1024xf32> to vector<5x510xf32>
    %51 = arith.mulf %50, %50 : vector<5x510xf32>
    %cst_39 = arith.constant dense<0.000000e+00> : vector<5xf32>
    %52 = vector.multi_reduction <add>, %51, %cst_39 [1] : vector<5x510xf32> to vector<5xf32>
    %53 = vector.shape_cast %52 : vector<5xf32> to vector<5x1xf32>
    %54 = arith.addf %49, %53 : vector<5x1xf32>
    %55 = vector.extract_strided_slice %48 {offsets = [0, 512], sizes = [5, 510], strides = [1, 1]} : vector<5x1024xf32> to vector<5x510xf32>
    %56 = arith.mulf %55, %55 : vector<5x510xf32>
    %cst_40 = arith.constant dense<0.000000e+00> : vector<5xf32>
    %57 = vector.multi_reduction <add>, %56, %cst_40 [1] : vector<5x510xf32> to vector<5xf32>
    %58 = vector.shape_cast %57 : vector<5xf32> to vector<5x1xf32>
    %59 = arith.addf %54, %58 : vector<5x1xf32>
    %c0_41 = arith.constant 0 : index
    %c0_42 = arith.constant 0 : index
    %60 = vector.load %arg4[%c0_41, %c0_42] : memref<5x1xf32, #tpu.memory_space<vmem>>, vector<5x1xf32>
    %cst_43 = arith.constant 1.020000e+03 : f32
    %61 = vector.broadcast %cst_43 : f32 to vector<5x1xf32>
    %62 = arith.divf %59, %61 : vector<5x1xf32>
    %cst_44 = arith.constant 9.99999974E-6 : f32
    %63 = vector.broadcast %cst_44 : f32 to vector<5x1xf32>
    %64 = arith.addf %62, %63 : vector<5x1xf32>
    %65 = math.rsqrt %64 : vector<5x1xf32>
    %66 = arith.mulf %60, %65 : vector<5x1xf32>
    %67 = vector.broadcast %66 : vector<5x1xf32> to vector<5x1024xf32>
    %68 = arith.mulf %48, %67 : vector<5x1024xf32>
    %c0_45 = arith.constant 0 : index
    %c0_46 = arith.constant 0 : index
    %69 = vector.load %arg5[%c0_45, %c0_46] : memref<5x1xf32, #tpu.memory_space<vmem>>, vector<5x1xf32>
    %70 = vector.broadcast %69 : vector<5x1xf32> to vector<5x1024xf32>
    %71 = arith.addf %68, %70 : vector<5x1024xf32>
    %cst_47 = arith.constant 0.000000e+00 : f32
    %72 = vector.broadcast %cst_47 : f32 to vector<5x1024xf32>
    %73 = arith.maximumf %71, %72 : vector<5x1024xf32>
    %74 = tpu.iota {dimensions = array<i32: 0>} : vector<508x254xi32>
    %75 = tpu.iota {dimensions = array<i32: 1>} : vector<508x254xi32>
    %c127_i32 = arith.constant 127 : i32
    %76 = vector.broadcast %c127_i32 : i32 to vector<508x254xi32>
    %77 = arith.cmpi slt, %75, %76 : vector<508x254xi32>
    %c4_i32 = arith.constant 4 : i32
    %78 = vector.broadcast %c4_i32 : i32 to vector<508x254xi32>
    %79 = arith.muli %78, %75 : vector<508x254xi32>
    %c0_i32 = arith.constant 0 : i32
    %80 = vector.broadcast %c0_i32 : i32 to vector<508x254xi32>
    %81 = arith.addi %79, %80 : vector<508x254xi32>
    %c127_i32_48 = arith.constant 127 : i32
    %82 = vector.broadcast %c127_i32_48 : i32 to vector<508x254xi32>
    %83 = arith.subi %75, %82 : vector<508x254xi32>
    %c4_i32_49 = arith.constant 4 : i32
    %84 = vector.broadcast %c4_i32_49 : i32 to vector<508x254xi32>
    %85 = arith.muli %84, %83 : vector<508x254xi32>
    %c2_i32 = arith.constant 2 : i32
    %86 = vector.broadcast %c2_i32 : i32 to vector<508x254xi32>
    %87 = arith.addi %85, %86 : vector<508x254xi32>
    %88 = arith.select %77, %81, %87 : vector<508x254xi1>, vector<508x254xi32>
    %89 = arith.cmpi eq, %74, %88 : vector<508x254xi32>
    %cst_50 = arith.constant 1.000000e+00 : f32
    %cst_51 = arith.constant 0.000000e+00 : f32
    %90 = vector.broadcast %cst_50 : f32 to vector<508x254xf32>
    %91 = vector.broadcast %cst_51 : f32 to vector<508x254xf32>
    %92 = arith.select %89, %90, %91 : vector<508x254xi1>, vector<508x254xf32>
    %93 = vector.extract_strided_slice %73 {offsets = [0, 0], sizes = [5, 510], strides = [1, 1]} : vector<5x1024xf32> to vector<5x510xf32>
    %94 = vector.extract_strided_slice %93 {offsets = [0, 0], sizes = [5, 508], strides = [1, 1]} : vector<5x510xf32> to vector<5x508xf32>
    %95 = vector.extract_strided_slice %93 {offsets = [0, 1], sizes = [5, 508], strides = [1, 1]} : vector<5x510xf32> to vector<5x508xf32>
    %96 = arith.maximumf %94, %95 : vector<5x508xf32>
    %97 = vector.extract_strided_slice %93 {offsets = [0, 2], sizes = [5, 508], strides = [1, 1]} : vector<5x510xf32> to vector<5x508xf32>
    %98 = arith.maximumf %96, %97 : vector<5x508xf32>
    %cst_52 = arith.constant dense<0.000000e+00> : vector<5x254xf32>
    %99 = tpu.matmul %98, %92, %cst_52 {dimension_numbers = #tpu.dot_dimension_numbers<[1], [0], [0], [1], [0, 0, 1, 1], [], []>} : vector<5x508xf32>, vector<508x254xf32>, vector<5x254xf32> -> vector<5x254xf32>
    %100 = vector.extract_strided_slice %99 {offsets = [0, 0], sizes = [5, 127], strides = [1, 1]} : vector<5x254xf32> to vector<5x127xf32>
    %101 = vector.extract_strided_slice %99 {offsets = [0, 127], sizes = [5, 127], strides = [1, 1]} : vector<5x254xf32> to vector<5x127xf32>
    %102 = vector.extract_strided_slice %73 {offsets = [0, 512], sizes = [5, 510], strides = [1, 1]} : vector<5x1024xf32> to vector<5x510xf32>
    %103 = vector.extract_strided_slice %102 {offsets = [0, 0], sizes = [5, 508], strides = [1, 1]} : vector<5x510xf32> to vector<5x508xf32>
    %104 = vector.extract_strided_slice %102 {offsets = [0, 1], sizes = [5, 508], strides = [1, 1]} : vector<5x510xf32> to vector<5x508xf32>
    %105 = arith.maximumf %103, %104 : vector<5x508xf32>
    %106 = vector.extract_strided_slice %102 {offsets = [0, 2], sizes = [5, 508], strides = [1, 1]} : vector<5x510xf32> to vector<5x508xf32>
    %107 = arith.maximumf %105, %106 : vector<5x508xf32>
    %cst_53 = arith.constant dense<0.000000e+00> : vector<5x254xf32>
    %108 = tpu.matmul %107, %92, %cst_53 {dimension_numbers = #tpu.dot_dimension_numbers<[1], [0], [0], [1], [0, 0, 1, 1], [], []>} : vector<5x508xf32>, vector<508x254xf32>, vector<5x254xf32> -> vector<5x254xf32>
    %109 = vector.extract_strided_slice %108 {offsets = [0, 0], sizes = [5, 127], strides = [1, 1]} : vector<5x254xf32> to vector<5x127xf32>
    %110 = vector.extract_strided_slice %108 {offsets = [0, 127], sizes = [5, 127], strides = [1, 1]} : vector<5x254xf32> to vector<5x127xf32>
    %111 = vector.extract_strided_slice %100 {offsets = [0, 0], sizes = [5, 125], strides = [1, 1]} : vector<5x127xf32> to vector<5x125xf32>
    %c0_54 = arith.constant 0 : index
    %c0_55 = arith.constant 0 : index
    %112 = vector.load %arg35[%c0_54, %c0_55] : memref<40x1024xf32, #tpu.memory_space<vmem>>, vector<5x125xf32>
    tpu.vector_store %arg35[%c0_54, %c0_55], %111 {strides = array<i32>} : memref<40x1024xf32, #tpu.memory_space<vmem>>, vector<5x125xf32>,
    %113 = vector.extract_strided_slice %101 {offsets = [0, 0], sizes = [5, 125], strides = [1, 1]} : vector<5x127xf32> to vector<5x125xf32>
    %c8_56 = arith.constant 8 : index
    %c0_57 = arith.constant 0 : index
    %114 = vector.load %arg35[%c8_56, %c0_57] : memref<40x1024xf32, #tpu.memory_space<vmem>>, vector<5x125xf32>
    tpu.vector_store %arg35[%c8_56, %c0_57], %113 {strides = array<i32>} : memref<40x1024xf32, #tpu.memory_space<vmem>>, vector<5x125xf32>,
    %115 = vector.extract_strided_slice %100 {offsets = [0, 1], sizes = [5, 125], strides = [1, 1]} : vector<5x127xf32> to vector<5x125xf32>
    %c16_58 = arith.constant 16 : index
    %c0_59 = arith.constant 0 : index
    %116 = vector.load %arg35[%c16_58, %c0_59] : memref<40x1024xf32, #tpu.memory_space<vmem>>, vector<5x125xf32>
    tpu.vector_store %arg35[%c16_58, %c0_59], %115 {strides = array<i32>} : memref<40x1024xf32, #tpu.memory_space<vmem>>, vector<5x125xf32>,
    %117 = vector.extract_strided_slice %101 {offsets = [0, 1], sizes = [5, 125], strides = [1, 1]} : vector<5x127xf32> to vector<5x125xf32>
    %c24_60 = arith.constant 24 : index
    %c0_61 = arith.constant 0 : index
    %118 = vector.load %arg35[%c24_60, %c0_61] : memref<40x1024xf32, #tpu.memory_space<vmem>>, vector<5x125xf32>
    tpu.vector_store %arg35[%c24_60, %c0_61], %117 {strides = array<i32>} : memref<40x1024xf32, #tpu.memory_space<vmem>>, vector<5x125xf32>,
    %119 = vector.extract_strided_slice %100 {offsets = [0, 2], sizes = [5, 125], strides = [1, 1]} : vector<5x127xf32> to vector<5x125xf32>
    %c32_62 = arith.constant 32 : index
    %c0_63 = arith.constant 0 : index
    %120 = vector.load %arg35[%c32_62, %c0_63] : memref<40x1024xf32, #tpu.memory_space<vmem>>, vector<5x125xf32>
    tpu.vector_store %arg35[%c32_62, %c0_63], %119 {strides = array<i32>} : memref<40x1024xf32, #tpu.memory_space<vmem>>, vector<5x125xf32>,
    %121 = vector.extract_strided_slice %109 {offsets = [0, 0], sizes = [5, 125], strides = [1, 1]} : vector<5x127xf32> to vector<5x125xf32>
    %c0_64 = arith.constant 0 : index
    %c128 = arith.constant 128 : index
    %122 = vector.load %arg35[%c0_64, %c128] : memref<40x1024xf32, #tpu.memory_space<vmem>>, vector<5x125xf32>
    tpu.vector_store %arg35[%c0_64, %c128], %121 {strides = array<i32>} : memref<40x1024xf32, #tpu.memory_space<vmem>>, vector<5x125xf32>,
    %123 = vector.extract_strided_slice %110 {offsets = [0, 0], sizes = [5, 125], strides = [1, 1]} : vector<5x127xf32> to vector<5x125xf32>
    %c8_65 = arith.constant 8 : index
    %c128_66 = arith.constant 128 : index
    %124 = vector.load %arg35[%c8_65, %c128_66] : memref<40x1024xf32, #tpu.memory_space<vmem>>, vector<5x125xf32>
    tpu.vector_store %arg35[%c8_65, %c128_66], %123 {strides = array<i32>} : memref<40x1024xf32, #tpu.memory_space<vmem>>, vector<5x125xf32>,
    %125 = vector.extract_strided_slice %109 {offsets = [0, 1], sizes = [5, 125], strides = [1, 1]} : vector<5x127xf32> to vector<5x125xf32>
    %c16_67 = arith.constant 16 : index
    %c128_68 = arith.constant 128 : index
    %126 = vector.load %arg35[%c16_67, %c128_68] : memref<40x1024xf32, #tpu.memory_space<vmem>>, vector<5x125xf32>
    tpu.vector_store %arg35[%c16_67, %c128_68], %125 {strides = array<i32>} : memref<40x1024xf32, #tpu.memory_space<vmem>>, vector<5x125xf32>,
    %127 = vector.extract_strided_slice %110 {offsets = [0, 1], sizes = [5, 125], strides = [1, 1]} : vector<5x127xf32> to vector<5x125xf32>
    %c24_69 = arith.constant 24 : index
    %c128_70 = arith.constant 128 : index
    %128 = vector.load %arg35[%c24_69, %c128_70] : memref<40x1024xf32, #tpu.memory_space<vmem>>, vector<5x125xf32>
    tpu.vector_store %arg35[%c24_69, %c128_70], %127 {strides = array<i32>} : memref<40x1024xf32, #tpu.memory_space<vmem>>, vector<5x125xf32>,
    %129 = vector.extract_strided_slice %109 {offsets = [0, 2], sizes = [5, 125], strides = [1, 1]} : vector<5x127xf32> to vector<5x125xf32>
    %c32_71 = arith.constant 32 : index
    %c128_72 = arith.constant 128 : index
    %130 = vector.load %arg35[%c32_71, %c128_72] : memref<40x1024xf32, #tpu.memory_space<vmem>>, vector<5x125xf32>
    tpu.vector_store %arg35[%c32_71, %c128_72], %129 {strides = array<i32>} : memref<40x1024xf32, #tpu.memory_space<vmem>>, vector<5x125xf32>,
    %c0_73 = arith.constant 0 : index
    %c0_74 = arith.constant 0 : index
    %131 = vector.load %arg6[%c0_73, %c0_74] : memref<5x40xf32, #tpu.memory_space<vmem>>, vector<5x40xf32>
    %c0_75 = arith.constant 0 : index
    %c0_76 = arith.constant 0 : index
    %132 = vector.load %arg35[%c0_75, %c0_76] : memref<40x1024xf32, #tpu.memory_space<vmem>>, vector<40x256xf32>
    %cst_77 = arith.constant dense<0.000000e+00> : vector<5x256xf32>
    %133 = tpu.matmul %131, %132, %cst_77 {dimension_numbers = #tpu.dot_dimension_numbers<[1], [0], [0], [1], [0, 0, 1, 1], [], []>} : vector<5x40xf32>, vector<40x256xf32>, vector<5x256xf32> -> vector<5x256xf32>
    %c0_78 = arith.constant 0 : index
    %c0_79 = arith.constant 0 : index
    %134 = vector.load %arg7[%c0_78, %c0_79] : memref<5x1xf32, #tpu.memory_space<vmem>>, vector<5x1xf32>
    %135 = vector.broadcast %134 : vector<5x1xf32> to vector<5x256xf32>
    %136 = arith.addf %133, %135 : vector<5x256xf32>
    %cst_80 = arith.constant 0.000000e+00 : f32
    %137 = vector.broadcast %cst_80 : f32 to vector<5x1xf32>
    %138 = vector.extract_strided_slice %136 {offsets = [0, 0], sizes = [5, 125], strides = [1, 1]} : vector<5x256xf32> to vector<5x125xf32>
    %cst_81 = arith.constant dense<0.000000e+00> : vector<5xf32>
    %139 = vector.multi_reduction <add>, %138, %cst_81 [1] : vector<5x125xf32> to vector<5xf32>
    %140 = vector.shape_cast %139 : vector<5xf32> to vector<5x1xf32>
    %141 = arith.addf %137, %140 : vector<5x1xf32>
    %142 = vector.extract_strided_slice %136 {offsets = [0, 128], sizes = [5, 125], strides = [1, 1]} : vector<5x256xf32> to vector<5x125xf32>
    %cst_82 = arith.constant dense<0.000000e+00> : vector<5xf32>
    %143 = vector.multi_reduction <add>, %142, %cst_82 [1] : vector<5x125xf32> to vector<5xf32>
    %144 = vector.shape_cast %143 : vector<5xf32> to vector<5x1xf32>
    %145 = arith.addf %141, %144 : vector<5x1xf32>
    %cst_83 = arith.constant 2.500000e+02 : f32
    %146 = vector.broadcast %cst_83 : f32 to vector<5x1xf32>
    %147 = arith.divf %145, %146 : vector<5x1xf32>
    %148 = vector.broadcast %147 : vector<5x1xf32> to vector<5x256xf32>
    %149 = arith.subf %136, %148 : vector<5x256xf32>
    %cst_84 = arith.constant 0.000000e+00 : f32
    %150 = vector.broadcast %cst_84 : f32 to vector<5x1xf32>
    %151 = vector.extract_strided_slice %149 {offsets = [0, 0], sizes = [5, 125], strides = [1, 1]} : vector<5x256xf32> to vector<5x125xf32>
    %152 = arith.mulf %151, %151 : vector<5x125xf32>
    %cst_85 = arith.constant dense<0.000000e+00> : vector<5xf32>
    %153 = vector.multi_reduction <add>, %152, %cst_85 [1] : vector<5x125xf32> to vector<5xf32>
    %154 = vector.shape_cast %153 : vector<5xf32> to vector<5x1xf32>
    %155 = arith.addf %150, %154 : vector<5x1xf32>
    %156 = vector.extract_strided_slice %149 {offsets = [0, 128], sizes = [5, 125], strides = [1, 1]} : vector<5x256xf32> to vector<5x125xf32>
    %157 = arith.mulf %156, %156 : vector<5x125xf32>
    %cst_86 = arith.constant dense<0.000000e+00> : vector<5xf32>
    %158 = vector.multi_reduction <add>, %157, %cst_86 [1] : vector<5x125xf32> to vector<5xf32>
    %159 = vector.shape_cast %158 : vector<5xf32> to vector<5x1xf32>
    %160 = arith.addf %155, %159 : vector<5x1xf32>
    %c0_87 = arith.constant 0 : index
    %c0_88 = arith.constant 0 : index
    %161 = vector.load %arg8[%c0_87, %c0_88] : memref<5x1xf32, #tpu.memory_space<vmem>>, vector<5x1xf32>
    %cst_89 = arith.constant 2.500000e+02 : f32
    %162 = vector.broadcast %cst_89 : f32 to vector<5x1xf32>
    %163 = arith.divf %160, %162 : vector<5x1xf32>
    %cst_90 = arith.constant 9.99999974E-6 : f32
    %164 = vector.broadcast %cst_90 : f32 to vector<5x1xf32>
    %165 = arith.addf %163, %164 : vector<5x1xf32>
    %166 = math.rsqrt %165 : vector<5x1xf32>
    %167 = arith.mulf %161, %166 : vector<5x1xf32>
    %168 = vector.broadcast %167 : vector<5x1xf32> to vector<5x256xf32>
    %169 = arith.mulf %149, %168 : vector<5x256xf32>
    %c0_91 = arith.constant 0 : index
    %c0_92 = arith.constant 0 : index
    %170 = vector.load %arg9[%c0_91, %c0_92] : memref<5x1xf32, #tpu.memory_space<vmem>>, vector<5x1xf32>
    %171 = vector.broadcast %170 : vector<5x1xf32> to vector<5x256xf32>
    %172 = arith.addf %169, %171 : vector<5x256xf32>
    %cst_93 = arith.constant 0.000000e+00 : f32
    %173 = vector.broadcast %cst_93 : f32 to vector<5x256xf32>
    %174 = arith.maximumf %172, %173 : vector<5x256xf32>
    %175 = tpu.iota {dimensions = array<i32: 0>} : vector<123x62xi32>
    %176 = tpu.iota {dimensions = array<i32: 1>} : vector<123x62xi32>
    %c31_i32 = arith.constant 31 : i32
    %177 = vector.broadcast %c31_i32 : i32 to vector<123x62xi32>
    %178 = arith.cmpi slt, %176, %177 : vector<123x62xi32>
    %c4_i32_94 = arith.constant 4 : i32
    %179 = vector.broadcast %c4_i32_94 : i32 to vector<123x62xi32>
    %180 = arith.muli %179, %176 : vector<123x62xi32>
    %c0_i32_95 = arith.constant 0 : i32
    %181 = vector.broadcast %c0_i32_95 : i32 to vector<123x62xi32>
    %182 = arith.addi %180, %181 : vector<123x62xi32>
    %c31_i32_96 = arith.constant 31 : i32
    %183 = vector.broadcast %c31_i32_96 : i32 to vector<123x62xi32>
    %184 = arith.subi %176, %183 : vector<123x62xi32>
    %c4_i32_97 = arith.constant 4 : i32
    %185 = vector.broadcast %c4_i32_97 : i32 to vector<123x62xi32>
    %186 = arith.muli %185, %184 : vector<123x62xi32>
    %c2_i32_98 = arith.constant 2 : i32
    %187 = vector.broadcast %c2_i32_98 : i32 to vector<123x62xi32>
    %188 = arith.addi %186, %187 : vector<123x62xi32>
    %189 = arith.select %178, %182, %188 : vector<123x62xi1>, vector<123x62xi32>
    %190 = arith.cmpi eq, %175, %189 : vector<123x62xi32>
    %cst_99 = arith.constant 1.000000e+00 : f32
    %cst_100 = arith.constant 0.000000e+00 : f32
    %191 = vector.broadcast %cst_99 : f32 to vector<123x62xf32>
    %192 = vector.broadcast %cst_100 : f32 to vector<123x62xf32>
    %193 = arith.select %190, %191, %192 : vector<123x62xi1>, vector<123x62xf32>
    %194 = vector.extract_strided_slice %174 {offsets = [0, 0], sizes = [5, 125], strides = [1, 1]} : vector<5x256xf32> to vector<5x125xf32>
    %195 = vector.extract_strided_slice %194 {offsets = [0, 0], sizes = [5, 123], strides = [1, 1]} : vector<5x125xf32> to vector<5x123xf32>
    %196 = vector.extract_strided_slice %194 {offsets = [0, 1], sizes = [5, 123], strides = [1, 1]} : vector<5x125xf32> to vector<5x123xf32>
    %197 = arith.maximumf %195, %196 : vector<5x123xf32>
    %198 = vector.extract_strided_slice %194 {offsets = [0, 2], sizes = [5, 123], strides = [1, 1]} : vector<5x125xf32> to vector<5x123xf32>
    %199 = arith.maximumf %197, %198 : vector<5x123xf32>
    %cst_101 = arith.constant dense<0.000000e+00> : vector<5x62xf32>
    %200 = tpu.matmul %199, %193, %cst_101 {dimension_numbers = #tpu.dot_dimension_numbers<[1], [0], [0], [1], [0, 0, 1, 1], [], []>} : vector<5x123xf32>, vector<123x62xf32>, vector<5x62xf32> -> vector<5x62xf32>
    %201 = vector.extract_strided_slice %200 {offsets = [0, 0], sizes = [5, 31], strides = [1, 1]} : vector<5x62xf32> to vector<5x31xf32>
    %202 = vector.extract_strided_slice %200 {offsets = [0, 31], sizes = [5, 31], strides = [1, 1]} : vector<5x62xf32> to vector<5x31xf32>
    %203 = vector.extract_strided_slice %174 {offsets = [0, 128], sizes = [5, 125], strides = [1, 1]} : vector<5x256xf32> to vector<5x125xf32>
    %204 = vector.extract_strided_slice %203 {offsets = [0, 0], sizes = [5, 123], strides = [1, 1]} : vector<5x125xf32> to vector<5x123xf32>
    %205 = vector.extract_strided_slice %203 {offsets = [0, 1], sizes = [5, 123], strides = [1, 1]} : vector<5x125xf32> to vector<5x123xf32>
    %206 = arith.maximumf %204, %205 : vector<5x123xf32>
    %207 = vector.extract_strided_slice %203 {offsets = [0, 2], sizes = [5, 123], strides = [1, 1]} : vector<5x125xf32> to vector<5x123xf32>
    %208 = arith.maximumf %206, %207 : vector<5x123xf32>
    %cst_102 = arith.constant dense<0.000000e+00> : vector<5x62xf32>
    %209 = tpu.matmul %208, %193, %cst_102 {dimension_numbers = #tpu.dot_dimension_numbers<[1], [0], [0], [1], [0, 0, 1, 1], [], []>} : vector<5x123xf32>, vector<123x62xf32>, vector<5x62xf32> -> vector<5x62xf32>
    %210 = vector.extract_strided_slice %209 {offsets = [0, 0], sizes = [5, 31], strides = [1, 1]} : vector<5x62xf32> to vector<5x31xf32>
    %211 = vector.extract_strided_slice %209 {offsets = [0, 31], sizes = [5, 31], strides = [1, 1]} : vector<5x62xf32> to vector<5x31xf32>
    %212 = vector.extract_strided_slice %201 {offsets = [0, 0], sizes = [5, 29], strides = [1, 1]} : vector<5x31xf32> to vector<5x29xf32>
    %c0_103 = arith.constant 0 : index
    %c0_104 = arith.constant 0 : index
    %213 = vector.load %arg35[%c0_103, %c0_104] : memref<40x1024xf32, #tpu.memory_space<vmem>>, vector<5x29xf32>
    tpu.vector_store %arg35[%c0_103, %c0_104], %212 {strides = array<i32>} : memref<40x1024xf32, #tpu.memory_space<vmem>>, vector<5x29xf32>,
    %214 = vector.extract_strided_slice %202 {offsets = [0, 0], sizes = [5, 29], strides = [1, 1]} : vector<5x31xf32> to vector<5x29xf32>
    %c8_105 = arith.constant 8 : index
    %c0_106 = arith.constant 0 : index
    %215 = vector.load %arg35[%c8_105, %c0_106] : memref<40x1024xf32, #tpu.memory_space<vmem>>, vector<5x29xf32>
    tpu.vector_store %arg35[%c8_105, %c0_106], %214 {strides = array<i32>} : memref<40x1024xf32, #tpu.memory_space<vmem>>, vector<5x29xf32>,
    %216 = vector.extract_strided_slice %201 {offsets = [0, 1], sizes = [5, 29], strides = [1, 1]} : vector<5x31xf32> to vector<5x29xf32>
    %c16_107 = arith.constant 16 : index
    %c0_108 = arith.constant 0 : index
    %217 = vector.load %arg35[%c16_107, %c0_108] : memref<40x1024xf32, #tpu.memory_space<vmem>>, vector<5x29xf32>
    tpu.vector_store %arg35[%c16_107, %c0_108], %216 {strides = array<i32>} : memref<40x1024xf32, #tpu.memory_space<vmem>>, vector<5x29xf32>,
    %218 = vector.extract_strided_slice %202 {offsets = [0, 1], sizes = [5, 29], strides = [1, 1]} : vector<5x31xf32> to vector<5x29xf32>
    %c24_109 = arith.constant 24 : index
    %c0_110 = arith.constant 0 : index
    %219 = vector.load %arg35[%c24_109, %c0_110] : memref<40x1024xf32, #tpu.memory_space<vmem>>, vector<5x29xf32>
    tpu.vector_store %arg35[%c24_109, %c0_110], %218 {strides = array<i32>} : memref<40x1024xf32, #tpu.memory_space<vmem>>, vector<5x29xf32>,
    %220 = vector.extract_strided_slice %201 {offsets = [0, 2], sizes = [5, 29], strides = [1, 1]} : vector<5x31xf32> to vector<5x29xf32>
    %c32_111 = arith.constant 32 : index
    %c0_112 = arith.constant 0 : index
    %221 = vector.load %arg35[%c32_111, %c0_112] : memref<40x1024xf32, #tpu.memory_space<vmem>>, vector<5x29xf32>
    tpu.vector_store %arg35[%c32_111, %c0_112], %220 {strides = array<i32>} : memref<40x1024xf32, #tpu.memory_space<vmem>>, vector<5x29xf32>,
    %222 = vector.extract_strided_slice %210 {offsets = [0, 0], sizes = [5, 29], strides = [1, 1]} : vector<5x31xf32> to vector<5x29xf32>
    %c0_113 = arith.constant 0 : index
    %c128_114 = arith.constant 128 : index
    %223 = vector.load %arg35[%c0_113, %c128_114] : memref<40x1024xf32, #tpu.memory_space<vmem>>, vector<5x29xf32>
    tpu.vector_store %arg35[%c0_113, %c128_114], %222 {strides = array<i32>} : memref<40x1024xf32, #tpu.memory_space<vmem>>, vector<5x29xf32>,
    %224 = vector.extract_strided_slice %211 {offsets = [0, 0], sizes = [5, 29], strides = [1, 1]} : vector<5x31xf32> to vector<5x29xf32>
    %c8_115 = arith.constant 8 : index
    %c128_116 = arith.constant 128 : index
    %225 = vector.load %arg35[%c8_115, %c128_116] : memref<40x1024xf32, #tpu.memory_space<vmem>>, vector<5x29xf32>
    tpu.vector_store %arg35[%c8_115, %c128_116], %224 {strides = array<i32>} : memref<40x1024xf32, #tpu.memory_space<vmem>>, vector<5x29xf32>,
    %226 = vector.extract_strided_slice %210 {offsets = [0, 1], sizes = [5, 29], strides = [1, 1]} : vector<5x31xf32> to vector<5x29xf32>
    %c16_117 = arith.constant 16 : index
    %c128_118 = arith.constant 128 : index
    %227 = vector.load %arg35[%c16_117, %c128_118] : memref<40x1024xf32, #tpu.memory_space<vmem>>, vector<5x29xf32>
    tpu.vector_store %arg35[%c16_117, %c128_118], %226 {strides = array<i32>} : memref<40x1024xf32, #tpu.memory_space<vmem>>, vector<5x29xf32>,
    %228 = vector.extract_strided_slice %211 {offsets = [0, 1], sizes = [5, 29], strides = [1, 1]} : vector<5x31xf32> to vector<5x29xf32>
    %c24_119 = arith.constant 24 : index
    %c128_120 = arith.constant 128 : index
    %229 = vector.load %arg35[%c24_119, %c128_120] : memref<40x1024xf32, #tpu.memory_space<vmem>>, vector<5x29xf32>
    tpu.vector_store %arg35[%c24_119, %c128_120], %228 {strides = array<i32>} : memref<40x1024xf32, #tpu.memory_space<vmem>>, vector<5x29xf32>,
    %230 = vector.extract_strided_slice %210 {offsets = [0, 2], sizes = [5, 29], strides = [1, 1]} : vector<5x31xf32> to vector<5x29xf32>
    %c32_121 = arith.constant 32 : index
    %c128_122 = arith.constant 128 : index
    %231 = vector.load %arg35[%c32_121, %c128_122] : memref<40x1024xf32, #tpu.memory_space<vmem>>, vector<5x29xf32>
    tpu.vector_store %arg35[%c32_121, %c128_122], %230 {strides = array<i32>} : memref<40x1024xf32, #tpu.memory_space<vmem>>, vector<5x29xf32>,
    %c0_123 = arith.constant 0 : index
    %c0_124 = arith.constant 0 : index
    %232 = vector.load %arg10[%c0_123, %c0_124] : memref<5x40xf32, #tpu.memory_space<vmem>>, vector<5x40xf32>
    %c0_125 = arith.constant 0 : index
    %c0_126 = arith.constant 0 : index
    %233 = vector.load %arg35[%c0_125, %c0_126] : memref<40x1024xf32, #tpu.memory_space<vmem>>, vector<40x256xf32>
    %cst_127 = arith.constant dense<0.000000e+00> : vector<5x256xf32>
    %234 = tpu.matmul %232, %233, %cst_127 {dimension_numbers = #tpu.dot_dimension_numbers<[1], [0], [0], [1], [0, 0, 1, 1], [], []>} : vector<5x40xf32>, vector<40x256xf32>, vector<5x256xf32> -> vector<5x256xf32>
    %c0_128 = arith.constant 0 : index
    %c0_129 = arith.constant 0 : index
    %235 = vector.load %arg11[%c0_128, %c0_129] : memref<5x1xf32, #tpu.memory_space<vmem>>, vector<5x1xf32>
    %236 = vector.broadcast %235 : vector<5x1xf32> to vector<5x256xf32>
    %237 = arith.addf %234, %236 : vector<5x256xf32>
    %cst_130 = arith.constant 0.000000e+00 : f32
    %238 = vector.broadcast %cst_130 : f32 to vector<5x1xf32>
    %239 = vector.extract_strided_slice %237 {offsets = [0, 0], sizes = [5, 29], strides = [1, 1]} : vector<5x256xf32> to vector<5x29xf32>
    %cst_131 = arith.constant dense<0.000000e+00> : vector<5xf32>
    %240 = vector.multi_reduction <add>, %239, %cst_131 [1] : vector<5x29xf32> to vector<5xf32>
    %241 = vector.shape_cast %240 : vector<5xf32> to vector<5x1xf32>
    %242 = arith.addf %238, %241 : vector<5x1xf32>
    %243 = vector.extract_strided_slice %237 {offsets = [0, 128], sizes = [5, 29], strides = [1, 1]} : vector<5x256xf32> to vector<5x29xf32>
    %cst_132 = arith.constant dense<0.000000e+00> : vector<5xf32>
    %244 = vector.multi_reduction <add>, %243, %cst_132 [1] : vector<5x29xf32> to vector<5xf32>
    %245 = vector.shape_cast %244 : vector<5xf32> to vector<5x1xf32>
    %246 = arith.addf %242, %245 : vector<5x1xf32>
    %cst_133 = arith.constant 5.800000e+01 : f32
    %247 = vector.broadcast %cst_133 : f32 to vector<5x1xf32>
    %248 = arith.divf %246, %247 : vector<5x1xf32>
    %249 = vector.broadcast %248 : vector<5x1xf32> to vector<5x256xf32>
    %250 = arith.subf %237, %249 : vector<5x256xf32>
    %cst_134 = arith.constant 0.000000e+00 : f32
    %251 = vector.broadcast %cst_134 : f32 to vector<5x1xf32>
    %252 = vector.extract_strided_slice %250 {offsets = [0, 0], sizes = [5, 29], strides = [1, 1]} : vector<5x256xf32> to vector<5x29xf32>
    %253 = arith.mulf %252, %252 : vector<5x29xf32>
    %cst_135 = arith.constant dense<0.000000e+00> : vector<5xf32>
    %254 = vector.multi_reduction <add>, %253, %cst_135 [1] : vector<5x29xf32> to vector<5xf32>
    %255 = vector.shape_cast %254 : vector<5xf32> to vector<5x1xf32>
    %256 = arith.addf %251, %255 : vector<5x1xf32>
    %257 = vector.extract_strided_slice %250 {offsets = [0, 128], sizes = [5, 29], strides = [1, 1]} : vector<5x256xf32> to vector<5x29xf32>
    %258 = arith.mulf %257, %257 : vector<5x29xf32>
    %cst_136 = arith.constant dense<0.000000e+00> : vector<5xf32>
    %259 = vector.multi_reduction <add>, %258, %cst_136 [1] : vector<5x29xf32> to vector<5xf32>
    %260 = vector.shape_cast %259 : vector<5xf32> to vector<5x1xf32>
    %261 = arith.addf %256, %260 : vector<5x1xf32>
    %c0_137 = arith.constant 0 : index
    %c0_138 = arith.constant 0 : index
    %262 = vector.load %arg12[%c0_137, %c0_138] : memref<5x1xf32, #tpu.memory_space<vmem>>, vector<5x1xf32>
    %cst_139 = arith.constant 5.800000e+01 : f32
    %263 = vector.broadcast %cst_139 : f32 to vector<5x1xf32>
    %264 = arith.divf %261, %263 : vector<5x1xf32>
    %cst_140 = arith.constant 9.99999974E-6 : f32
    %265 = vector.broadcast %cst_140 : f32 to vector<5x1xf32>
    %266 = arith.addf %264, %265 : vector<5x1xf32>
    %267 = math.rsqrt %266 : vector<5x1xf32>
    %268 = arith.mulf %262, %267 : vector<5x1xf32>
    %269 = vector.broadcast %268 : vector<5x1xf32> to vector<5x256xf32>
    %270 = arith.mulf %250, %269 : vector<5x256xf32>
    %c0_141 = arith.constant 0 : index
    %c0_142 = arith.constant 0 : index
    %271 = vector.load %arg13[%c0_141, %c0_142] : memref<5x1xf32, #tpu.memory_space<vmem>>, vector<5x1xf32>
    %272 = vector.broadcast %271 : vector<5x1xf32> to vector<5x256xf32>
    %273 = arith.addf %270, %272 : vector<5x256xf32>
    %cst_143 = arith.constant 0.000000e+00 : f32
    %274 = vector.broadcast %cst_143 : f32 to vector<5x256xf32>
    %275 = arith.maximumf %273, %274 : vector<5x256xf32>
    %276 = tpu.iota {dimensions = array<i32: 0>} : vector<27x14xi32>
    %277 = tpu.iota {dimensions = array<i32: 1>} : vector<27x14xi32>
    %c7_i32 = arith.constant 7 : i32
    %278 = vector.broadcast %c7_i32 : i32 to vector<27x14xi32>
    %279 = arith.cmpi slt, %277, %278 : vector<27x14xi32>
    %c4_i32_144 = arith.constant 4 : i32
    %280 = vector.broadcast %c4_i32_144 : i32 to vector<27x14xi32>
    %281 = arith.muli %280, %277 : vector<27x14xi32>
    %c0_i32_145 = arith.constant 0 : i32
    %282 = vector.broadcast %c0_i32_145 : i32 to vector<27x14xi32>
    %283 = arith.addi %281, %282 : vector<27x14xi32>
    %c7_i32_146 = arith.constant 7 : i32
    %284 = vector.broadcast %c7_i32_146 : i32 to vector<27x14xi32>
    %285 = arith.subi %277, %284 : vector<27x14xi32>
    %c4_i32_147 = arith.constant 4 : i32
    %286 = vector.broadcast %c4_i32_147 : i32 to vector<27x14xi32>
    %287 = arith.muli %286, %285 : vector<27x14xi32>
    %c2_i32_148 = arith.constant 2 : i32
    %288 = vector.broadcast %c2_i32_148 : i32 to vector<27x14xi32>
    %289 = arith.addi %287, %288 : vector<27x14xi32>
    %290 = arith.select %279, %283, %289 : vector<27x14xi1>, vector<27x14xi32>
    %291 = arith.cmpi eq, %276, %290 : vector<27x14xi32>
    %cst_149 = arith.constant 1.000000e+00 : f32
    %cst_150 = arith.constant 0.000000e+00 : f32
    %292 = vector.broadcast %cst_149 : f32 to vector<27x14xf32>
    %293 = vector.broadcast %cst_150 : f32 to vector<27x14xf32>
    %294 = arith.select %291, %292, %293 : vector<27x14xi1>, vector<27x14xf32>
    %295 = vector.extract_strided_slice %275 {offsets = [0, 0], sizes = [5, 29], strides = [1, 1]} : vector<5x256xf32> to vector<5x29xf32>
    %296 = vector.extract_strided_slice %295 {offsets = [0, 0], sizes = [5, 27], strides = [1, 1]} : vector<5x29xf32> to vector<5x27xf32>
    %297 = vector.extract_strided_slice %295 {offsets = [0, 1], sizes = [5, 27], strides = [1, 1]} : vector<5x29xf32> to vector<5x27xf32>
    %298 = arith.maximumf %296, %297 : vector<5x27xf32>
    %299 = vector.extract_strided_slice %295 {offsets = [0, 2], sizes = [5, 27], strides = [1, 1]} : vector<5x29xf32> to vector<5x27xf32>
    %300 = arith.maximumf %298, %299 : vector<5x27xf32>
    %cst_151 = arith.constant dense<0.000000e+00> : vector<5x14xf32>
    %301 = tpu.matmul %300, %294, %cst_151 {dimension_numbers = #tpu.dot_dimension_numbers<[1], [0], [0], [1], [0, 0, 1, 1], [], []>} : vector<5x27xf32>, vector<27x14xf32>, vector<5x14xf32> -> vector<5x14xf32>
    %302 = vector.extract_strided_slice %301 {offsets = [0, 0], sizes = [5, 7], strides = [1, 1]} : vector<5x14xf32> to vector<5x7xf32>
    %303 = vector.extract_strided_slice %301 {offsets = [0, 7], sizes = [5, 7], strides = [1, 1]} : vector<5x14xf32> to vector<5x7xf32>
    %304 = vector.extract_strided_slice %275 {offsets = [0, 128], sizes = [5, 29], strides = [1, 1]} : vector<5x256xf32> to vector<5x29xf32>
    %305 = vector.extract_strided_slice %304 {offsets = [0, 0], sizes = [5, 27], strides = [1, 1]} : vector<5x29xf32> to vector<5x27xf32>
    %306 = vector.extract_strided_slice %304 {offsets = [0, 1], sizes = [5, 27], strides = [1, 1]} : vector<5x29xf32> to vector<5x27xf32>
    %307 = arith.maximumf %305, %306 : vector<5x27xf32>
    %308 = vector.extract_strided_slice %304 {offsets = [0, 2], sizes = [5, 27], strides = [1, 1]} : vector<5x29xf32> to vector<5x27xf32>
    %309 = arith.maximumf %307, %308 : vector<5x27xf32>
    %cst_152 = arith.constant dense<0.000000e+00> : vector<5x14xf32>
    %310 = tpu.matmul %309, %294, %cst_152 {dimension_numbers = #tpu.dot_dimension_numbers<[1], [0], [0], [1], [0, 0, 1, 1], [], []>} : vector<5x27xf32>, vector<27x14xf32>, vector<5x14xf32> -> vector<5x14xf32>
    %311 = vector.extract_strided_slice %310 {offsets = [0, 0], sizes = [5, 7], strides = [1, 1]} : vector<5x14xf32> to vector<5x7xf32>
    %312 = vector.extract_strided_slice %310 {offsets = [0, 7], sizes = [5, 7], strides = [1, 1]} : vector<5x14xf32> to vector<5x7xf32>
    %313 = vector.extract_strided_slice %302 {offsets = [0, 0], sizes = [5, 5], strides = [1, 1]} : vector<5x7xf32> to vector<5x5xf32>
    %c0_153 = arith.constant 0 : index
    %c0_154 = arith.constant 0 : index
    %314 = vector.load %arg35[%c0_153, %c0_154] : memref<40x1024xf32, #tpu.memory_space<vmem>>, vector<5x5xf32>
    tpu.vector_store %arg35[%c0_153, %c0_154], %313 {strides = array<i32>} : memref<40x1024xf32, #tpu.memory_space<vmem>>, vector<5x5xf32>,
    %315 = vector.extract_strided_slice %303 {offsets = [0, 0], sizes = [5, 5], strides = [1, 1]} : vector<5x7xf32> to vector<5x5xf32>
    %c8_155 = arith.constant 8 : index
    %c0_156 = arith.constant 0 : index
    %316 = vector.load %arg35[%c8_155, %c0_156] : memref<40x1024xf32, #tpu.memory_space<vmem>>, vector<5x5xf32>
    tpu.vector_store %arg35[%c8_155, %c0_156], %315 {strides = array<i32>} : memref<40x1024xf32, #tpu.memory_space<vmem>>, vector<5x5xf32>,
    %317 = vector.extract_strided_slice %302 {offsets = [0, 1], sizes = [5, 5], strides = [1, 1]} : vector<5x7xf32> to vector<5x5xf32>
    %c16_157 = arith.constant 16 : index
    %c0_158 = arith.constant 0 : index
    %318 = vector.load %arg35[%c16_157, %c0_158] : memref<40x1024xf32, #tpu.memory_space<vmem>>, vector<5x5xf32>
    tpu.vector_store %arg35[%c16_157, %c0_158], %317 {strides = array<i32>} : memref<40x1024xf32, #tpu.memory_space<vmem>>, vector<5x5xf32>,
    %319 = vector.extract_strided_slice %303 {offsets = [0, 1], sizes = [5, 5], strides = [1, 1]} : vector<5x7xf32> to vector<5x5xf32>
    %c24_159 = arith.constant 24 : index
    %c0_160 = arith.constant 0 : index
    %320 = vector.load %arg35[%c24_159, %c0_160] : memref<40x1024xf32, #tpu.memory_space<vmem>>, vector<5x5xf32>
    tpu.vector_store %arg35[%c24_159, %c0_160], %319 {strides = array<i32>} : memref<40x1024xf32, #tpu.memory_space<vmem>>, vector<5x5xf32>,
    %321 = vector.extract_strided_slice %302 {offsets = [0, 2], sizes = [5, 5], strides = [1, 1]} : vector<5x7xf32> to vector<5x5xf32>
    %c32_161 = arith.constant 32 : index
    %c0_162 = arith.constant 0 : index
    %322 = vector.load %arg35[%c32_161, %c0_162] : memref<40x1024xf32, #tpu.memory_space<vmem>>, vector<5x5xf32>
    tpu.vector_store %arg35[%c32_161, %c0_162], %321 {strides = array<i32>} : memref<40x1024xf32, #tpu.memory_space<vmem>>, vector<5x5xf32>,
    %323 = vector.extract_strided_slice %311 {offsets = [0, 0], sizes = [5, 5], strides = [1, 1]} : vector<5x7xf32> to vector<5x5xf32>
    %c0_163 = arith.constant 0 : index
    %c128_164 = arith.constant 128 : index
    %324 = vector.load %arg35[%c0_163, %c128_164] : memref<40x1024xf32, #tpu.memory_space<vmem>>, vector<5x5xf32>
    tpu.vector_store %arg35[%c0_163, %c128_164], %323 {strides = array<i32>} : memref<40x1024xf32, #tpu.memory_space<vmem>>, vector<5x5xf32>,
    %325 = vector.extract_strided_slice %312 {offsets = [0, 0], sizes = [5, 5], strides = [1, 1]} : vector<5x7xf32> to vector<5x5xf32>
    %c8_165 = arith.constant 8 : index
    %c128_166 = arith.constant 128 : index
    %326 = vector.load %arg35[%c8_165, %c128_166] : memref<40x1024xf32, #tpu.memory_space<vmem>>, vector<5x5xf32>
    tpu.vector_store %arg35[%c8_165, %c128_166], %325 {strides = array<i32>} : memref<40x1024xf32, #tpu.memory_space<vmem>>, vector<5x5xf32>,
    %327 = vector.extract_strided_slice %311 {offsets = [0, 1], sizes = [5, 5], strides = [1, 1]} : vector<5x7xf32> to vector<5x5xf32>
    %c16_167 = arith.constant 16 : index
    %c128_168 = arith.constant 128 : index
    %328 = vector.load %arg35[%c16_167, %c128_168] : memref<40x1024xf32, #tpu.memory_space<vmem>>, vector<5x5xf32>
    tpu.vector_store %arg35[%c16_167, %c128_168], %327 {strides = array<i32>} : memref<40x1024xf32, #tpu.memory_space<vmem>>, vector<5x5xf32>,
    %329 = vector.extract_strided_slice %312 {offsets = [0, 1], sizes = [5, 5], strides = [1, 1]} : vector<5x7xf32> to vector<5x5xf32>
    %c24_169 = arith.constant 24 : index
    %c128_170 = arith.constant 128 : index
    %330 = vector.load %arg35[%c24_169, %c128_170] : memref<40x1024xf32, #tpu.memory_space<vmem>>, vector<5x5xf32>
    tpu.vector_store %arg35[%c24_169, %c128_170], %329 {strides = array<i32>} : memref<40x1024xf32, #tpu.memory_space<vmem>>, vector<5x5xf32>,
    %331 = vector.extract_strided_slice %311 {offsets = [0, 2], sizes = [5, 5], strides = [1, 1]} : vector<5x7xf32> to vector<5x5xf32>
    %c32_171 = arith.constant 32 : index
    %c128_172 = arith.constant 128 : index
    %332 = vector.load %arg35[%c32_171, %c128_172] : memref<40x1024xf32, #tpu.memory_space<vmem>>, vector<5x5xf32>
    tpu.vector_store %arg35[%c32_171, %c128_172], %331 {strides = array<i32>} : memref<40x1024xf32, #tpu.memory_space<vmem>>, vector<5x5xf32>,
    %c0_173 = arith.constant 0 : index
    %c0_174 = arith.constant 0 : index
    %333 = vector.load %arg14[%c0_173, %c0_174] : memref<5x40xf32, #tpu.memory_space<vmem>>, vector<5x40xf32>
    %c0_175 = arith.constant 0 : index
    %c0_176 = arith.constant 0 : index
    %334 = vector.load %arg35[%c0_175, %c0_176] : memref<40x1024xf32, #tpu.memory_space<vmem>>, vector<40x256xf32>
    %cst_177 = arith.constant dense<0.000000e+00> : vector<5x256xf32>
    %335 = tpu.matmul %333, %334, %cst_177 {dimension_numbers = #tpu.dot_dimension_numbers<[1], [0], [0], [1], [0, 0, 1, 1], [], []>} : vector<5x40xf32>, vector<40x256xf32>, vector<5x256xf32> -> vector<5x256xf32>
    %c0_178 = arith.constant 0 : index
    %c0_179 = arith.constant 0 : index
    %336 = vector.load %arg15[%c0_178, %c0_179] : memref<5x1xf32, #tpu.memory_space<vmem>>, vector<5x1xf32>
    %337 = vector.broadcast %336 : vector<5x1xf32> to vector<5x256xf32>
    %338 = arith.addf %335, %337 : vector<5x256xf32>
    %cst_180 = arith.constant 0.000000e+00 : f32
    %339 = vector.broadcast %cst_180 : f32 to vector<5x1xf32>
    %340 = vector.extract_strided_slice %338 {offsets = [0, 0], sizes = [5, 5], strides = [1, 1]} : vector<5x256xf32> to vector<5x5xf32>
    %cst_181 = arith.constant dense<0.000000e+00> : vector<5xf32>
    %341 = vector.multi_reduction <add>, %340, %cst_181 [1] : vector<5x5xf32> to vector<5xf32>
    %342 = vector.shape_cast %341 : vector<5xf32> to vector<5x1xf32>
    %343 = arith.addf %339, %342 : vector<5x1xf32>
    %344 = vector.extract_strided_slice %338 {offsets = [0, 128], sizes = [5, 5], strides = [1, 1]} : vector<5x256xf32> to vector<5x5xf32>
    %cst_182 = arith.constant dense<0.000000e+00> : vector<5xf32>
    %345 = vector.multi_reduction <add>, %344, %cst_182 [1] : vector<5x5xf32> to vector<5xf32>
    %346 = vector.shape_cast %345 : vector<5xf32> to vector<5x1xf32>
    %347 = arith.addf %343, %346 : vector<5x1xf32>
    %cst_183 = arith.constant 1.000000e+01 : f32
    %348 = vector.broadcast %cst_183 : f32 to vector<5x1xf32>
    %349 = arith.divf %347, %348 : vector<5x1xf32>
    %350 = vector.broadcast %349 : vector<5x1xf32> to vector<5x256xf32>
    %351 = arith.subf %338, %350 : vector<5x256xf32>
    %cst_184 = arith.constant 0.000000e+00 : f32
    %352 = vector.broadcast %cst_184 : f32 to vector<5x1xf32>
    %353 = vector.extract_strided_slice %351 {offsets = [0, 0], sizes = [5, 5], strides = [1, 1]} : vector<5x256xf32> to vector<5x5xf32>
    %354 = arith.mulf %353, %353 : vector<5x5xf32>
    %cst_185 = arith.constant dense<0.000000e+00> : vector<5xf32>
    %355 = vector.multi_reduction <add>, %354, %cst_185 [1] : vector<5x5xf32> to vector<5xf32>
    %356 = vector.shape_cast %355 : vector<5xf32> to vector<5x1xf32>
    %357 = arith.addf %352, %356 : vector<5x1xf32>
    %358 = vector.extract_strided_slice %351 {offsets = [0, 128], sizes = [5, 5], strides = [1, 1]} : vector<5x256xf32> to vector<5x5xf32>
    %359 = arith.mulf %358, %358 : vector<5x5xf32>
    %cst_186 = arith.constant dense<0.000000e+00> : vector<5xf32>
    %360 = vector.multi_reduction <add>, %359, %cst_186 [1] : vector<5x5xf32> to vector<5xf32>
    %361 = vector.shape_cast %360 : vector<5xf32> to vector<5x1xf32>
    %362 = arith.addf %357, %361 : vector<5x1xf32>
    %c0_187 = arith.constant 0 : index
    %c0_188 = arith.constant 0 : index
    %363 = vector.load %arg16[%c0_187, %c0_188] : memref<5x1xf32, #tpu.memory_space<vmem>>, vector<5x1xf32>
    %cst_189 = arith.constant 1.000000e+01 : f32
    %364 = vector.broadcast %cst_189 : f32 to vector<5x1xf32>
    %365 = arith.divf %362, %364 : vector<5x1xf32>
    %cst_190 = arith.constant 9.99999974E-6 : f32
    %366 = vector.broadcast %cst_190 : f32 to vector<5x1xf32>
    %367 = arith.addf %365, %366 : vector<5x1xf32>
    %368 = math.rsqrt %367 : vector<5x1xf32>
    %369 = arith.mulf %363, %368 : vector<5x1xf32>
    %370 = vector.broadcast %369 : vector<5x1xf32> to vector<5x256xf32>
    %371 = arith.mulf %351, %370 : vector<5x256xf32>
    %c0_191 = arith.constant 0 : index
    %c0_192 = arith.constant 0 : index
    %372 = vector.load %arg17[%c0_191, %c0_192] : memref<5x1xf32, #tpu.memory_space<vmem>>, vector<5x1xf32>
    %373 = vector.broadcast %372 : vector<5x1xf32> to vector<5x256xf32>
    %374 = arith.addf %371, %373 : vector<5x256xf32>
    %cst_193 = arith.constant 0.000000e+00 : f32
    %375 = vector.broadcast %cst_193 : f32 to vector<5x256xf32>
    %376 = arith.maximumf %374, %375 : vector<5x256xf32>
    %377 = tpu.iota {dimensions = array<i32: 0>} : vector<3x2xi32>
    %378 = tpu.iota {dimensions = array<i32: 1>} : vector<3x2xi32>
    %c2_i32_194 = arith.constant 2 : i32
    %379 = vector.broadcast %c2_i32_194 : i32 to vector<3x2xi32>
    %380 = arith.cmpi slt, %378, %379 : vector<3x2xi32>
    %c2_i32_195 = arith.constant 2 : i32
    %381 = vector.broadcast %c2_i32_195 : i32 to vector<3x2xi32>
    %382 = arith.muli %381, %378 : vector<3x2xi32>
    %c0_i32_196 = arith.constant 0 : i32
    %383 = vector.broadcast %c0_i32_196 : i32 to vector<3x2xi32>
    %384 = arith.addi %382, %383 : vector<3x2xi32>
    %c2_i32_197 = arith.constant 2 : i32
    %385 = vector.broadcast %c2_i32_197 : i32 to vector<3x2xi32>
    %386 = arith.subi %378, %385 : vector<3x2xi32>
    %c2_i32_198 = arith.constant 2 : i32
    %387 = vector.broadcast %c2_i32_198 : i32 to vector<3x2xi32>
    %388 = arith.muli %387, %386 : vector<3x2xi32>
    %c0_i32_199 = arith.constant 0 : i32
    %389 = vector.broadcast %c0_i32_199 : i32 to vector<3x2xi32>
    %390 = arith.addi %388, %389 : vector<3x2xi32>
    %391 = arith.select %380, %384, %390 : vector<3x2xi1>, vector<3x2xi32>
    %392 = arith.cmpi eq, %377, %391 : vector<3x2xi32>
    %cst_200 = arith.constant 1.000000e+00 : f32
    %cst_201 = arith.constant 0.000000e+00 : f32
    %393 = vector.broadcast %cst_200 : f32 to vector<3x2xf32>
    %394 = vector.broadcast %cst_201 : f32 to vector<3x2xf32>
    %395 = arith.select %392, %393, %394 : vector<3x2xi1>, vector<3x2xf32>
    %396 = vector.extract_strided_slice %376 {offsets = [0, 0], sizes = [5, 5], strides = [1, 1]} : vector<5x256xf32> to vector<5x5xf32>
    %397 = vector.extract_strided_slice %396 {offsets = [0, 0], sizes = [5, 3], strides = [1, 1]} : vector<5x5xf32> to vector<5x3xf32>
    %398 = vector.extract_strided_slice %396 {offsets = [0, 1], sizes = [5, 3], strides = [1, 1]} : vector<5x5xf32> to vector<5x3xf32>
    %399 = arith.maximumf %397, %398 : vector<5x3xf32>
    %400 = vector.extract_strided_slice %396 {offsets = [0, 2], sizes = [5, 3], strides = [1, 1]} : vector<5x5xf32> to vector<5x3xf32>
    %401 = arith.maximumf %399, %400 : vector<5x3xf32>
    %cst_202 = arith.constant dense<0.000000e+00> : vector<5x2xf32>
    %402 = tpu.matmul %401, %395, %cst_202 {dimension_numbers = #tpu.dot_dimension_numbers<[1], [0], [0], [1], [0, 0, 1, 1], [], []>} : vector<5x3xf32>, vector<3x2xf32>, vector<5x2xf32> -> vector<5x2xf32>
    %403 = vector.extract_strided_slice %376 {offsets = [0, 128], sizes = [5, 5], strides = [1, 1]} : vector<5x256xf32> to vector<5x5xf32>
    %404 = vector.extract_strided_slice %403 {offsets = [0, 0], sizes = [5, 3], strides = [1, 1]} : vector<5x5xf32> to vector<5x3xf32>
    %405 = vector.extract_strided_slice %403 {offsets = [0, 1], sizes = [5, 3], strides = [1, 1]} : vector<5x5xf32> to vector<5x3xf32>
    %406 = arith.maximumf %404, %405 : vector<5x3xf32>
    %407 = vector.extract_strided_slice %403 {offsets = [0, 2], sizes = [5, 3], strides = [1, 1]} : vector<5x5xf32> to vector<5x3xf32>
    %408 = arith.maximumf %406, %407 : vector<5x3xf32>
    %cst_203 = arith.constant dense<0.000000e+00> : vector<5x2xf32>
    %409 = tpu.matmul %408, %395, %cst_203 {dimension_numbers = #tpu.dot_dimension_numbers<[1], [0], [0], [1], [0, 0, 1, 1], [], []>} : vector<5x3xf32>, vector<3x2xf32>, vector<5x2xf32> -> vector<5x2xf32>
    %c0_204 = arith.constant 0 : index
    %c0_205 = arith.constant 0 : index
    %410 = vector.load %arg18[%c0_204, %c0_205] : memref<10x32xf32, #tpu.memory_space<vmem>>, vector<10x32xf32>
    %c0_206 = arith.constant 0 : index
    %c0_207 = arith.constant 0 : index
    %411 = vector.load %arg19[%c0_206, %c0_207] : memref<1x32xf32, #tpu.memory_space<vmem>>, vector<1x32xf32>
    %412 = vector.extract_strided_slice %402 {offsets = [0, 0], sizes = [1, 2], strides = [1, 1]} : vector<5x2xf32> to vector<1x2xf32>
    %413 = vector.extract_strided_slice %410 {offsets = [0, 0], sizes = [2, 32], strides = [1, 1]} : vector<10x32xf32> to vector<2x32xf32>
    %cst_208 = arith.constant dense<0.000000e+00> : vector<1x32xf32>
    %414 = tpu.matmul %412, %413, %cst_208 {dimension_numbers = #tpu.dot_dimension_numbers<[1], [0], [0], [1], [0, 0, 1, 1], [], []>} : vector<1x2xf32>, vector<2x32xf32>, vector<1x32xf32> -> vector<1x32xf32>
    %415 = arith.addf %411, %414 : vector<1x32xf32>
    %416 = vector.extract_strided_slice %402 {offsets = [1, 0], sizes = [1, 2], strides = [1, 1]} : vector<5x2xf32> to vector<1x2xf32>
    %417 = vector.extract_strided_slice %410 {offsets = [2, 0], sizes = [2, 32], strides = [1, 1]} : vector<10x32xf32> to vector<2x32xf32>
    %cst_209 = arith.constant dense<0.000000e+00> : vector<1x32xf32>
    %418 = tpu.matmul %416, %417, %cst_209 {dimension_numbers = #tpu.dot_dimension_numbers<[1], [0], [0], [1], [0, 0, 1, 1], [], []>} : vector<1x2xf32>, vector<2x32xf32>, vector<1x32xf32> -> vector<1x32xf32>
    %419 = arith.addf %415, %418 : vector<1x32xf32>
    %420 = vector.extract_strided_slice %402 {offsets = [2, 0], sizes = [1, 2], strides = [1, 1]} : vector<5x2xf32> to vector<1x2xf32>
    %421 = vector.extract_strided_slice %410 {offsets = [4, 0], sizes = [2, 32], strides = [1, 1]} : vector<10x32xf32> to vector<2x32xf32>
    %cst_210 = arith.constant dense<0.000000e+00> : vector<1x32xf32>
    %422 = tpu.matmul %420, %421, %cst_210 {dimension_numbers = #tpu.dot_dimension_numbers<[1], [0], [0], [1], [0, 0, 1, 1], [], []>} : vector<1x2xf32>, vector<2x32xf32>, vector<1x32xf32> -> vector<1x32xf32>
    %423 = arith.addf %419, %422 : vector<1x32xf32>
    %424 = vector.extract_strided_slice %402 {offsets = [3, 0], sizes = [1, 2], strides = [1, 1]} : vector<5x2xf32> to vector<1x2xf32>
    %425 = vector.extract_strided_slice %410 {offsets = [6, 0], sizes = [2, 32], strides = [1, 1]} : vector<10x32xf32> to vector<2x32xf32>
    %cst_211 = arith.constant dense<0.000000e+00> : vector<1x32xf32>
    %426 = tpu.matmul %424, %425, %cst_211 {dimension_numbers = #tpu.dot_dimension_numbers<[1], [0], [0], [1], [0, 0, 1, 1], [], []>} : vector<1x2xf32>, vector<2x32xf32>, vector<1x32xf32> -> vector<1x32xf32>
    %427 = arith.addf %423, %426 : vector<1x32xf32>
    %428 = vector.extract_strided_slice %402 {offsets = [4, 0], sizes = [1, 2], strides = [1, 1]} : vector<5x2xf32> to vector<1x2xf32>
    %429 = vector.extract_strided_slice %410 {offsets = [8, 0], sizes = [2, 32], strides = [1, 1]} : vector<10x32xf32> to vector<2x32xf32>
    %cst_212 = arith.constant dense<0.000000e+00> : vector<1x32xf32>
    %430 = tpu.matmul %428, %429, %cst_212 {dimension_numbers = #tpu.dot_dimension_numbers<[1], [0], [0], [1], [0, 0, 1, 1], [], []>} : vector<1x2xf32>, vector<2x32xf32>, vector<1x32xf32> -> vector<1x32xf32>
    %431 = arith.addf %427, %430 : vector<1x32xf32>
    %cst_213 = arith.constant 0.000000e+00 : f32
    %432 = vector.broadcast %cst_213 : f32 to vector<1x32xf32>
    %433 = arith.maximumf %431, %432 : vector<1x32xf32>
    %c0_214 = arith.constant 0 : index
    %c0_215 = arith.constant 0 : index
    %434 = vector.load %arg20[%c0_214, %c0_215] : memref<32x32xf32, #tpu.memory_space<vmem>>, vector<32x32xf32>
    %cst_216 = arith.constant dense<0.000000e+00> : vector<1x32xf32>
    %435 = tpu.matmul %433, %434, %cst_216 {dimension_numbers = #tpu.dot_dimension_numbers<[1], [0], [0], [1], [0, 0, 1, 1], [], []>} : vector<1x32xf32>, vector<32x32xf32>, vector<1x32xf32> -> vector<1x32xf32>
    %c0_217 = arith.constant 0 : index
    %c0_218 = arith.constant 0 : index
    %436 = vector.load %arg21[%c0_217, %c0_218] : memref<1x32xf32, #tpu.memory_space<vmem>>, vector<1x32xf32>
    %437 = arith.addf %435, %436 : vector<1x32xf32>
    %cst_219 = arith.constant 0.000000e+00 : f32
    %438 = vector.broadcast %cst_219 : f32 to vector<1x32xf32>
    %439 = arith.maximumf %437, %438 : vector<1x32xf32>
    %c0_220 = arith.constant 0 : index
    %c0_221 = arith.constant 0 : index
    %440 = vector.load %arg22[%c0_220, %c0_221] : memref<32x32xf32, #tpu.memory_space<vmem>>, vector<32x32xf32>
    %cst_222 = arith.constant dense<0.000000e+00> : vector<1x32xf32>
    %441 = tpu.matmul %439, %440, %cst_222 {dimension_numbers = #tpu.dot_dimension_numbers<[1], [0], [0], [1], [0, 0, 1, 1], [], []>} : vector<1x32xf32>, vector<32x32xf32>, vector<1x32xf32> -> vector<1x32xf32>
    %c0_223 = arith.constant 0 : index
    %c0_224 = arith.constant 0 : index
    %442 = vector.load %arg23[%c0_223, %c0_224] : memref<1x32xf32, #tpu.memory_space<vmem>>, vector<1x32xf32>
    %443 = arith.addf %441, %442 : vector<1x32xf32>
    %cst_225 = arith.constant 0.000000e+00 : f32
    %444 = vector.broadcast %cst_225 : f32 to vector<1x32xf32>
    %445 = arith.maximumf %443, %444 : vector<1x32xf32>
    %c0_226 = arith.constant 0 : index
    %c0_227 = arith.constant 0 : index
    %446 = vector.load %arg24[%c0_226, %c0_227] : memref<32x32xf32, #tpu.memory_space<vmem>>, vector<32x32xf32>
    %cst_228 = arith.constant dense<0.000000e+00> : vector<1x32xf32>
    %447 = tpu.matmul %445, %446, %cst_228 {dimension_numbers = #tpu.dot_dimension_numbers<[1], [0], [0], [1], [0, 0, 1, 1], [], []>} : vector<1x32xf32>, vector<32x32xf32>, vector<1x32xf32> -> vector<1x32xf32>
    %c0_229 = arith.constant 0 : index
    %c0_230 = arith.constant 0 : index
    %448 = vector.load %arg25[%c0_229, %c0_230] : memref<1x32xf32, #tpu.memory_space<vmem>>, vector<1x32xf32>
    %449 = arith.addf %447, %448 : vector<1x32xf32>
    %cst_231 = arith.constant 0.000000e+00 : f32
    %450 = vector.broadcast %cst_231 : f32 to vector<1x32xf32>
    %451 = arith.maximumf %449, %450 : vector<1x32xf32>
    %c0_232 = arith.constant 0 : index
    %c0_233 = arith.constant 0 : index
    %452 = vector.load %arg26[%c0_232, %c0_233] : memref<32x32xf32, #tpu.memory_space<vmem>>, vector<32x32xf32>
    %cst_234 = arith.constant dense<0.000000e+00> : vector<1x32xf32>
    %453 = tpu.matmul %451, %452, %cst_234 {dimension_numbers = #tpu.dot_dimension_numbers<[1], [0], [0], [1], [0, 0, 1, 1], [], []>} : vector<1x32xf32>, vector<32x32xf32>, vector<1x32xf32> -> vector<1x32xf32>
    %c0_235 = arith.constant 0 : index
    %c0_236 = arith.constant 0 : index
    %454 = vector.load %arg27[%c0_235, %c0_236] : memref<1x32xf32, #tpu.memory_space<vmem>>, vector<1x32xf32>
    %455 = arith.addf %453, %454 : vector<1x32xf32>
    %cst_237 = arith.constant 0.000000e+00 : f32
    %456 = vector.broadcast %cst_237 : f32 to vector<1x32xf32>
    %457 = arith.maximumf %455, %456 : vector<1x32xf32>
    %c0_238 = arith.constant 0 : index
    %c0_239 = arith.constant 0 : index
    %458 = vector.load %arg28[%c0_238, %c0_239] : memref<32x32xf32, #tpu.memory_space<vmem>>, vector<32x32xf32>
    %cst_240 = arith.constant dense<0.000000e+00> : vector<1x32xf32>
    %459 = tpu.matmul %457, %458, %cst_240 {dimension_numbers = #tpu.dot_dimension_numbers<[1], [0], [0], [1], [0, 0, 1, 1], [], []>} : vector<1x32xf32>, vector<32x32xf32>, vector<1x32xf32> -> vector<1x32xf32>
    %c0_241 = arith.constant 0 : index
    %c0_242 = arith.constant 0 : index
    %460 = vector.load %arg29[%c0_241, %c0_242] : memref<1x32xf32, #tpu.memory_space<vmem>>, vector<1x32xf32>
    %461 = arith.addf %459, %460 : vector<1x32xf32>
    %cst_243 = arith.constant 0.000000e+00 : f32
    %462 = vector.broadcast %cst_243 : f32 to vector<1x32xf32>
    %463 = arith.maximumf %461, %462 : vector<1x32xf32>
    %c0_244 = arith.constant 0 : index
    %c0_245 = arith.constant 0 : index
    %464 = vector.load %arg30[%c0_244, %c0_245] : memref<32x32xf32, #tpu.memory_space<vmem>>, vector<32x32xf32>
    %cst_246 = arith.constant dense<0.000000e+00> : vector<1x32xf32>
    %465 = tpu.matmul %463, %464, %cst_246 {dimension_numbers = #tpu.dot_dimension_numbers<[1], [0], [0], [1], [0, 0, 1, 1], [], []>} : vector<1x32xf32>, vector<32x32xf32>, vector<1x32xf32> -> vector<1x32xf32>
    %c0_247 = arith.constant 0 : index
    %c0_248 = arith.constant 0 : index
    %466 = vector.load %arg31[%c0_247, %c0_248] : memref<1x32xf32, #tpu.memory_space<vmem>>, vector<1x32xf32>
    %467 = arith.addf %465, %466 : vector<1x32xf32>
    %cst_249 = arith.constant 0.000000e+00 : f32
    %468 = vector.broadcast %cst_249 : f32 to vector<1x32xf32>
    %469 = arith.maximumf %467, %468 : vector<1x32xf32>
    %c0_250 = arith.constant 0 : index
    %c0_251 = arith.constant 0 : index
    %470 = vector.load %arg32[%c0_250, %c0_251] : memref<32x8xf32, #tpu.memory_space<vmem>>, vector<32x8xf32>
    %cst_252 = arith.constant dense<0.000000e+00> : vector<1x8xf32>
    %471 = tpu.matmul %469, %470, %cst_252 {dimension_numbers = #tpu.dot_dimension_numbers<[1], [0], [0], [1], [0, 0, 1, 1], [], []>} : vector<1x32xf32>, vector<32x8xf32>, vector<1x8xf32> -> vector<1x8xf32>
    %c0_253 = arith.constant 0 : index
    %c0_254 = arith.constant 0 : index
    %472 = vector.load %arg33[%c0_253, %c0_254] : memref<1x8xf32, #tpu.memory_space<vmem>>, vector<1x8xf32>
    %473 = arith.addf %471, %472 : vector<1x8xf32>
    %c0_255 = arith.constant 0 : index
    %c0_256 = arith.constant 0 : index
    %c0_257 = arith.constant 0 : index
    %474 = vector.load %arg34[%c0_255, %c0_256, %c0_257] : memref<2x1x8xf32, #tpu.memory_space<vmem>>, vector<1x1x8xf32>
    %475 = vector.shape_cast %474 : vector<1x1x8xf32> to vector<1x8xf32>
    %476 = vector.shape_cast %473 : vector<1x8xf32> to vector<1x1x8xf32>
    tpu.vector_store %arg34[%c0_255, %c0_256, %c0_257], %476 {strides = array<i32>} : memref<2x1x8xf32, #tpu.memory_space<vmem>>, vector<1x1x8xf32>,
    %c0_258 = arith.constant 0 : index
    %c0_259 = arith.constant 0 : index
    %477 = vector.load %arg19[%c0_258, %c0_259] : memref<1x32xf32, #tpu.memory_space<vmem>>, vector<1x32xf32>
    %478 = vector.extract_strided_slice %409 {offsets = [0, 0], sizes = [1, 2], strides = [1, 1]} : vector<5x2xf32> to vector<1x2xf32>
    %479 = vector.extract_strided_slice %410 {offsets = [0, 0], sizes = [2, 32], strides = [1, 1]} : vector<10x32xf32> to vector<2x32xf32>
    %cst_260 = arith.constant dense<0.000000e+00> : vector<1x32xf32>
    %480 = tpu.matmul %478, %479, %cst_260 {dimension_numbers = #tpu.dot_dimension_numbers<[1], [0], [0], [1], [0, 0, 1, 1], [], []>} : vector<1x2xf32>, vector<2x32xf32>, vector<1x32xf32> -> vector<1x32xf32>
    %481 = arith.addf %477, %480 : vector<1x32xf32>
    %482 = vector.extract_strided_slice %409 {offsets = [1, 0], sizes = [1, 2], strides = [1, 1]} : vector<5x2xf32> to vector<1x2xf32>
    %483 = vector.extract_strided_slice %410 {offsets = [2, 0], sizes = [2, 32], strides = [1, 1]} : vector<10x32xf32> to vector<2x32xf32>
    %cst_261 = arith.constant dense<0.000000e+00> : vector<1x32xf32>
    %484 = tpu.matmul %482, %483, %cst_261 {dimension_numbers = #tpu.dot_dimension_numbers<[1], [0], [0], [1], [0, 0, 1, 1], [], []>} : vector<1x2xf32>, vector<2x32xf32>, vector<1x32xf32> -> vector<1x32xf32>
    %485 = arith.addf %481, %484 : vector<1x32xf32>
    %486 = vector.extract_strided_slice %409 {offsets = [2, 0], sizes = [1, 2], strides = [1, 1]} : vector<5x2xf32> to vector<1x2xf32>
    %487 = vector.extract_strided_slice %410 {offsets = [4, 0], sizes = [2, 32], strides = [1, 1]} : vector<10x32xf32> to vector<2x32xf32>
    %cst_262 = arith.constant dense<0.000000e+00> : vector<1x32xf32>
    %488 = tpu.matmul %486, %487, %cst_262 {dimension_numbers = #tpu.dot_dimension_numbers<[1], [0], [0], [1], [0, 0, 1, 1], [], []>} : vector<1x2xf32>, vector<2x32xf32>, vector<1x32xf32> -> vector<1x32xf32>
    %489 = arith.addf %485, %488 : vector<1x32xf32>
    %490 = vector.extract_strided_slice %409 {offsets = [3, 0], sizes = [1, 2], strides = [1, 1]} : vector<5x2xf32> to vector<1x2xf32>
    %491 = vector.extract_strided_slice %410 {offsets = [6, 0], sizes = [2, 32], strides = [1, 1]} : vector<10x32xf32> to vector<2x32xf32>
    %cst_263 = arith.constant dense<0.000000e+00> : vector<1x32xf32>
    %492 = tpu.matmul %490, %491, %cst_263 {dimension_numbers = #tpu.dot_dimension_numbers<[1], [0], [0], [1], [0, 0, 1, 1], [], []>} : vector<1x2xf32>, vector<2x32xf32>, vector<1x32xf32> -> vector<1x32xf32>
    %493 = arith.addf %489, %492 : vector<1x32xf32>
    %494 = vector.extract_strided_slice %409 {offsets = [4, 0], sizes = [1, 2], strides = [1, 1]} : vector<5x2xf32> to vector<1x2xf32>
    %495 = vector.extract_strided_slice %410 {offsets = [8, 0], sizes = [2, 32], strides = [1, 1]} : vector<10x32xf32> to vector<2x32xf32>
    %cst_264 = arith.constant dense<0.000000e+00> : vector<1x32xf32>
    %496 = tpu.matmul %494, %495, %cst_264 {dimension_numbers = #tpu.dot_dimension_numbers<[1], [0], [0], [1], [0, 0, 1, 1], [], []>} : vector<1x2xf32>, vector<2x32xf32>, vector<1x32xf32> -> vector<1x32xf32>
    %497 = arith.addf %493, %496 : vector<1x32xf32>
    %cst_265 = arith.constant 0.000000e+00 : f32
    %498 = vector.broadcast %cst_265 : f32 to vector<1x32xf32>
    %499 = arith.maximumf %497, %498 : vector<1x32xf32>
    %c0_266 = arith.constant 0 : index
    %c0_267 = arith.constant 0 : index
    %500 = vector.load %arg20[%c0_266, %c0_267] : memref<32x32xf32, #tpu.memory_space<vmem>>, vector<32x32xf32>
    %cst_268 = arith.constant dense<0.000000e+00> : vector<1x32xf32>
    %501 = tpu.matmul %499, %500, %cst_268 {dimension_numbers = #tpu.dot_dimension_numbers<[1], [0], [0], [1], [0, 0, 1, 1], [], []>} : vector<1x32xf32>, vector<32x32xf32>, vector<1x32xf32> -> vector<1x32xf32>
    %c0_269 = arith.constant 0 : index
    %c0_270 = arith.constant 0 : index
    %502 = vector.load %arg21[%c0_269, %c0_270] : memref<1x32xf32, #tpu.memory_space<vmem>>, vector<1x32xf32>
    %503 = arith.addf %501, %502 : vector<1x32xf32>
    %cst_271 = arith.constant 0.000000e+00 : f32
    %504 = vector.broadcast %cst_271 : f32 to vector<1x32xf32>
    %505 = arith.maximumf %503, %504 : vector<1x32xf32>
    %c0_272 = arith.constant 0 : index
    %c0_273 = arith.constant 0 : index
    %506 = vector.load %arg22[%c0_272, %c0_273] : memref<32x32xf32, #tpu.memory_space<vmem>>, vector<32x32xf32>
    %cst_274 = arith.constant dense<0.000000e+00> : vector<1x32xf32>
    %507 = tpu.matmul %505, %506, %cst_274 {dimension_numbers = #tpu.dot_dimension_numbers<[1], [0], [0], [1], [0, 0, 1, 1], [], []>} : vector<1x32xf32>, vector<32x32xf32>, vector<1x32xf32> -> vector<1x32xf32>
    %c0_275 = arith.constant 0 : index
    %c0_276 = arith.constant 0 : index
    %508 = vector.load %arg23[%c0_275, %c0_276] : memref<1x32xf32, #tpu.memory_space<vmem>>, vector<1x32xf32>
    %509 = arith.addf %507, %508 : vector<1x32xf32>
    %cst_277 = arith.constant 0.000000e+00 : f32
    %510 = vector.broadcast %cst_277 : f32 to vector<1x32xf32>
    %511 = arith.maximumf %509, %510 : vector<1x32xf32>
    %c0_278 = arith.constant 0 : index
    %c0_279 = arith.constant 0 : index
    %512 = vector.load %arg24[%c0_278, %c0_279] : memref<32x32xf32, #tpu.memory_space<vmem>>, vector<32x32xf32>
    %cst_280 = arith.constant dense<0.000000e+00> : vector<1x32xf32>
    %513 = tpu.matmul %511, %512, %cst_280 {dimension_numbers = #tpu.dot_dimension_numbers<[1], [0], [0], [1], [0, 0, 1, 1], [], []>} : vector<1x32xf32>, vector<32x32xf32>, vector<1x32xf32> -> vector<1x32xf32>
    %c0_281 = arith.constant 0 : index
    %c0_282 = arith.constant 0 : index
    %514 = vector.load %arg25[%c0_281, %c0_282] : memref<1x32xf32, #tpu.memory_space<vmem>>, vector<1x32xf32>
    %515 = arith.addf %513, %514 : vector<1x32xf32>
    %cst_283 = arith.constant 0.000000e+00 : f32
    %516 = vector.broadcast %cst_283 : f32 to vector<1x32xf32>
    %517 = arith.maximumf %515, %516 : vector<1x32xf32>
    %c0_284 = arith.constant 0 : index
    %c0_285 = arith.constant 0 : index
    %518 = vector.load %arg26[%c0_284, %c0_285] : memref<32x32xf32, #tpu.memory_space<vmem>>, vector<32x32xf32>
    %cst_286 = arith.constant dense<0.000000e+00> : vector<1x32xf32>
    %519 = tpu.matmul %517, %518, %cst_286 {dimension_numbers = #tpu.dot_dimension_numbers<[1], [0], [0], [1], [0, 0, 1, 1], [], []>} : vector<1x32xf32>, vector<32x32xf32>, vector<1x32xf32> -> vector<1x32xf32>
    %c0_287 = arith.constant 0 : index
    %c0_288 = arith.constant 0 : index
    %520 = vector.load %arg27[%c0_287, %c0_288] : memref<1x32xf32, #tpu.memory_space<vmem>>, vector<1x32xf32>
    %521 = arith.addf %519, %520 : vector<1x32xf32>
    %cst_289 = arith.constant 0.000000e+00 : f32
    %522 = vector.broadcast %cst_289 : f32 to vector<1x32xf32>
    %523 = arith.maximumf %521, %522 : vector<1x32xf32>
    %c0_290 = arith.constant 0 : index
    %c0_291 = arith.constant 0 : index
    %524 = vector.load %arg28[%c0_290, %c0_291] : memref<32x32xf32, #tpu.memory_space<vmem>>, vector<32x32xf32>
    %cst_292 = arith.constant dense<0.000000e+00> : vector<1x32xf32>
    %525 = tpu.matmul %523, %524, %cst_292 {dimension_numbers = #tpu.dot_dimension_numbers<[1], [0], [0], [1], [0, 0, 1, 1], [], []>} : vector<1x32xf32>, vector<32x32xf32>, vector<1x32xf32> -> vector<1x32xf32>
    %c0_293 = arith.constant 0 : index
    %c0_294 = arith.constant 0 : index
    %526 = vector.load %arg29[%c0_293, %c0_294] : memref<1x32xf32, #tpu.memory_space<vmem>>, vector<1x32xf32>
    %527 = arith.addf %525, %526 : vector<1x32xf32>
    %cst_295 = arith.constant 0.000000e+00 : f32
    %528 = vector.broadcast %cst_295 : f32 to vector<1x32xf32>
    %529 = arith.maximumf %527, %528 : vector<1x32xf32>
    %c0_296 = arith.constant 0 : index
    %c0_297 = arith.constant 0 : index
    %530 = vector.load %arg30[%c0_296, %c0_297] : memref<32x32xf32, #tpu.memory_space<vmem>>, vector<32x32xf32>
    %cst_298 = arith.constant dense<0.000000e+00> : vector<1x32xf32>
    %531 = tpu.matmul %529, %530, %cst_298 {dimension_numbers = #tpu.dot_dimension_numbers<[1], [0], [0], [1], [0, 0, 1, 1], [], []>} : vector<1x32xf32>, vector<32x32xf32>, vector<1x32xf32> -> vector<1x32xf32>
    %c0_299 = arith.constant 0 : index
    %c0_300 = arith.constant 0 : index
    %532 = vector.load %arg31[%c0_299, %c0_300] : memref<1x32xf32, #tpu.memory_space<vmem>>, vector<1x32xf32>
    %533 = arith.addf %531, %532 : vector<1x32xf32>
    %cst_301 = arith.constant 0.000000e+00 : f32
    %534 = vector.broadcast %cst_301 : f32 to vector<1x32xf32>
    %535 = arith.maximumf %533, %534 : vector<1x32xf32>
    %c0_302 = arith.constant 0 : index
    %c0_303 = arith.constant 0 : index
    %536 = vector.load %arg32[%c0_302, %c0_303] : memref<32x8xf32, #tpu.memory_space<vmem>>, vector<32x8xf32>
    %cst_304 = arith.constant dense<0.000000e+00> : vector<1x8xf32>
    %537 = tpu.matmul %535, %536, %cst_304 {dimension_numbers = #tpu.dot_dimension_numbers<[1], [0], [0], [1], [0, 0, 1, 1], [], []>} : vector<1x32xf32>, vector<32x8xf32>, vector<1x8xf32> -> vector<1x8xf32>
    %c0_305 = arith.constant 0 : index
    %c0_306 = arith.constant 0 : index
    %538 = vector.load %arg33[%c0_305, %c0_306] : memref<1x8xf32, #tpu.memory_space<vmem>>, vector<1x8xf32>
    %539 = arith.addf %537, %538 : vector<1x8xf32>
    %c1_307 = arith.constant 1 : index
    %c0_308 = arith.constant 0 : index
    %c0_309 = arith.constant 0 : index
    %540 = vector.load %arg34[%c1_307, %c0_308, %c0_309] : memref<2x1x8xf32, #tpu.memory_space<vmem>>, vector<1x1x8xf32>
    %541 = vector.shape_cast %540 : vector<1x1x8xf32> to vector<1x8xf32>
    %542 = vector.shape_cast %539 : vector<1x8xf32> to vector<1x1x8xf32>
    tpu.vector_store %arg34[%c1_307, %c0_308, %c0_309], %542 {strides = array<i32>} : memref<2x1x8xf32, #tpu.memory_space<vmem>>, vector<1x1x8xf32>,
    return
  }
}

</mosaic_0001>

<bundles_post_ra>
// kernel: team_model_forward.1
= control target key start
LH: loop header
LB: loop body
LE: loop exit
PB: predicated region body
PF: predicated region fallthrough
CT: control target
= control target key end

     0   :  { %s5949_s6 = smov 1   ;;  %s5950_s10 = smov 2   ;;  %s7353_s0 = inlined_call_operand.smem [shape: u32[35], index: -1, kind: input, shape index: {}] }
   0x1   :  { %s6007_s5 = sld [smem:[%s7353_s0]]   ;;  %s5951_s14 = smov 3  }
   0x2   :  { %s6012_s9 = sld [smem:[%s7353_s0 + %s5949_s6]]   ;;  %s5952_s18 = smov 4  }
   0x3   :  { %s6017_s13 = sld [smem:[%s7353_s0 + %s5950_s10]]   ;;  %s5953_s22 = smov 5  }
   0x4   :  { %s6022_s17 = sld [smem:[%s7353_s0 + %s5951_s14]]   ;;  %s5954_s26 = smov 6  }
   0x5   :  { %s6027_s21 = sld [smem:[%s7353_s0 + %s5952_s18]]   ;;  %s5955_s30 = smov 7  }
   0x6   :  { %s6032_s25 = sld [smem:[%s7353_s0 + %s5953_s22]]   ;;  %s5956_s4 = smov 8  }
   0x7   :  { %s6037_s29 = sld [smem:[%s7353_s0 + %s5954_s26]]   ;;  %s5957_s10 = smov 9  }
   0x8   :  { %s6042_s3 = sld [smem:[%s7353_s0 + %s5955_s30]]   ;;  %s5958_s15 = smov 10  }
   0x9   :  { %s6047_s8 = sld [smem:[%s7353_s0 + %s5956_s4]]   ;;  %s5959_s20 = smov 11  }
   0xa   :  { %s6052_s14 = sld [smem:[%s7353_s0 + %s5957_s10]]   ;;  %s5960_s26 = smov 12  }
   0xb   :  { %s6057_s19 = sld [smem:[%s7353_s0 + %s5958_s15]]   ;;  %s5961_s1 = smov 13  }
   0xc   :  { %s6062_s24 = sld [smem:[%s7353_s0 + %s5959_s20]]   ;;  %s5962_s7 = smov 14  }
   0xd   :  { %s6067_s30 = sld [smem:[%s7353_s0 + %s5960_s26]]   ;;  %s5963_s15 = smov 15  }
   0xe   :  { %s6072_s6 = sld [smem:[%s7353_s0 + %s5961_s1]]   ;;  %s5964_s22 = smov 16  }
   0xf   :  { %s6077_s12 = sld [smem:[%s7353_s0 + %s5962_s7]]   ;;  %s5965_s28 = smov 17  }
  0x10   :  { %s6082_s20 = sld [smem:[%s7353_s0 + %s5963_s15]]   ;;  %s5966_s7 = smov 18  }
  0x11   :  { %s6087_s27 = sld [smem:[%s7353_s0 + %s5964_s22]]   ;;  %s5967_s15 = smov 19  }
  0x12   :  { %s6092_s4 = sld [smem:[%s7353_s0 + %s5965_s28]]   ;;  %s5968_s22 = smov 20  }
  0x13   :  { %s5969_s28 = smov 21  }
  0x15   :  { %7368 = sst [smem:[#allocation9_spill]] %s6077_s12 }
  0x16   :  { %7369 = sst [smem:[#allocation10_spill]] %s6082_s20 }
  0x17   :  { %7370 = sst [smem:[#allocation11_spill]] %s6087_s27 }
  0x18   :  { %7371 = sst [smem:[#allocation12_spill]] %s6092_s4 }
  0x19   :  { %s6097_s12 = sld [smem:[%s7353_s0 + %s5966_s7]]   ;;  %s5970_s7 = smov 22  }
  0x1a   :  { %s6102_s20 = sld [smem:[%s7353_s0 + %s5967_s15]]   ;;  %s5971_s15 = smov 23  }
  0x1b   :  { %s6107_s27 = sld [smem:[%s7353_s0 + %s5968_s22]]   ;;  %s5972_s22 = smov 24  }
  0x1c   :  { %s6112_s4 = sld [smem:[%s7353_s0 + %s5969_s28]]   ;;  %s5973_s28 = smov 25  }
  0x1f   :  { %7372 = sst [smem:[#allocation13_spill]] %s6097_s12 }
  0x20   :  { %7373 = sst [smem:[#allocation14_spill]] %s6102_s20 }
  0x21   :  { %7374 = sst [smem:[#allocation15_spill]] %s6107_s27 }
  0x22   :  { %7375 = sst [smem:[#allocation16_spill]] %s6112_s4 }
  0x23   :  { %s6117_s12 = sld [smem:[%s7353_s0 + %s5970_s7]]   ;;  %s5974_s7 = smov 26  }
  0x24   :  { %s6122_s20 = sld [smem:[%s7353_s0 + %s5971_s15]]   ;;  %s5975_s15 = smov 27  }
  0x25   :  { %s6127_s27 = sld [smem:[%s7353_s0 + %s5972_s22]]   ;;  %s5976_s22 = smov 28  }
  0x26   :  { %s6132_s4 = sld [smem:[%s7353_s0 + %s5973_s28]]   ;;  %s5977_s28 = smov 29  }
  0x29   :  { %7376 = sst [smem:[#allocation17_spill]] %s6117_s12 }
  0x2a   :  { %7377 = sst [smem:[#allocation18_spill]] %s6122_s20 }
  0x2b   :  { %7378 = sst [smem:[#allocation19_spill]] %s6127_s27 }
  0x2c   :  { %7379 = sst [smem:[#allocation20_spill]] %s6132_s4 }
  0x2d   :  { %s6137_s12 = sld [smem:[%s7353_s0 + %s5974_s7]]   ;;  %s5978_s7 = smov 30  }
  0x2e   :  { %s6142_s20 = sld [smem:[%s7353_s0 + %s5975_s15]]   ;;  %s5979_s15 = smov 31  }
  0x2f   :  { %s6147_s27 = sld [smem:[%s7353_s0 + %s5976_s22]]   ;;  %s5980_s22 = smov 32  }
  0x30   :  { %s6152_s4 = sld [smem:[%s7353_s0 + %s5977_s28]]   ;;  %s5981_s28 = smov 33  }
  0x33   :  { %7380 = sst [smem:[#allocation21_spill]] %s6137_s12 }
  0x34   :  { %7381 = sst [smem:[#allocation22_spill]] %s6142_s20 }
  0x35   :  { %7382 = sst [smem:[#allocation23_spill]] %s6147_s27 }
  0x36   :  { %7383 = sst [smem:[#allocation24_spill]] %s6152_s4 }
  0x37   :  { %s6157_s12 = sld [smem:[%s7353_s0 + %s5978_s7]]   ;;  %s5982_s7 = smov 34  }
  0x38   :  { %s6162_s20 = sld [smem:[%s7353_s0 + %s5979_s15]]  }
  0x39   :  { %s6167_s27 = sld [smem:[%s7353_s0 + %s5980_s22]]  }
  0x3a   :  { %s6172_s4 = sld [smem:[%s7353_s0 + %s5981_s28]]  }
  0x3d   :  { %7384 = sst [smem:[#allocation25_spill]] %s6157_s12 }
  0x3e   :  { %s6177_s12 = sld [smem:[%s7353_s0 + %s5982_s7]]  }
  0x3f   :  { %74 = vsyncpa [#allocation4], 0 }
  0x40   :  { %75 = vsyncpa [#allocation5], 0  ;;  %s5983_s15 = smov [#allocation3]   ;;  %s5901_s18 = scalar_lea.hbm %s6017_s13, 128 }
  0x41   :  { %s86_s16 = sshll.u32 %s5983_s15, 4  ;;  %p5902_p0 = scmp.ne.s32.totalorder %s6017_s13, %s5901_s18  ;;  %s87_s16 = int_to_ptr.vmem [resolvable:$true] %s86_s16 }
  0x42   :  { %p5905_p1 = scmp.lt.u32.totalorder %s5901_s18, %s6017_s13 }
  0x44   :  { %p5907_p2 = pnand %p5905_p1, %p5902_p0 }
  0x46   :  { %5910 = shalt.err (!%p5907_p2)
}
  0x47   :  { %s5911_s22 = scalar_lea.vmem %s87_s16, 128  ;;  %p5916_p4 = scmp.lt.s32.totalorder %s87_s16, %s87_s16 }
  0x48   :  { %p5912_p3 = scmp.ne.s32.totalorder %s87_s16, %s5911_s22  ;;  %p5917_p5 = scmp.lt.s32.totalorder %s5911_s22, %s5911_s22 }
  0x4a   :  { %p5918_p6 = por %p5917_p5, %p5916_p4 }
  0x4c   :  { %p5919_p7 = pnand %p5918_p6, %p5912_p3 }
  0x4e   :  { %5922 = shalt.err (!%p5919_p7)
}
  0x4f   :  { %89 = dma.hbm_to_vmem [thread:$0]  %s6017_s13, 128, %s87_s16, [#allocation4]  }
  0x50   :  { %5945 = dma.done.wait [#allocation4], 128  }
  0x51   :  { %5946 = vsyncadd [#allocation4], 4294967168  ;;  %v5984_v0 = vmov 0.0   ;;  %v201_v1 = vld [vmem:[%s6012_s9 + $0x8] sm:$0xff]  ;;  %v200_v3 = vld [vmem:[%s6012_s9] sm:$0xff]  ;;  %vm214_vm0 = vcmask 1027072  }
  0x52   :  { %165 = vst [vmem:[#allocation2 + $0x50] sm:$0xff] %v5984_v0  ;;  %155 = vst [vmem:[#allocation2] sm:$0xff] %v5984_v0  ;;  %477 = vmatprep.mubr.f32.mxu0 %v5984_v0  ;;  %548 = vmatprep.mubr.f32.mxu1 %v5984_v0  ;;  %v196_v2 = vld [vmem:[%s6007_s5 + $0x8] sm:$0xff]  ;;  %s5985_s0 = smov 127   ;;  %v195_v4 = vld [vmem:[%s6007_s5] sm:$0xff]  ;;  %v218_v5 = vcombine.high %v200_v3, %v200_v3  ;;  %v219_v6 = vcombine.high %v201_v1, %v201_v1  ;;  %v5987_v29 = vmov 0  }
  0x53   :  { %156 = vst [vmem:[#allocation2 + $0x8] sm:$0xff] %v5984_v0  ;;  %157 = vst [vmem:[#allocation2 + $0x10] sm:$0xff] %v5984_v0  ;;  %250 = vrot.lane.b32.xlu1 %v201_v1, %s5985_s0  ;;  %230 = vrot.lane.b32.xlu0 %v196_v2, %s5985_s0  ;;  %v208_v7 = vcombine.high %v196_v2, %v196_v2  ;;  %v4520_v8 = vld [vmem:[%s6007_s5 + $0x18] sm:$0xff]  ;;  %v207_v9 = vcombine.high %v195_v4, %v195_v4  ;;  %v4519_v10 = vld [vmem:[%s6007_s5 + $0x10] sm:$0xff]  ;;  %s5986_s5 = smov 126   ;;  %vm234_vm1 = vcmask 1039360  }
  0x54   :  { %158 = vst [vmem:[#allocation2 + $0x18] sm:$0xff] %v5984_v0  ;;  %159 = vst [vmem:[#allocation2 + $0x20] sm:$0xff] %v5984_v0  ;;  %v4522_v11 = vld [vmem:[%s6012_s9 + $0x18] sm:$0xff]  ;;  %v4521_v12 = vld [vmem:[%s6012_s9 + $0x10] sm:$0xff]  ;;  %v288_v13 = vcombine.high %v4520_v8, %v4520_v8  ;;  %v287_v14 = vcombine.high %v4519_v10, %v4519_v10  ;;  %5855 = vset.pattern.permute.xlu0 %v5987_v29  ;;  %5856 = vset.pattern.permute.xlu1 %v5987_v29  ;;  %vm273_vm2 = vcmask 1031168   ;;  %vm7367_vm3 = vcmask 326656  }
  0x55   :  { %160 = vst [vmem:[#allocation2 + $0x28] sm:$0xff] %v5984_v0  ;;  %161 = vst [vmem:[#allocation2 + $0x30] sm:$0xff] %v5984_v0  ;;  %v297_v15 = vcombine.high %v4521_v12, %v4521_v12  ;;  %v298_v16 = vcombine.high %v4522_v11, %v4522_v11  ;;  %v403_v30 = vld [vmem:[%s6022_s17] sm:$0x1f]  ;;  %vm697_vm4 = vcmask 1044480   ;;  %vm703_vm5 = vcmask 1028096  }
  0x56   :  { %162 = vst [vmem:[#allocation2 + $0x38] sm:$0xff] %v5984_v0  ;;  %163 = vst [vmem:[#allocation2 + $0x40] sm:$0xff] %v5984_v0  ;;  %s5990_s9 = smov 1   ;;  %s5993_s13 = smov 97  }
  0x57   :  { %164 = vst [vmem:[#allocation2 + $0x48] sm:$0xff] %v5984_v0  ;;  %166 = vst [vmem:[#allocation2 + $0x58] sm:$0xff] %v5984_v0  ;;  %246 = vrot.lane.b32.xlu1 %v200_v3, %s5985_s0  ;;  %226 = vrot.lane.b32.xlu0 %v195_v4, %s5985_s0  ;;  %s5994_s17 = smov 96   ;;  %s7400_s23 = sld [smem:[#allocation16_spill]] }
  0x58   :  { %167 = vst [vmem:[#allocation2 + $0x60] sm:$0xff] %v5984_v0  ;;  %168 = vst [vmem:[#allocation2 + $0x68] sm:$0xff] %v5984_v0  ;;  %s7401_s26 = sld [smem:[#allocation19_spill]]  ;;  %s7402_s28 = sld [smem:[#allocation21_spill]] }
  0x59   :  { %169 = vst [vmem:[#allocation2 + $0x70] sm:$0xff] %v5984_v0  ;;  %170 = vst [vmem:[#allocation2 + $0x78] sm:$0xff] %v5984_v0  ;;  %s7403_s1 = sld [smem:[#allocation18_spill]]  ;;  %s7404_s2 = sld [smem:[#allocation23_spill]] }
  0x5a   :  { %171 = vst [vmem:[#allocation2 + $0x80] sm:$0xff] %v5984_v0  ;;  %172 = vst [vmem:[#allocation2 + $0x88] sm:$0xff] %v5984_v0  ;;  %s7405_s7 = sld [smem:[#allocation20_spill]]  ;;  %s7406_s10 = sld [smem:[#allocation25_spill]] }
  0x5b   :  { %173 = vst [vmem:[#allocation2 + $0x90] sm:$0xff] %v5984_v0  ;;  %174 = vst [vmem:[#allocation2 + $0x98] sm:$0xff] %v5984_v0  ;;  %248 = vrot.lane.b32.xlu1 %v218_v5, %s5985_s0  ;;  %228 = vrot.lane.b32.xlu0 %v207_v9, %s5985_s0  ;;  %s7407_s11 = sld [smem:[#allocation22_spill]]  ;;  %s7408_s15 = sld [smem:[#allocation24_spill]] }
  0x5c   :  { %175 = vst [vmem:[#allocation2 + $0xa0] sm:$0xff] %v5984_v0  ;;  %176 = vst [vmem:[#allocation2 + $0xa8] sm:$0xff] %v5984_v0 }
  0x5d   :  { %177 = vst [vmem:[#allocation2 + $0xb0] sm:$0xff] %v5984_v0  ;;  %178 = vst [vmem:[#allocation2 + $0xb8] sm:$0xff] %v5984_v0 }
  0x5e   :  { %179 = vst [vmem:[#allocation2 + $0xc0] sm:$0xff] %v5984_v0  ;;  %180 = vst [vmem:[#allocation2 + $0xc8] sm:$0xff] %v5984_v0 }
  0x5f   :  { %181 = vst [vmem:[#allocation2 + $0xd0] sm:$0xff] %v5984_v0  ;;  %182 = vst [vmem:[#allocation2 + $0xd8] sm:$0xff] %v5984_v0  ;;  %252 = vrot.lane.b32.xlu1 %v219_v6, %s5985_s0  ;;  %232 = vrot.lane.b32.xlu0 %v208_v7, %s5985_s0 }
  0x60   :  { %183 = vst [vmem:[#allocation2 + $0xe0] sm:$0xff] %v5984_v0  ;;  %184 = vst [vmem:[#allocation2 + $0xe8] sm:$0xff] %v5984_v0 }
  0x61   :  { %185 = vst [vmem:[#allocation2 + $0xf0] sm:$0xff] %v5984_v0  ;;  %186 = vst [vmem:[#allocation2 + $0xf8] sm:$0xff] %v5984_v0 }
  0x62   :  { %187 = vst [vmem:[#allocation2 + $0x100] sm:$0xff] %v5984_v0  ;;  %188 = vst [vmem:[#allocation2 + $0x108] sm:$0xff] %v5984_v0 }
  0x63   :  { %189 = vst [vmem:[#allocation2 + $0x110] sm:$0xff] %v5984_v0  ;;  %190 = vst [vmem:[#allocation2 + $0x118] sm:$0xff] %v5984_v0  ;;  %269 = vrot.lane.b32.xlu1 %v196_v2, %s5986_s5  ;;  %267 = vrot.lane.b32.xlu0 %v207_v9, %s5986_s5 }
  0x64   :  { %191 = vst [vmem:[#allocation2 + $0x120] sm:$0xff] %v5984_v0  ;;  %192 = vst [vmem:[#allocation2 + $0x128] sm:$0xff] %v5984_v0 }
  0x65   :  { %193 = vst [vmem:[#allocation2 + $0x130] sm:$0xff] %v5984_v0  ;;  %194 = vst [vmem:[#allocation2 + $0x138] sm:$0xff] %v5984_v0 }
  0x66   :  { %224 = vst [vmem:[#allocation2 + $0x50] sm:$0xf] %v201_v1  ;;  %213 = vst [vmem:[#allocation2 + $0x10] sm:$0xf] %v196_v2 }
  0x67   :  { %222 = vst [vmem:[#allocation2 + $0x40] sm:$0xf] %v200_v3  ;;  %211 = vst [vmem:[#allocation2] sm:$0xf] %v195_v4  ;;  %271 = vrot.lane.b32.xlu1 %v208_v7, %s5986_s5  ;;  %265 = vrot.lane.b32.xlu0 %v195_v4, %s5986_s5 }
  0x68   :  { %293 = vst [vmem:[#allocation2 + $0x30] sm:$0xf] %v4520_v8  ;;  %223 = vst [vmem:[#allocation2 + $0x48] sm:$0xf] %v218_v5 }
  0x69   :  { %225 = vst.msk [vmem:[#allocation2 + $0x58] sm:$0xf] %vm214_vm0, %v219_v6  ;;  %215 = vst.msk [vmem:[#allocation2 + $0x18] sm:$0xf] %vm214_vm0, %v208_v7 }
  0x6a   :  { %291 = vst [vmem:[#allocation2 + $0x20] sm:$0xf] %v4519_v10  ;;  %303 = vst [vmem:[#allocation2 + $0x70] sm:$0xf] %v4522_v11 }
  0x6b   :  { %301 = vst [vmem:[#allocation2 + $0x60] sm:$0xf] %v4521_v12  ;;  %212 = vst [vmem:[#allocation2 + $0x8] sm:$0xf] %v207_v9  ;;  %309 = vrot.lane.b32.xlu1 %v4520_v8, %s5985_s0  ;;  %307 = vrot.lane.b32.xlu0 %v287_v14, %s5985_s0 }
  0x6c   :  { %294 = vst.msk [vmem:[#allocation2 + $0x38] sm:$0xf] %vm214_vm0, %v288_v13  ;;  %292 = vst [vmem:[#allocation2 + $0x28] sm:$0xf] %v287_v14 }
  0x6d   :  { %302 = vst [vmem:[#allocation2 + $0x68] sm:$0xf] %v297_v15  ;;  %304 = vst.msk [vmem:[#allocation2 + $0x78] sm:$0xf] %vm214_vm0, %v298_v16  ;;  %v365_v18 = vld [vmem:[#allocation2 + $0x10] sm:$0xff] }
  0x6e   :  { %v371_v17 = vld [vmem:[#allocation2 + $0x40] sm:$0xff]  ;;  %v373_v19 = vld [vmem:[#allocation2 + $0x50] sm:$0xff] }
  0x6f   :  { %v363_v20 = vld [vmem:[#allocation2] sm:$0xff]  ;;  %v372_v21 = vld [vmem:[#allocation2 + $0x48] sm:$0xff]  ;;  %v5329_v27 = vpack.c.bf16 %v373_v19, %v365_v18  ;;  %328 = vrot.lane.b32.xlu1 %v4522_v11, %s5985_s0  ;;  %326 = vrot.lane.b32.xlu0 %v297_v15, %s5985_s0 }
  0x70   :  { %v366_v22 = vld [vmem:[#allocation2 + $0x18] sm:$0xff]  ;;  %v5321_v25 = vpack.c.bf16 %v371_v17, %v363_v20  ;;  %v6275_v17 = vld [vmem:[#allocation3] sm:$0x1f] }
  0x71   :  { %v374_v23 = vld [vmem:[#allocation2 + $0x58] sm:$0xff]  ;;  %v367_v5 = vld [vmem:[#allocation2 + $0x20] sm:$0xff] }
  0x72   :  { %v364_v24 = vld [vmem:[#allocation2 + $0x8] sm:$0xff]  ;;  %v5327_v26 = vpack.c.bf16 %v374_v23, %v366_v22  ;;  %v375_v6 = vld [vmem:[#allocation2 + $0x60] sm:$0xff] }
  0x73   :  { %v5319_v28 = vpack.c.bf16 %v372_v21, %v364_v24  ;;  %324 = vrot.lane.b32.xlu1 %v4521_v12, %s5985_s0  ;;  %305 = vrot.lane.b32.xlu0 %v4519_v10, %s5985_s0  ;;  %v368_v1 = vld [vmem:[#allocation2 + $0x28] sm:$0xff]  ;;  %v370_v9 = vld [vmem:[#allocation2 + $0x38] sm:$0xff]  ;;  %v369_v12 = vld [vmem:[#allocation2 + $0x30] sm:$0xff]  ;;  %v5337_v18 = vpack.c.bf16 %v375_v6, %v367_v5 }
  0x74   :  { %5328 = vmatprep.subr.bf16.mxu1 %v5327_v26  ;;  %v376_v4 = vld [vmem:[#allocation2 + $0x68] sm:$0xff] }
  0x75   :  { %5320 = vmatprep.subr.bf16.mxu0 %v5319_v28  ;;  %5330 = vmatpush1.bf16.msra.mxu1 %v5329_v27  ;;  %v5335_v11 = vpack.c.bf16 %v376_v4, %v368_v1 }
  0x76   :  { %5322 = vmatpush1.bf16.msra.mxu0 %v5321_v25 }
  0x77   :  { %330 = vrot.lane.b32.xlu1 %v298_v16, %s5985_s0  ;;  %311 = vrot.lane.b32.xlu0 %v288_v13, %s5985_s0 }
  0x7b   :  { %347 = vrot.lane.b32.xlu1 %v4520_v8, %s5986_s5  ;;  %345 = vrot.lane.b32.xlu0 %v287_v14, %s5986_s5 }
  0x7f   :  { %349 = vrot.lane.b32.xlu1 %v288_v13, %s5986_s5  ;;  %343 = vrot.lane.b32.xlu0 %v4519_v10, %s5986_s5  ;;  %v378_v10 = vld [vmem:[#allocation2 + $0x78] sm:$0xff]  ;;  %v377_v13 = vld [vmem:[#allocation2 + $0x70] sm:$0xff] }
  0x80   :  { %v5343_v19 = vpack.c.bf16 %v378_v10, %v370_v9  ;;  %v5345_v23 = vpack.c.bf16 %v377_v13, %v369_v12 }
  0x83   :  { %406 = vperm.xlu0 %5855, %v403_v30  }
  0xc5   :  { %v251_v31 = vpop.permute.xlu1 %250  ;;  %v231_v32 = vpop.permute.xlu0 %230 }
  0xc9   :  { %v247_v33 = vpop.permute.xlu1 %246  ;;  %v227_v34 = vpop.permute.xlu0 %226 }
  0xcd   :  { %v249_v35 = vpop.permute.xlu1 %248  ;;  %v229_v36 = vpop.permute.xlu0 %228 }
  0xce   :  { %v254_v37 = vsel %vm234_vm1, %v247_v33, %v249_v35  ;;  %v255_v38 = vsel %vm234_vm1, %v249_v35, %v251_v31  ;;  %v235_v39 = vsel %vm234_vm1, %v227_v34, %v229_v36  ;;  %v236_v40 = vsel %vm234_vm1, %v229_v36, %v231_v32 }
  0xcf   :  { %261 = vst [vmem:[#allocation2 + $0xc0] sm:$0xf] %v254_v37  ;;  %262 = vst [vmem:[#allocation2 + $0xc8] sm:$0xf] %v255_v38 }
  0xd0   :  { %242 = vst [vmem:[#allocation2 + $0x80] sm:$0xf] %v235_v39  ;;  %243 = vst [vmem:[#allocation2 + $0x88] sm:$0xf] %v236_v40 }
  0xd1   :  { %v253_v41 = vpop.permute.xlu1 %252  ;;  %v233_v42 = vpop.permute.xlu0 %232 }
  0xd2   :  { %v256_v43 = vsel %vm234_vm1, %v251_v31, %v253_v41  ;;  %264 = vst.msk [vmem:[#allocation2 + $0xd8] sm:$0xf] %vm214_vm0, %v253_v41  ;;  %v237_v44 = vsel %vm234_vm1, %v231_v32, %v233_v42  ;;  %245 = vst.msk [vmem:[#allocation2 + $0x98] sm:$0xf] %vm214_vm0, %v233_v42 }
  0xd3   :  { %263 = vst [vmem:[#allocation2 + $0xd0] sm:$0xf] %v256_v43  ;;  %244 = vst [vmem:[#allocation2 + $0x90] sm:$0xf] %v237_v44 }
  0xd5   :  { %v270_v45 = vpop.permute.xlu1 %269  ;;  %v268_v46 = vpop.permute.xlu0 %267 }
  0xd6   :  { %v275_v47 = vsel %vm273_vm2, %v268_v46, %v270_v45  ;;  %v388_v49 = vld [vmem:[#allocation2 + $0xc8] sm:$0xff]  ;;  %v387_v52 = vld [vmem:[#allocation2 + $0xc0] sm:$0xff] }
  0xd7   :  { %v380_v48 = vld [vmem:[#allocation2 + $0x88] sm:$0xff]  ;;  %v379_v50 = vld [vmem:[#allocation2 + $0x80] sm:$0xff]  ;;  %282 = vst [vmem:[#allocation2 + $0x108] sm:$0xf] %v275_v47 }
  0xd8   :  { %v5323_v51 = vpack.c.bf16 %v388_v49, %v380_v48  ;;  %v5325_v53 = vpack.c.bf16 %v387_v52, %v379_v50 }
  0xd9   :  { %v272_v54 = vpop.permute.xlu1 %271  ;;  %v266_v55 = vpop.permute.xlu0 %265  ;;  %v382_v56 = vld [vmem:[#allocation2 + $0x98] sm:$0xff] }
  0xda   :  { %5324 = vmatprep.subr.bf16.mxu0 %v5323_v51  ;;  %v390_v57 = vld [vmem:[#allocation2 + $0xd8] sm:$0xff]  ;;  %v276_v58 = vsel %vm273_vm2, %v270_v45, %v272_v54  ;;  %284 = vst.msk [vmem:[#allocation2 + $0x118] sm:$0xf] %vm214_vm0, %v272_v54  ;;  %v274_v59 = vsel %vm273_vm2, %v266_v55, %v268_v46  ;;  %v381_v61 = vld [vmem:[#allocation2 + $0x90] sm:$0xff] }
  0xdb   :  { %5326 = vmatpush1.bf16.msra.mxu0 %v5325_v53  ;;  %v5331_v60 = vpack.c.bf16 %v390_v57, %v382_v56  ;;  %v389_v62 = vld [vmem:[#allocation2 + $0xd0] sm:$0xff]  ;;  %283 = vst [vmem:[#allocation2 + $0x110] sm:$0xf] %v276_v58  ;;  %281 = vst [vmem:[#allocation2 + $0x100] sm:$0xf] %v274_v59 }
  0xdc   :  { %v5333_v63 = vpack.c.bf16 %v389_v62, %v381_v61 }
  0xdd   :  { %5332 = vmatprep.subr.bf16.mxu1 %v5331_v60  ;;  %v310_v2 = vpop.permute.xlu1 %309  ;;  %v308_v3 = vpop.permute.xlu0 %307 }
  0xde   :  { %5334 = vmatpush1.bf16.msra.mxu1 %v5333_v63  ;;  %v314_v7 = vsel %vm234_vm1, %v308_v3, %v310_v2  ;;  %v396_v8 = vld [vmem:[#allocation2 + $0x108] sm:$0xff] }
  0xdf   :  { %321 = vst [vmem:[#allocation2 + $0xa8] sm:$0xf] %v314_v7  ;;  %421 = vmatprep.subr.mxu0 %v396_v8 }
  0xe1   :  { %v329_v14 = vpop.permute.xlu1 %328  ;;  %v327_v15 = vpop.permute.xlu0 %326  ;;  %v398_v16 = vld [vmem:[#allocation2 + $0x118] sm:$0xff] }
  0xe2   :  { %v333_v20 = vsel %vm234_vm1, %v327_v15, %v329_v14  ;;  %492 = vmatprep.subr.mxu1 %v398_v16  ;;  %v395_v21 = vld [vmem:[#allocation2 + $0x100] sm:$0xff]  ;;  %v397_v22 = vld [vmem:[#allocation2 + $0x110] sm:$0xff] }
  0xe3   :  { %340 = vst [vmem:[#allocation2 + $0xe8] sm:$0xf] %v333_v20  ;;  %422 = vmatpush1.msra.mxu0 %v395_v21  ;;  %493 = vmatpush1.msra.mxu1 %v397_v22 }
  0xe4   :  { %5336 = vmatprep.subr.bf16.mxu0 %v5335_v11  ;;  %4523 = vmatmul.mubr.msk.f32.vlgmr.msra.gmra.mrb[0].mxu0 %vm7367_vm3, %v6275_v17 }
  0xe5   :  { %v325_v24 = vpop.permute.xlu1 %324  ;;  %v306_v25 = vpop.permute.xlu0 %305  ;;  %5338 = vmatpush1.bf16.msra.mxu0 %v5337_v18  ;;  %5344 = vmatprep.subr.bf16.mxu1 %v5343_v19 }
  0xe6   :  { %v332_v26 = vsel %vm234_vm1, %v325_v24, %v327_v15  ;;  %v313_v27 = vsel %vm234_vm1, %v306_v25, %v308_v3  ;;  %4524 = vmatmul.mubr.msk.f32.vlgmr.msra.gmra.mrb[0].mxu1 %vm7367_vm3, %v6275_v17  ;;  %619 = vmatprep.mubr.f32.mxu0 %v5984_v0  ;;  %v384_v32 = vld [vmem:[#allocation2 + $0xa8] sm:$0xff] }
  0xe7   :  { %339 = vst [vmem:[#allocation2 + $0xe0] sm:$0xf] %v332_v26  ;;  %320 = vst [vmem:[#allocation2 + $0xa0] sm:$0xf] %v313_v27  ;;  %5346 = vmatpush1.bf16.msra.mxu1 %v5345_v23  ;;  %690 = vmatprep.mubr.f32.mxu1 %v5984_v0 }
  0xe9   :  { %v331_v28 = vpop.permute.xlu1 %330  ;;  %v312_v29 = vpop.permute.xlu0 %311 }
  0xea   :  { %v334_v30 = vsel %vm234_vm1, %v329_v14, %v331_v28  ;;  %342 = vst.msk [vmem:[#allocation2 + $0xf8] sm:$0xf] %vm214_vm0, %v331_v28  ;;  %v315_v31 = vsel %vm234_vm1, %v310_v2, %v312_v29  ;;  %323 = vst.msk [vmem:[#allocation2 + $0xb8] sm:$0xf] %vm214_vm0, %v312_v29  ;;  %v392_v33 = vld [vmem:[#allocation2 + $0xe8] sm:$0xff] }
  0xeb   :  { %341 = vst [vmem:[#allocation2 + $0xf0] sm:$0xf] %v334_v30  ;;  %322 = vst [vmem:[#allocation2 + $0xb0] sm:$0xf] %v315_v31  ;;  %v5339_v34 = vpack.c.bf16 %v392_v33, %v384_v32 }
  0xed   :  { %v348_v35 = vpop.permute.xlu1 %347  ;;  %v346_v36 = vpop.permute.xlu0 %345  ;;  %5340 = vmatprep.subr.bf16.mxu0 %v5339_v34 }
  0xee   :  { %v352_v37 = vsel %vm273_vm2, %v346_v36, %v348_v35  ;;  %v383_v38 = vld [vmem:[#allocation2 + $0xa0] sm:$0xff] }
  0xef   :  { %v391_v39 = vld [vmem:[#allocation2 + $0xe0] sm:$0xff]  ;;  %359 = vst [vmem:[#allocation2 + $0x128] sm:$0xf] %v352_v37 }
  0xf0   :  { %v5341_v40 = vpack.c.bf16 %v391_v39, %v383_v38 }
  0xf1   :  { %v350_v41 = vpop.permute.xlu1 %349  ;;  %v344_v42 = vpop.permute.xlu0 %343  ;;  %v386_v43 = vld [vmem:[#allocation2 + $0xb8] sm:$0xff] }
  0xf2   :  { %5342 = vmatpush1.bf16.msra.mxu0 %v5341_v40  ;;  %v394_v44 = vld [vmem:[#allocation2 + $0xf8] sm:$0xff]  ;;  %v353_v45 = vsel %vm273_vm2, %v348_v35, %v350_v41  ;;  %361 = vst.msk [vmem:[#allocation2 + $0x138] sm:$0xf] %vm214_vm0, %v350_v41  ;;  %v351_v46 = vsel %vm273_vm2, %v344_v42, %v346_v36  ;;  %v385_v48 = vld [vmem:[#allocation2 + $0xb0] sm:$0xff] }
  0xf3   :  { %v5347_v47 = vpack.c.bf16 %v394_v44, %v386_v43  ;;  %v393_v49 = vld [vmem:[#allocation2 + $0xf0] sm:$0xff]  ;;  %360 = vst [vmem:[#allocation2 + $0x130] sm:$0xf] %v353_v45  ;;  %358 = vst [vmem:[#allocation2 + $0x120] sm:$0xf] %v351_v46 }
  0xf4   :  { %v5349_v50 = vpack.c.bf16 %v393_v49, %v385_v48 }
  0xf5   :  { %5348 = vmatprep.subr.bf16.mxu1 %v5347_v47 }
  0xf6   :  { %5350 = vmatpush1.bf16.msra.mxu1 %v5349_v50  ;;  %v400_v51 = vld [vmem:[#allocation2 + $0x128] sm:$0xff] }
  0xf7   :  { %563 = vmatprep.subr.mxu0 %v400_v51 }
  0xf9   :  { %v402_v52 = vld [vmem:[#allocation2 + $0x138] sm:$0xff] }
  0xfa   :  { %634 = vmatprep.subr.mxu1 %v402_v52  ;;  %v399_v53 = vld [vmem:[#allocation2 + $0x120] sm:$0xff]  ;;  %v401_v54 = vld [vmem:[#allocation2 + $0x130] sm:$0xff] }
  0xfb   :  { %564 = vmatpush1.msra.mxu0 %v399_v53  ;;  %635 = vmatpush1.msra.mxu1 %v401_v54 }
  0xfc   :  { %4525 = vmatmul.mubr.msk.f32.vlgmr.msra.gmra.mrb[2].mxu0 %vm7367_vm3, %v6275_v17  ;;  %4526 = vmatmul.mubr.msk.f32.vlgmr.msra.gmra.mrb[2].mxu1 %vm7367_vm3, %v6275_v17 }
 0x102   :  { %v407_v55 = vpop.permute.xlu0 %406 }
 0x1b7   :  { %v479_v56 = vpop.f32.mrb[0].mxu0 }
 0x1b8   :  { %v480_v57 = vadd.f32 %v479_v56, %v407_v55  ;;  %v481_v58 = vpop.f32.mrb[1].mxu0 }
 0x1b9   :  { %v482_v59 = vadd.f32 %v481_v58, %v407_v55  ;;  %v550_v60 = vpop.f32.mrb[0].mxu1 }
 0x1ba   :  { %v698_v61 = vsel %vm697_vm4, %v480_v57, 0.0  ;;  %v551_v62 = vadd.f32 %v550_v60, %v407_v55  ;;  %v552_v63 = vpop.f32.mrb[1].mxu1 }
 0x1bb   :  { %v699_v1 = vsel %vm697_vm4, %v482_v59, 0.0  ;;  %v553_v2 = vadd.f32 %v552_v63, %v407_v55  ;;  %v757_v63 = vld [vmem:[%s6027_s21] sm:$0x1f]  ;;  %s7391_s21 = sld [smem:[#allocation10_spill]] }
 0x1bc   :  { %v700_v3 = vadd.f32 %v699_v1, %v698_v61  ;;  %v701_v4 = vsel %vm697_vm4, %v551_v62, 0.0 }
 0x1bd   :  { %v704_v5 = vsel %vm703_vm5, %v553_v2, 0.0 }
 0x1be   :  { %v702_v6 = vadd.f32 %v701_v4, %v700_v3  ;;  %v797_v3 = vlaneseq }
 0x1c0   :  { %v705_v7 = vadd.f32 %v704_v5, %v702_v6  ;;  %v6348_v4 = vand.u32 127, %v797_v3  ;;  %v6350_v5 = vshrl.u32 %v797_v3, 7 }
 0x1c2   :  { %706 = vadd.xlane.f32.xlu1 %v705_v7  ;;  %v864_v6 = vadd.s32 128, %v6348_v4  ;;  %v4527_v7 = vadd.s32 4294967169, %v6348_v4  ;;  %vm865_vm6 = vcmp.lt.s32.totalorder %v6348_v4, 127 }
 0x1cf   :  { %v621_v8 = vpop.f32.mrb[2].mxu0  ;;  %v692_v9 = vpop.f32.mrb[2].mxu1 }
 0x1d0   :  { %v622_v10 = vadd.f32 %v621_v8, %v407_v55  ;;  %v623_v11 = vpop.f32.mrb[3].mxu0  ;;  %v694_v12 = vpop.f32.mrb[3].mxu1  ;;  %v693_v13 = vadd.f32 %v692_v9, %v407_v55  ;;  %v4528_v8 = vadd.s32 4294967169, %v864_v6  ;;  %v6355_v9 = vmul.u32 4, %v6348_v4 }
 0x1d1   :  { %v624_v14 = vadd.f32 %v623_v11, %v407_v55  ;;  %v695_v17 = vadd.f32 %v694_v12, %v407_v55  ;;  %v6358_v11 = vadd.s32 8, %v6350_v5 }
 0x1d2   :  { %v709_v15 = vsel %vm697_vm4, %v622_v10, 0.0  ;;  %v712_v19 = vsel %vm697_vm4, %v693_v13, 0.0  ;;  %v872_v12 = vmul.u32 4, %v4528_v8  ;;  %v826_v8 = vadd.s32 224, %v6350_v5 }
 0x1d3   :  { %v710_v16 = vsel %vm697_vm4, %v624_v14, 0.0  ;;  %v714_v21 = vsel %vm703_vm5, %v695_v17, 0.0 }
 0x1d4   :  { %v711_v18 = vadd.f32 %v710_v16, %v709_v15  ;;  %v6365_v15 = vadd.s32 24, %v6350_v5  ;;  %v6367_v16 = vadd.s32 2, %v872_v12  ;;  %v828_v12 = vadd.s32 240, %v6350_v5 }
 0x1d6   :  { %v713_v20 = vadd.f32 %v712_v19, %v711_v18  ;;  %v6373_v18 = vadd.s32 40, %v6350_v5  ;;  %vm878_vm7 = vcmp.eq.s32.totalorder %v6350_v5, %v6367_v16  ;;  %vm880_vm8 = vcmp.eq.s32.totalorder %v6358_v11, %v6367_v16 }
 0x1d7   :  { %vm5351_vm11 = vmpackc.low %vm880_vm8, %vm878_vm7  ;;  %vm884_vm13 = vcmp.eq.s32.totalorder %v6365_v15, %v6367_v16 }
 0x1d8   :  { %v715_v22 = vadd.f32 %v714_v21, %v713_v20  ;;  %v5988_v20 = vmov 1.0|1.0   ;;  %v6401_v21 = vadd.s32 48, %v6350_v5 }
 0x1d9   :  { %5352 = vmatprep.subr.msk.bf16.mxu0 %vm5351_vm11, %v5988_v20  ;;  %5482 = vmatprep.subr.msk.bf16.mxu1 %vm5351_vm11, %v5988_v20 }
 0x1da   :  { %716 = vadd.xlane.f32.xlu0 %v715_v22  ;;  %v6404_v22 = vadd.s32 56, %v6350_v5  ;;  %vm890_vm11 = vcmp.eq.s32.totalorder %v6401_v21, %v6367_v16 }
 0x24f   :  { %v707_v23 = vpop.xlane.xlu1 %706 }
 0x267   :  { %v717_v24 = vpop.xlane.xlu0 %716 }
 0x268   :  { %v718_v25 = vadd.f32 %v717_v24, %v707_v23  ;;  %v6422_v23 = vadd.s32 64, %v6350_v5  ;;  %v6425_v24 = vadd.s32 72, %v6350_v5 }
 0x26a   :  { %v720_v26 = vmul.f32 0.0009803922, %v718_v25  ;;  %v6440_v25 = vadd.s32 80, %v6350_v5 }
 0x26c   :  { %v6306_v27 = vsub.f32 %v622_v10, %v720_v26  ;;  %v6308_v28 = vsub.f32 %v624_v14, %v720_v26  ;;  %v6310_v29 = vsub.f32 %v693_v13, %v720_v26  ;;  %v6312_v30 = vsub.f32 %v695_v17, %v720_v26 }
 0x26d   :  { %v6314_v31 = vsub.f32 %v480_v57, %v720_v26  ;;  %v6316_v32 = vsub.f32 %v482_v59, %v720_v26  ;;  %v6318_v33 = vsub.f32 %v551_v62, %v720_v26  ;;  %v6320_v34 = vsub.f32 %v553_v2, %v720_v26  ;;  %v775_v57 = vld [vmem:[%s6032_s25] sm:$0x1f]  ;;  %s5995_s25 = smov 121  }
 0x26e   :  { %v743_v35 = vmul.f32 %v6306_v27, %v6306_v27  ;;  %v744_v36 = vmul.f32 %v6308_v28, %v6308_v28  ;;  %v745_v37 = vmul.f32 %v6310_v29, %v6310_v29  ;;  %v746_v41 = vmul.f32 %v6312_v30, %v6312_v30 }
 0x26f   :  { %v729_v38 = vmul.f32 %v6314_v31, %v6314_v31  ;;  %v730_v39 = vmul.f32 %v6316_v32, %v6316_v32  ;;  %v731_v40 = vmul.f32 %v6318_v33, %v6318_v33  ;;  %v732_v45 = vmul.f32 %v6320_v34, %v6320_v34 }
 0x270   :  { %v747_v42 = vsel %vm697_vm4, %v743_v35, 0.0  ;;  %v748_v43 = vsel %vm697_vm4, %v744_v36, 0.0  ;;  %v750_v48 = vsel %vm697_vm4, %v745_v37, 0.0  ;;  %v752_v52 = vsel %vm703_vm5, %v746_v41, 0.0 }
 0x271   :  { %v749_v44 = vadd.f32 %v748_v43, %v747_v42  ;;  %v733_v46 = vsel %vm697_vm4, %v729_v38, 0.0  ;;  %v734_v47 = vsel %vm697_vm4, %v730_v39, 0.0  ;;  %v736_v51 = vsel %vm697_vm4, %v731_v40, 0.0 }
 0x272   :  { %v735_v49 = vadd.f32 %v734_v47, %v733_v46  ;;  %v738_v55 = vsel %vm703_vm5, %v732_v45, 0.0  ;;  %v871_v10 = vmul.u32 4, %v4527_v7  ;;  %v6362_v14 = vadd.s32 16, %v6350_v5 }
 0x273   :  { %v751_v50 = vadd.f32 %v750_v48, %v749_v44  ;;  %v6370_v17 = vadd.s32 32, %v6350_v5  ;;  %vm888_vm5 = vcmp.eq.s32.totalorder %v6373_v18, %v6367_v16  ;;  %v6443_v26 = vadd.s32 88, %v6350_v5 }
 0x274   :  { %v737_v53 = vadd.f32 %v736_v51, %v735_v49  ;;  %v873_v13 = vadd.s32 2, %v871_v10  ;;  %vm882_vm12 = vcmp.eq.s32.totalorder %v6362_v14, %v6367_v16  ;;  %v6458_v35 = vadd.s32 96, %v6350_v5 }
 0x275   :  { %v753_v54 = vadd.f32 %v752_v52, %v751_v50  ;;  %vm886_vm4 = vcmp.eq.s32.totalorder %v6370_v17, %v6367_v16  ;;  %v6461_v36 = vadd.s32 104, %v6350_v5  ;;  %v6476_v37 = vadd.s32 112, %v6350_v5 }
 0x276   :  { %v739_v56 = vadd.f32 %v738_v55, %v737_v53  ;;  %v6376_v19 = vsel %vm865_vm6, %v6355_v9, %v873_v13  ;;  %vm5355_vm6 = vmpackc.low %vm884_vm13, %vm882_vm12  ;;  %vm892_vm12 = vcmp.eq.s32.totalorder %v6404_v22, %v6367_v16  ;;  %v6479_v38 = vadd.s32 120, %v6350_v5 }
 0x277   :  { %754 = vadd.xlane.f32.xlu0 %v753_v54  ;;  %vm877_vm9 = vcmp.eq.s32.totalorder %v6350_v5, %v6376_v19  ;;  %vm879_vm10 = vcmp.eq.s32.totalorder %v6358_v11, %v6376_v19  ;;  %vm881_vm14 = vcmp.eq.s32.totalorder %v6362_v14, %v6376_v19  ;;  %vm883_vm15 = vcmp.eq.s32.totalorder %v6365_v15, %v6376_v19  ;;  %vm5359_vm8 = vmpackc.low %vm888_vm5, %vm886_vm4 }
 0x278   :  { %740 = vadd.xlane.f32.xlu1 %v739_v56  ;;  %vm5353_vm0 = vmpackc.low %vm879_vm10, %vm877_vm9  ;;  %vm885_vm9 = vcmp.eq.s32.totalorder %v6370_v17, %v6376_v19  ;;  %vm887_vm10 = vcmp.eq.s32.totalorder %v6373_v18, %v6376_v19  ;;  %vm894_vm4 = vcmp.eq.s32.totalorder %v6422_v23, %v6367_v16  ;;  %vm896_vm5 = vcmp.eq.s32.totalorder %v6425_v24, %v6367_v16 }
 0x279   :  { %5354 = vmatpush1.bf16.msk.msra.mxu0 %vm5353_vm0, %v5988_v20  ;;  %5484 = vmatpush1.bf16.msk.msra.mxu1 %vm5353_vm0, %v5988_v20  ;;  %vm5357_vm7 = vmpackc.low %vm883_vm15, %vm881_vm14  ;;  %vm889_vm15 = vcmp.eq.s32.totalorder %v6401_v21, %v6376_v19  ;;  %vm891_vm0 = vcmp.eq.s32.totalorder %v6404_v22, %v6376_v19  ;;  %v814_v39 = vadd.s32 128, %v6350_v5  ;;  %v815_v40 = vadd.s32 136, %v6350_v5 }
 0x27a   :  { %5356 = vmatprep.subr.msk.bf16.mxu0 %vm5355_vm6, %v5988_v20  ;;  %5486 = vmatprep.subr.msk.bf16.mxu1 %vm5355_vm6, %v5988_v20  ;;  %vm5361_vm13 = vmpackc.low %vm887_vm10, %vm885_vm9  ;;  %vm895_vm9 = vcmp.eq.s32.totalorder %v6425_v24, %v6376_v19  ;;  %vm898_vm10 = vcmp.eq.s32.totalorder %v6440_v25, %v6367_v16  ;;  %v816_v41 = vadd.s32 144, %v6350_v5  ;;  %v817_v42 = vadd.s32 152, %v6350_v5 }
 0x27b   :  { %vm5363_vm14 = vmpackc.low %vm892_vm12, %vm890_vm11  ;;  %vm900_vm11 = vcmp.eq.s32.totalorder %v6443_v26, %v6367_v16  ;;  %v818_v43 = vadd.s32 160, %v6350_v5  ;;  %v819_v44 = vadd.s32 168, %v6350_v5  ;;  %v820_v45 = vadd.s32 176, %v6350_v5 }
 0x27c   :  { %vm5365_vm6 = vmpackc.low %vm891_vm0, %vm889_vm15  ;;  %vm899_vm15 = vcmp.eq.s32.totalorder %v6443_v26, %v6376_v19  ;;  %vm902_vm0 = vcmp.eq.s32.totalorder %v6458_v35, %v6367_v16  ;;  %v821_v46 = vadd.s32 184, %v6350_v5  ;;  %v822_v47 = vadd.s32 192, %v6350_v5 }
 0x27d   :  { %5358 = vmatpush1.bf16.msk.msra.mxu0 %vm5357_vm7, %v5988_v20  ;;  %5488 = vmatpush1.bf16.msk.msra.mxu1 %vm5357_vm7, %v5988_v20  ;;  %vm5367_vm7 = vmpackc.low %vm896_vm5, %vm894_vm4  ;;  %vm904_vm4 = vcmp.eq.s32.totalorder %v6461_v36, %v6367_v16  ;;  %v823_v48 = vadd.s32 200, %v6350_v5  ;;  %v824_v49 = vadd.s32 208, %v6350_v5  ;;  %v825_v50 = vadd.s32 216, %v6350_v5 }
 0x27e   :  { %5360 = vmatprep.subr.msk.bf16.mxu0 %vm5359_vm8, %v5988_v20  ;;  %5490 = vmatprep.subr.msk.bf16.mxu1 %vm5359_vm8, %v5988_v20  ;;  %vm893_vm8 = vcmp.eq.s32.totalorder %v6422_v23, %v6376_v19  ;;  %v827_v10 = vadd.s32 232, %v6350_v5  ;;  %v829_v13 = vadd.s32 248, %v6350_v5 }
 0x27f   :  { %vm5369_vm12 = vmpackc.low %vm895_vm9, %vm893_vm8  ;;  %vm903_vm8 = vcmp.eq.s32.totalorder %v6461_v36, %v6376_v19  ;;  %vm906_vm9 = vcmp.eq.s32.totalorder %v6476_v37, %v6367_v16 }
 0x281   :  { %5362 = vmatpush1.bf16.msk.msra.mxu0 %vm5361_vm13, %v5988_v20  ;;  %5492 = vmatpush1.bf16.msk.msra.mxu1 %vm5361_vm13, %v5988_v20  ;;  %vm5371_vm13 = vmpackc.low %vm900_vm11, %vm898_vm10  ;;  %vm908_vm10 = vcmp.eq.s32.totalorder %v6479_v38, %v6367_v16 }
 0x282   :  { %5364 = vmatprep.subr.msk.bf16.mxu0 %vm5363_vm14, %v5988_v20  ;;  %5494 = vmatprep.subr.msk.bf16.mxu1 %vm5363_vm14, %v5988_v20  ;;  %vm897_vm14 = vcmp.eq.s32.totalorder %v6440_v25, %v6376_v19 }
 0x283   :  { %vm5373_vm5 = vmpackc.low %vm899_vm15, %vm897_vm14  ;;  %vm907_vm14 = vcmp.eq.s32.totalorder %v6479_v38, %v6376_v19  ;;  %vm910_vm15 = vcmp.eq.s32.totalorder %v814_v39, %v6367_v16 }
 0x285   :  { %5366 = vmatpush1.bf16.msk.msra.mxu0 %vm5365_vm6, %v5988_v20  ;;  %5496 = vmatpush1.bf16.msk.msra.mxu1 %vm5365_vm6, %v5988_v20  ;;  %vm5375_vm6 = vmpackc.low %vm904_vm4, %vm902_vm0  ;;  %vm912_vm0 = vcmp.eq.s32.totalorder %v815_v40, %v6367_v16 }
 0x286   :  { %5368 = vmatprep.subr.msk.bf16.mxu0 %vm5367_vm7, %v5988_v20  ;;  %5498 = vmatprep.subr.msk.bf16.mxu1 %vm5367_vm7, %v5988_v20  ;;  %vm901_vm7 = vcmp.eq.s32.totalorder %v6458_v35, %v6376_v19 }
 0x287   :  { %vm5377_vm11 = vmpackc.low %vm903_vm8, %vm901_vm7  ;;  %vm911_vm7 = vcmp.eq.s32.totalorder %v815_v40, %v6376_v19  ;;  %vm914_vm8 = vcmp.eq.s32.totalorder %v816_v41, %v6367_v16  ;;  %v831_v40 = vadd.s32 264, %v6350_v5 }
 0x289   :  { %5370 = vmatpush1.bf16.msk.msra.mxu0 %vm5369_vm12, %v5988_v20  ;;  %5500 = vmatpush1.bf16.msk.msra.mxu1 %vm5369_vm12, %v5988_v20  ;;  %vm5379_vm12 = vmpackc.low %vm908_vm10, %vm906_vm9  ;;  %vm916_vm9 = vcmp.eq.s32.totalorder %v817_v42, %v6367_v16 }
 0x28a   :  { %5372 = vmatprep.subr.msk.bf16.mxu0 %vm5371_vm13, %v5988_v20  ;;  %5502 = vmatprep.subr.msk.bf16.mxu1 %vm5371_vm13, %v5988_v20  ;;  %vm905_vm13 = vcmp.eq.s32.totalorder %v6476_v37, %v6376_v19 }
 0x28b   :  { %vm5381_vm4 = vmpackc.low %vm907_vm14, %vm905_vm13  ;;  %vm915_vm13 = vcmp.eq.s32.totalorder %v817_v42, %v6376_v19  ;;  %vm918_vm14 = vcmp.eq.s32.totalorder %v818_v43, %v6367_v16 }
 0x28d   :  { %778 = vperm.xlu0 %5855, %v775_v57   ;;  %5374 = vmatpush1.bf16.msk.msra.mxu0 %vm5373_vm5, %v5988_v20 }
 0x28e   :  { %5504 = vmatpush1.bf16.msk.msra.mxu1 %vm5373_vm5, %v5988_v20  ;;  %5376 = vmatprep.subr.msk.bf16.mxu0 %vm5375_vm6, %v5988_v20  ;;  %vm5383_vm5 = vmpackc.low %vm912_vm0, %vm910_vm15  ;;  %vm920_vm15 = vcmp.eq.s32.totalorder %v819_v44, %v6367_v16 }
 0x28f   :  { %5506 = vmatprep.subr.msk.bf16.mxu1 %vm5375_vm6, %v5988_v20  ;;  %vm909_vm6 = vcmp.eq.s32.totalorder %v814_v39, %v6376_v19  ;;  %v830_v39 = vadd.s32 256, %v6350_v5 }
 0x290   :  { %vm5385_vm10 = vmpackc.low %vm911_vm7, %vm909_vm6  ;;  %vm919_vm6 = vcmp.eq.s32.totalorder %v819_v44, %v6376_v19  ;;  %vm922_vm7 = vcmp.eq.s32.totalorder %v820_v45, %v6367_v16 }
 0x291   :  { %5378 = vmatpush1.bf16.msk.msra.mxu0 %vm5377_vm11, %v5988_v20 }
 0x292   :  { %5508 = vmatpush1.bf16.msk.msra.mxu1 %vm5377_vm11, %v5988_v20  ;;  %5380 = vmatprep.subr.msk.bf16.mxu0 %vm5379_vm12, %v5988_v20  ;;  %vm5387_vm11 = vmpackc.low %vm916_vm9, %vm914_vm8  ;;  %vm924_vm8 = vcmp.eq.s32.totalorder %v821_v46, %v6367_v16 }
 0x293   :  { %5510 = vmatprep.subr.msk.bf16.mxu1 %vm5379_vm12, %v5988_v20  ;;  %vm913_vm12 = vcmp.eq.s32.totalorder %v816_v41, %v6376_v19 }
 0x294   :  { %vm5389_vm0 = vmpackc.low %vm915_vm13, %vm913_vm12  ;;  %vm923_vm12 = vcmp.eq.s32.totalorder %v821_v46, %v6376_v19 }
 0x295   :  { %5382 = vmatpush1.bf16.msk.msra.mxu0 %vm5381_vm4, %v5988_v20 }
 0x296   :  { %5512 = vmatpush1.bf16.msk.msra.mxu1 %vm5381_vm4, %v5988_v20  ;;  %5384 = vmatprep.subr.msk.bf16.mxu0 %vm5383_vm5, %v5988_v20  ;;  %vm5391_vm4 = vmpackc.low %vm920_vm15, %vm918_vm14  ;;  %vm926_vm14 = vcmp.eq.s32.totalorder %v822_v47, %v6367_v16  ;;  %vm928_vm15 = vcmp.eq.s32.totalorder %v823_v48, %v6367_v16 }
 0x297   :  { %5514 = vmatprep.subr.msk.bf16.mxu1 %vm5383_vm5, %v5988_v20  ;;  %vm917_vm5 = vcmp.eq.s32.totalorder %v818_v43, %v6376_v19 }
 0x298   :  { %vm5393_vm9 = vmpackc.low %vm919_vm6, %vm917_vm5  ;;  %vm927_vm5 = vcmp.eq.s32.totalorder %v823_v48, %v6376_v19 }
 0x299   :  { %5386 = vmatpush1.bf16.msk.msra.mxu0 %vm5385_vm10, %v5988_v20 }
 0x29a   :  { %5516 = vmatpush1.bf16.msk.msra.mxu1 %vm5385_vm10, %v5988_v20  ;;  %5388 = vmatprep.subr.msk.bf16.mxu0 %vm5387_vm11, %v5988_v20  ;;  %vm5395_vm10 = vmpackc.low %vm924_vm8, %vm922_vm7  ;;  %vm930_vm7 = vcmp.eq.s32.totalorder %v824_v49, %v6367_v16  ;;  %vm932_vm8 = vcmp.eq.s32.totalorder %v825_v50, %v6367_v16 }
 0x29b   :  { %5518 = vmatprep.subr.msk.bf16.mxu1 %vm5387_vm11, %v5988_v20  ;;  %vm921_vm11 = vcmp.eq.s32.totalorder %v820_v45, %v6376_v19 }
 0x29c   :  { %vm5397_vm13 = vmpackc.low %vm923_vm12, %vm921_vm11  ;;  %vm931_vm11 = vcmp.eq.s32.totalorder %v825_v50, %v6376_v19 }
 0x29d   :  { %5390 = vmatpush1.bf16.msk.msra.mxu0 %vm5389_vm0, %v5988_v20 }
 0x29e   :  { %5520 = vmatpush1.bf16.msk.msra.mxu1 %vm5389_vm0, %v5988_v20  ;;  %5392 = vmatprep.subr.msk.bf16.mxu0 %vm5391_vm4, %v5988_v20  ;;  %vm5399_vm0 = vmpackc.low %vm928_vm15, %vm926_vm14  ;;  %vm936_vm14 = vcmp.eq.s32.totalorder %v827_v10, %v6367_v16  ;;  %vm933_vm15 = vcmp.eq.s32.totalorder %v826_v8, %v6376_v19 }
 0x29f   :  { %5522 = vmatprep.subr.msk.bf16.mxu1 %vm5391_vm4, %v5988_v20  ;;  %vm925_vm4 = vcmp.eq.s32.totalorder %v822_v47, %v6376_v19 }
 0x2a0   :  { %vm5401_vm6 = vmpackc.low %vm927_vm5, %vm925_vm4  ;;  %vm938_vm5 = vcmp.eq.s32.totalorder %v828_v12, %v6367_v16 }
 0x2a1   :  { %5394 = vmatpush1.bf16.msk.msra.mxu0 %vm5393_vm9, %v5988_v20 }
 0x2a2   :  { %5524 = vmatpush1.bf16.msk.msra.mxu1 %vm5393_vm9, %v5988_v20  ;;  %5396 = vmatprep.subr.msk.bf16.mxu0 %vm5395_vm10, %v5988_v20  ;;  %vm5403_vm9 = vmpackc.low %vm932_vm8, %vm930_vm7  ;;  %vm937_vm7 = vcmp.eq.s32.totalorder %v828_v12, %v6376_v19  ;;  %vm939_vm8 = vcmp.eq.s32.totalorder %v829_v13, %v6376_v19 }
 0x2a3   :  { %5526 = vmatprep.subr.msk.bf16.mxu1 %vm5395_vm10, %v5988_v20  ;;  %vm929_vm10 = vcmp.eq.s32.totalorder %v824_v49, %v6376_v19  ;;  %vm5413_vm3 = vmpackc.low %vm939_vm8, %vm937_vm7 }
 0x2a4   :  { %vm5405_vm12 = vmpackc.low %vm931_vm11, %vm929_vm10  ;;  %vm942_vm10 = vcmp.eq.s32.totalorder %v830_v39, %v6367_v16  ;;  %vm944_vm11 = vcmp.eq.s32.totalorder %v831_v40, %v6367_v16 }
 0x2a5   :  { %5398 = vmatpush1.bf16.msk.msra.mxu0 %vm5397_vm13, %v5988_v20 }
 0x2a6   :  { %5528 = vmatpush1.bf16.msk.msra.mxu1 %vm5397_vm13, %v5988_v20  ;;  %5400 = vmatprep.subr.msk.bf16.mxu0 %vm5399_vm0, %v5988_v20  ;;  %vm934_vm13 = vcmp.eq.s32.totalorder %v826_v8, %v6367_v16 }
 0x2a7   :  { %5530 = vmatprep.subr.msk.bf16.mxu1 %vm5399_vm0, %v5988_v20  ;;  %vm935_vm0 = vcmp.eq.s32.totalorder %v827_v10, %v6376_v19  ;;  %vm5407_vm4 = vmpackc.low %vm936_vm14, %vm934_vm13  ;;  %vm941_vm13 = vcmp.eq.s32.totalorder %v830_v39, %v6376_v19  ;;  %vm943_vm14 = vcmp.eq.s32.totalorder %v831_v40, %v6376_v19 }
 0x2a9   :  { %5402 = vmatpush1.bf16.msk.msra.mxu0 %vm5401_vm6, %v5988_v20 }
 0x2aa   :  { %5532 = vmatpush1.bf16.msk.msra.mxu1 %vm5401_vm6, %v5988_v20  ;;  %5404 = vmatprep.subr.msk.bf16.mxu0 %vm5403_vm9, %v5988_v20  ;;  %vm940_vm6 = vcmp.eq.s32.totalorder %v829_v13, %v6367_v16 }
 0x2ab   :  { %5534 = vmatprep.subr.msk.bf16.mxu1 %vm5403_vm9, %v5988_v20  ;;  %vm5409_vm9 = vmpackc.low %vm935_vm0, %vm933_vm15 }
 0x2ac   :  { %vm5415_vm15 = vmpackc.low %vm944_vm11, %vm942_vm10 }
 0x2ad   :  { %5406 = vmatpush1.bf16.msk.msra.mxu0 %vm5405_vm12, %v5988_v20  ;;  %vm6654_vm0 = vmpackc.low %vm943_vm14, %vm941_vm13 }
 0x2ae   :  { %5536 = vmatpush1.bf16.msk.msra.mxu1 %vm5405_vm12, %v5988_v20  ;;  %5408 = vmatprep.subr.msk.bf16.mxu0 %vm5407_vm4, %v5988_v20  ;;  %vm5411_vm12 = vmpackc.low %vm940_vm6, %vm938_vm5  ;;  %vm1175_vm5 = vcmask 1014784  }
 0x2af   :  { %5538 = vmatprep.subr.msk.bf16.mxu1 %vm5407_vm4, %v5988_v20 }
 0x2b1   :  { %5410 = vmatpush1.bf16.msk.msra.mxu0 %vm5409_vm9, %v5988_v20 }
 0x2b2   :  { %5540 = vmatpush1.bf16.msk.msra.mxu1 %vm5409_vm9, %v5988_v20  ;;  %5412 = vmatprep.subr.msk.bf16.mxu0 %vm5411_vm12, %v5988_v20 }
 0x2b3   :  { %5542 = vmatprep.subr.msk.bf16.mxu1 %vm5411_vm12, %v5988_v20 }
 0x2b5   :  { %5414 = vmatpush1.bf16.msk.msra.mxu0 %vm5413_vm3, %v5988_v20 }
 0x2b6   :  { %5544 = vmatpush1.bf16.msk.msra.mxu1 %vm5413_vm3, %v5988_v20  ;;  %5416 = vmatprep.subr.msk.bf16.mxu0 %vm5415_vm15, %v5988_v20 }
 0x2b7   :  { %5546 = vmatprep.subr.msk.bf16.mxu1 %vm5415_vm15, %v5988_v20 }
 0x304   :  { %v755_v58 = vpop.xlane.xlu0 %754 }
 0x305   :  { %v741_v59 = vpop.xlane.xlu1 %740 }
 0x306   :  { %v756_v60 = vadd.f32 %v755_v58, %v741_v59 }
 0x308   :  { %v758_v61 = vmul.f32 0.0009803922, %v756_v60 }
 0x30a   :  { %v759_v62 = vadd.f32 1e-05, %v758_v61 }
 0x30c   :  { %5893 = vrsqrt.f32 %v759_v62  ;;  %v6574_v56 = vpop.permute.xlu0 %778 }
 0x316   :  { %v5894_v1 = vpop.eup %5893 }
 0x317   :  { %v761_v2 = vmul.f32 %v5894_v1, %v757_v63 }
 0x319   :  { %764 = vperm.xlu1 %5856, %v761_v2  }
 0x398   :  { %v6561_v51 = vpop.permute.xlu1 %764 }
 0x399   :  { %v772_v52 = vmul.f32 %v6561_v51, %v6308_v28  ;;  %v773_v53 = vmul.f32 %v6561_v51, %v6310_v29  ;;  %v767_v54 = vmul.f32 %v6561_v51, %v6314_v31  ;;  %v771_v55 = vmul.f32 %v6561_v51, %v6306_v27 }
 0x39a   :  { %v768_v57 = vmul.f32 %v6561_v51, %v6316_v32  ;;  %v769_v28 = vmul.f32 %v6561_v51, %v6318_v33  ;;  %v774_v29 = vmul.f32 %v6561_v51, %v6312_v30  ;;  %v770_v42 = vmul.f32 %v6561_v51, %v6320_v34 }
 0x39b   :  { %v6584_v31 = vadd.f32 %v6574_v56, %v772_v52  ;;  %v6587_v27 = vadd.f32 %v6574_v56, %v773_v53  ;;  %v6590_v58 = vadd.f32 %v6574_v56, %v767_v54  ;;  %v6593_v59 = vadd.f32 %v6574_v56, %v771_v55 }
 0x39c   :  { %v6597_v32 = vadd.f32 %v6574_v56, %v768_v57  ;;  %v6600_v30 = vadd.f32 %v6574_v56, %v769_v28  ;;  %v788_v6 = vadd.f32 %v6574_v56, %v774_v29  ;;  %v784_v34 = vadd.f32 %v6574_v56, %v770_v42 }
 0x39d   :  { %v794_v33 = vmax.f32 %v6584_v31, 0.0  ;;  %v795_v60 = vmax.f32 %v6587_v27, 0.0  ;;  %v789_v61 = vmax.f32 %v6590_v58, 0.0  ;;  %v793_v62 = vmax.f32 %v6593_v59, 0.0 }
 0x39e   :  { %v790_v63 = vmax.f32 %v6597_v32, 0.0  ;;  %v791_v1 = vmax.f32 %v6600_v30, 0.0  ;;  %v6648_v41 = vmax.f32 %v788_v6, 0.0  ;;  %v6669_v44 = vmax.f32 %v784_v34, 0.0 }
 0x39f   :  { %v5857_v2 = vpack.i.bf16 %v795_v60, %v794_v33  ;;  %v5867_v3 = vpack.i.bf16 %v789_v61, %v793_v62  ;;  %v832_v6 = vadd.s32 272, %v6350_v5 }
 0x3a0   :  { %v5862_v7 = vpack.i.bf16 %v791_v1, %v790_v63 }
 0x3a1   :  { %5858 = vrot.lane.b32.xlu1 %v5857_v2, %s5985_s0  ;;  %5868 = vrot.lane.b32.xlu0 %v5867_v3, %s5985_s0  ;;  %vm946_vm3 = vcmp.eq.s32.totalorder %v832_v6, %v6367_v16  ;;  %vm945_vm7 = vcmp.eq.s32.totalorder %v832_v6, %v6376_v19  ;;  %v841_v6 = vadd.s32 344, %v6350_v5 }
 0x3a5   :  { %5863 = vrot.lane.b32.xlu1 %v5862_v7, %s5985_s0  ;;  %5878 = vrot.lane.b32.xlu0 %v5862_v7, %s5986_s5  ;;  %v833_v7 = vadd.s32 280, %v6350_v5 }
 0x3a7   :  { %vm948_vm4 = vcmp.eq.s32.totalorder %v833_v7, %v6367_v16  ;;  %vm947_vm8 = vcmp.eq.s32.totalorder %v833_v7, %v6376_v19  ;;  %v842_v7 = vadd.s32 352, %v6350_v5 }
 0x3a8   :  { %vm6719_vm6 = vmpackc.low %vm948_vm4, %vm946_vm3 }
 0x3a9   :  { %5873 = vrot.lane.b32.xlu1 %v5857_v2, %s5986_s5  ;;  %1338 = vrot.lane.b32.xlu0 %v6648_v41, %s5985_s0  ;;  %vm5421_vm10 = vmpackc.low %vm947_vm8, %vm945_vm7 }
 0x3ad   :  { %5883 = vrot.lane.b32.xlu1 %v5867_v3, %s5986_s5  ;;  %1357 = vrot.lane.b32.xlu0 %v6648_v41, %s5986_s5 }
 0x3b1   :  { %1143 = vrot.lane.b32.xlu1 %v6669_v44, %s5985_s0 }
 0x3b5   :  { %1162 = vrot.lane.b32.xlu1 %v6669_v44, %s5986_s5 }
 0x413   :  { %v5859_v45 = vpop.permute.xlu1 %5858  ;;  %v5869_v46 = vpop.permute.xlu0 %5868 }
 0x414   :  { %v5861_v47 = vunpack.i.h.bf16 %v5859_v45  ;;  %v5860_v48 = vunpack.i.l.bf16 %v5859_v45  ;;  %v5870_v56 = vunpack.i.l.bf16 %v5869_v46  ;;  %v5871_v28 = vunpack.i.h.bf16 %v5869_v46 }
 0x416   :  { %v1341_v55 = vsel %vm234_vm1, %v5860_v48, %v5861_v47  ;;  %v1340_v42 = vsel %vm234_vm1, %v5870_v56, %v5860_v48 }
 0x417   :  { %v5864_v49 = vpop.permute.xlu1 %5863  ;;  %v6675_v50 = vpop.permute.xlu0 %5878  ;;  %v1348_v40 = vmax.f32 %v794_v33, %v1341_v55  ;;  %v1347_v27 = vmax.f32 %v793_v62, %v1340_v42  ;;  %v835_v55 = vadd.s32 296, %v6350_v5  ;;  %v848_v42 = vadd.s32 400, %v6350_v5 }
 0x418   :  { %v5866_v51 = vunpack.i.h.bf16 %v5864_v49  ;;  %v5865_v52 = vunpack.i.l.bf16 %v5864_v49  ;;  %v5881_v53 = vunpack.i.h.bf16 %v6675_v50  ;;  %v5880_v54 = vunpack.i.l.bf16 %v6675_v50 }
 0x419   :  { %v834_v49 = vadd.s32 288, %v6350_v5  ;;  %vm951_vm13 = vcmp.eq.s32.totalorder %v835_v55, %v6376_v19  ;;  %v839_v50 = vadd.s32 328, %v6350_v5 }
 0x41a   :  { %v1146_v57 = vsel %vm234_vm1, %v5865_v52, %v5866_v51  ;;  %v1165_v13 = vsel %vm273_vm2, %v5880_v54, %v5881_v53  ;;  %v1145_v32 = vsel %vm234_vm1, %v5871_v28, %v5865_v52 }
 0x41b   :  { %v5874_v29 = vpop.permute.xlu1 %5873  ;;  %v1339_v2 = vpop.permute.xlu0 %1338  ;;  %v1153_v3 = vmax.f32 %v790_v63, %v1146_v57  ;;  %vm950_vm9 = vcmp.eq.s32.totalorder %v834_v49, %v6367_v16  ;;  %vm949_vm11 = vcmp.eq.s32.totalorder %v834_v49, %v6376_v19  ;;  %vm960_vm7 = vcmp.eq.s32.totalorder %v839_v50, %v6367_v16 }
 0x41c   :  { %v5876_v8 = vunpack.i.h.bf16 %v5874_v29  ;;  %v5875_v10 = vunpack.i.l.bf16 %v5874_v29  ;;  %v1342_v12 = vsel %vm234_vm1, %v5861_v47, %v1339_v2  ;;  %v1350_v28 = vmax.f32 %v6648_v41, %v1339_v2 }
 0x41d   :  { %v1172_v39 = vmax.f32 %v1153_v3, %v1165_v13  ;;  %v6696_v34 = vmax.f32 %v795_v60, %v1342_v12  ;;  %v1152_v60 = vmax.f32 %v789_v61, %v1145_v32  ;;  %v836_v61 = vadd.s32 304, %v6350_v5 }
 0x41e   :  { %v1360_v63 = vsel %vm273_vm2, %v5875_v10, %v5876_v8  ;;  %v837_v41 = vadd.s32 312, %v6350_v5  ;;  %v844_v12 = vadd.s32 368, %v6350_v5  ;;  %v845_v13 = vadd.s32 376, %v6350_v5 }
 0x41f   :  { %v5884_v45 = vpop.permute.xlu1 %5883  ;;  %v1358_v46 = vpop.permute.xlu0 %1357  ;;  %1250 = vmatprep.mubr.f32.mxu0 %v1172_v39  ;;  %v1367_v47 = vmax.f32 %v1348_v40, %v1360_v63  ;;  %vm954_vm14 = vcmp.eq.s32.totalorder %v836_v61, %v6367_v16  ;;  %vm953_vm3 = vcmp.eq.s32.totalorder %v836_v61, %v6376_v19  ;;  %v846_v39 = vadd.s32 384, %v6350_v5 }
 0x420   :  { %v5886_v31 = vunpack.i.h.bf16 %v5884_v45  ;;  %v5885_v33 = vunpack.i.l.bf16 %v5884_v45  ;;  %v6701_v48 = vsel %vm273_vm2, %v5876_v8, %v1358_v46  ;;  %v1369_v62 = vmax.f32 %v1350_v28, %v1358_v46 }
 0x421   :  { %v1368_v52 = vmax.f32 %v6696_v34, %v6701_v48  ;;  %1437 = vmatprep.mubr.f32.mxu1 %v1367_v47  ;;  %vm956_vm15 = vcmp.eq.s32.totalorder %v837_v41, %v6367_v16  ;;  %vm955_vm4 = vcmp.eq.s32.totalorder %v837_v41, %v6376_v19  ;;  %v847_v40 = vadd.s32 392, %v6350_v5  ;;  %v1566_v34 = vld [vmem:[%s6042_s3] sm:$0x1f]  ;;  %s7392_s3 = sld [smem:[#allocation9_spill]] }
 0x422   :  { %v1164_v56 = vsel %vm273_vm2, %v5886_v31, %v5880_v54  ;;  %v1359_v57 = vsel %vm273_vm2, %v5885_v33, %v5875_v10  ;;  %v843_v10 = vadd.s32 360, %v6350_v5  ;;  %v849_v32 = vadd.s32 408, %v6350_v5 }
 0x423   :  { %v1171_v29 = vmax.f32 %v1152_v60, %v1164_v56  ;;  %v1366_v3 = vmax.f32 %v1347_v27, %v1359_v57  ;;  %v1144_v8 = vpop.permute.xlu1 %1143  ;;  %v850_v63 = vadd.s32 416, %v6350_v5  ;;  %v851_v45 = vadd.s32 424, %v6350_v5 }
 0x424   :  { %v1147_v59 = vsel %vm234_vm1, %v5866_v51, %v1144_v8  ;;  %vm952_vm1 = vcmp.eq.s32.totalorder %v835_v55, %v6367_v16  ;;  %v1155_v51 = vmax.f32 %v6669_v44, %v1144_v8  ;;  %v838_v44 = vadd.s32 320, %v6350_v5 }
 0x425   :  { %1251 = vmatmul.mubr.f32.vlgmr.msra.gmra.mrb[4].mxu0 %v1171_v29  ;;  %1438 = vmatmul.mubr.f32.vlgmr.msra.gmra.mrb[4].mxu1 %v1366_v3  ;;  %v6738_v54 = vmax.f32 %v791_v1, %v1147_v59  ;;  %vm5423_vm12 = vmpackc.low %vm952_vm1, %vm950_vm9  ;;  %vm959_vm1 = vcmp.eq.s32.totalorder %v839_v50, %v6376_v19  ;;  %v852_v46 = vadd.s32 432, %v6350_v5  ;;  %v853_v47 = vadd.s32 440, %v6350_v5 }
 0x426   :  { %5418 = vmatpush1.bf16.msk.msra.mxu0 %vm6654_vm0, %v5988_v20  ;;  %5548 = vmatpush1.bf16.msk.msra.mxu1 %vm6654_vm0, %v5988_v20  ;;  %vm5427_vm0 = vmpackc.low %vm956_vm15, %vm954_vm14  ;;  %vm957_vm9 = vcmp.eq.s32.totalorder %v838_v44, %v6376_v19  ;;  %vm963_vm15 = vcmp.eq.s32.totalorder %v841_v6, %v6376_v19  ;;  %v854_v31 = vadd.s32 448, %v6350_v5  ;;  %v855_v33 = vadd.s32 456, %v6350_v5 }
 0x427   :  { %4786 = vmatprep.mubr.msk.f32.mxu1 %vm1175_vm5, %v1369_v62  ;;  %v1163_v2 = vpop.permute.xlu1 %1162  ;;  %5420 = vmatprep.subr.msk.bf16.mxu0 %vm6719_vm6, %v5988_v20  ;;  %v856_v49 = vadd.s32 464, %v6350_v5  ;;  %v857_v27 = vadd.s32 472, %v6350_v5  ;;  %v858_v60 = vadd.s32 480, %v6350_v5  ;;  %v859_v55 = vadd.s32 488, %v6350_v5 }
 0x428   :  { %v6752_v30 = vsel %vm273_vm2, %v5881_v53, %v1163_v2  ;;  %v1174_v1 = vmax.f32 %v1155_v51, %v1163_v2  ;;  %5550 = vmatprep.subr.msk.bf16.mxu1 %vm6719_vm6, %v5988_v20  ;;  %vm5425_vm2 = vmpackc.low %vm951_vm13, %vm949_vm11  ;;  %vm958_vm6 = vcmp.eq.s32.totalorder %v838_v44, %v6367_v16  ;;  %v840_v53 = vadd.s32 336, %v6350_v5 }
 0x429   :  { %v1173_v43 = vmax.f32 %v6738_v54, %v6752_v30  ;;  %vm5431_vm8 = vmpackc.low %vm960_vm7, %vm958_vm6  ;;  %vm964_vm11 = vcmp.eq.s32.totalorder %v841_v6, %v6367_v16  ;;  %vm965_vm6 = vcmp.eq.s32.totalorder %v842_v7, %v6376_v19  ;;  %vm967_vm7 = vcmp.eq.s32.totalorder %v843_v10, %v6376_v19 }
 0x42a   :  { %5422 = vmatpush1.bf16.msk.msra.mxu0 %vm5421_vm10, %v5988_v20  ;;  %5552 = vmatpush1.bf16.msk.msra.mxu1 %vm5421_vm10, %v5988_v20  ;;  %vm962_vm10 = vcmp.eq.s32.totalorder %v840_v53, %v6367_v16  ;;  %vm961_vm14 = vcmp.eq.s32.totalorder %v840_v53, %v6376_v19  ;;  %v861_v56 = vadd.s32 504, %v6350_v5  ;;  %v860_v57 = vadd.s32 496, %v6350_v5 }
 0x42b   :  { %4657 = vmatprep.mubr.msk.f32.mxu0 %vm1175_vm5, %v1174_v1  ;;  %5424 = vmatprep.subr.msk.bf16.mxu0 %vm5423_vm12, %v5988_v20  ;;  %vm5429_vm5 = vmpackc.low %vm955_vm4, %vm953_vm3  ;;  %v5989_v29 = vmov 1.0  }
 0x42c   :  { %5554 = vmatprep.subr.msk.bf16.mxu1 %vm5423_vm12, %v5988_v20  ;;  %vm5433_vm12 = vmpackc.low %vm959_vm1, %vm957_vm9 }
 0x42d   :  { %vm5435_vm13 = vmpackc.low %vm964_vm11, %vm962_vm10  ;;  %vm969_vm10 = vcmp.eq.s32.totalorder %v844_v12, %v6376_v19  ;;  %vm971_vm11 = vcmp.eq.s32.totalorder %v845_v13, %v6376_v19 }
 0x42e   :  { %5426 = vmatpush1.bf16.msk.msra.mxu0 %vm5425_vm2, %v5988_v20  ;;  %5556 = vmatpush1.bf16.msk.msra.mxu1 %vm5425_vm2, %v5988_v20  ;;  %vm966_vm2 = vcmp.eq.s32.totalorder %v842_v7, %v6367_v16  ;;  %vm5437_vm3 = vmpackc.low %vm963_vm15, %vm961_vm14 }
 0x42f   :  { %5428 = vmatprep.subr.msk.bf16.mxu0 %vm5427_vm0, %v5988_v20  ;;  %5558 = vmatprep.subr.msk.bf16.mxu1 %vm5427_vm0, %v5988_v20  ;;  %vm968_vm0 = vcmp.eq.s32.totalorder %v843_v10, %v6367_v16  ;;  %vm5441_vm9 = vmpackc.low %vm967_vm7, %vm965_vm6 }
 0x430   :  { %vm5439_vm4 = vmpackc.low %vm968_vm0, %vm966_vm2  ;;  %vm973_vm2 = vcmp.eq.s32.totalorder %v846_v39, %v6376_v19  ;;  %vm975_vm0 = vcmp.eq.s32.totalorder %v847_v40, %v6376_v19 }
 0x431   :  { %vm5445_vm14 = vmpackc.low %vm971_vm11, %vm969_vm10 }
 0x432   :  { %5430 = vmatpush1.bf16.msk.msra.mxu0 %vm5429_vm5, %v5988_v20  ;;  %5560 = vmatpush1.bf16.msk.msra.mxu1 %vm5429_vm5, %v5988_v20  ;;  %vm970_vm5 = vcmp.eq.s32.totalorder %v844_v12, %v6367_v16  ;;  %vm5449_vm6 = vmpackc.low %vm975_vm0, %vm973_vm2 }
 0x433   :  { %5432 = vmatprep.subr.msk.bf16.mxu0 %vm5431_vm8, %v5988_v20  ;;  %5562 = vmatprep.subr.msk.bf16.mxu1 %vm5431_vm8, %v5988_v20  ;;  %vm972_vm8 = vcmp.eq.s32.totalorder %v845_v13, %v6367_v16 }
 0x434   :  { %vm5443_vm1 = vmpackc.low %vm972_vm8, %vm970_vm5  ;;  %vm977_vm5 = vcmp.eq.s32.totalorder %v848_v42, %v6376_v19  ;;  %vm979_vm8 = vcmp.eq.s32.totalorder %v849_v32, %v6376_v19 }
 0x435   :  { %vm5453_vm10 = vmpackc.low %vm979_vm8, %vm977_vm5 }
 0x436   :  { %5434 = vmatpush1.bf16.msk.msra.mxu0 %vm5433_vm12, %v5988_v20  ;;  %5564 = vmatpush1.bf16.msk.msra.mxu1 %vm5433_vm12, %v5988_v20  ;;  %vm974_vm12 = vcmp.eq.s32.totalorder %v846_v39, %v6367_v16 }
 0x437   :  { %5436 = vmatprep.subr.msk.bf16.mxu0 %vm5435_vm13, %v5988_v20  ;;  %5566 = vmatprep.subr.msk.bf16.mxu1 %vm5435_vm13, %v5988_v20  ;;  %vm976_vm13 = vcmp.eq.s32.totalorder %v847_v40, %v6367_v16 }
 0x438   :  { %vm5447_vm15 = vmpackc.low %vm976_vm13, %vm974_vm12  ;;  %vm981_vm12 = vcmp.eq.s32.totalorder %v850_v63, %v6376_v19  ;;  %vm983_vm13 = vcmp.eq.s32.totalorder %v851_v45, %v6376_v19 }
 0x439   :  { %vm5457_vm2 = vmpackc.low %vm983_vm13, %vm981_vm12 }
 0x43a   :  { %5438 = vmatpush1.bf16.msk.msra.mxu0 %vm5437_vm3, %v5988_v20  ;;  %5568 = vmatpush1.bf16.msk.msra.mxu1 %vm5437_vm3, %v5988_v20  ;;  %vm978_vm3 = vcmp.eq.s32.totalorder %v848_v42, %v6367_v16 }
 0x43b   :  { %5440 = vmatprep.subr.msk.bf16.mxu0 %vm5439_vm4, %v5988_v20  ;;  %5570 = vmatprep.subr.msk.bf16.mxu1 %vm5439_vm4, %v5988_v20  ;;  %vm980_vm4 = vcmp.eq.s32.totalorder %v849_v32, %v6367_v16 }
 0x43c   :  { %vm5451_vm7 = vmpackc.low %vm980_vm4, %vm978_vm3  ;;  %vm985_vm3 = vcmp.eq.s32.totalorder %v852_v46, %v6376_v19  ;;  %vm987_vm4 = vcmp.eq.s32.totalorder %v853_v47, %v6376_v19 }
 0x43d   :  { %vm5461_vm5 = vmpackc.low %vm987_vm4, %vm985_vm3  ;;  %vm1004_vm3 = vcmp.eq.s32.totalorder %v861_v56, %v6367_v16 }
 0x43e   :  { %5442 = vmatpush1.bf16.msk.msra.mxu0 %vm5441_vm9, %v5988_v20  ;;  %5572 = vmatpush1.bf16.msk.msra.mxu1 %vm5441_vm9, %v5988_v20  ;;  %vm982_vm9 = vcmp.eq.s32.totalorder %v850_v63, %v6367_v16  ;;  %v1132_v28 = vsel %vm1004_vm3, 1.0, %v5984_v0 }
 0x43f   :  { %5444 = vmatprep.subr.msk.bf16.mxu0 %vm5443_vm1, %v5988_v20  ;;  %5574 = vmatprep.subr.msk.bf16.mxu1 %vm5443_vm1, %v5988_v20  ;;  %vm984_vm1 = vcmp.eq.s32.totalorder %v851_v45, %v6367_v16  ;;  %v5475_v3 = vpack.c.bf16 %v1132_v28, %v5989_v29  ;;  %v1555_v45 = vld [vmem:[%s6037_s29] sm:$0x1f]  ;;  %s5996_s29 = smov 120  }
 0x440   :  { %vm5455_vm11 = vmpackc.low %vm984_vm1, %vm982_vm9  ;;  %vm989_vm9 = vcmp.eq.s32.totalorder %v854_v31, %v6376_v19  ;;  %vm991_vm1 = vcmp.eq.s32.totalorder %v855_v33, %v6376_v19 }
 0x441   :  { %vm5465_vm12 = vmpackc.low %vm991_vm1, %vm989_vm9  ;;  %vm1002_vm9 = vcmp.eq.s32.totalorder %v860_v57, %v6367_v16  ;;  %vm1179_vm1 = vcmask 1043456  }
 0x442   :  { %5446 = vmatpush1.bf16.msk.msra.mxu0 %vm5445_vm14, %v5988_v20  ;;  %5576 = vmatpush1.bf16.msk.msra.mxu1 %vm5445_vm14, %v5988_v20  ;;  %vm986_vm14 = vcmp.eq.s32.totalorder %v852_v46, %v6367_v16 }
 0x443   :  { %5448 = vmatprep.subr.msk.bf16.mxu0 %vm5447_vm15, %v5988_v20  ;;  %5578 = vmatprep.subr.msk.bf16.mxu1 %vm5447_vm15, %v5988_v20  ;;  %vm988_vm15 = vcmp.eq.s32.totalorder %v853_v47, %v6367_v16 }
 0x444   :  { %vm5459_vm0 = vmpackc.low %vm988_vm15, %vm986_vm14  ;;  %vm993_vm14 = vcmp.eq.s32.totalorder %v856_v49, %v6376_v19  ;;  %vm995_vm15 = vcmp.eq.s32.totalorder %v857_v27, %v6376_v19 }
 0x445   :  { %vm5469_vm4 = vmpackc.low %vm995_vm15, %vm993_vm14  ;;  %vm1515_vm14 = vcmask 1019904   ;;  %vm1523_vm15 = vcmask 7168  }
 0x446   :  { %5450 = vmatpush1.bf16.msk.msra.mxu0 %vm5449_vm6, %v5988_v20  ;;  %5580 = vmatpush1.bf16.msk.msra.mxu1 %vm5449_vm6, %v5988_v20  ;;  %vm990_vm6 = vcmp.eq.s32.totalorder %v854_v31, %v6367_v16 }
 0x447   :  { %5452 = vmatprep.subr.msk.bf16.mxu0 %vm5451_vm7, %v5988_v20  ;;  %5582 = vmatprep.subr.msk.bf16.mxu1 %vm5451_vm7, %v5988_v20  ;;  %vm992_vm7 = vcmp.eq.s32.totalorder %v855_v33, %v6367_v16 }
 0x448   :  { %vm5463_vm8 = vmpackc.low %vm992_vm7, %vm990_vm6  ;;  %vm997_vm6 = vcmp.eq.s32.totalorder %v858_v60, %v6376_v19 }
 0x44a   :  { %5454 = vmatpush1.bf16.msk.msra.mxu0 %vm5453_vm10, %v5988_v20  ;;  %5584 = vmatpush1.bf16.msk.msra.mxu1 %vm5453_vm10, %v5988_v20  ;;  %vm994_vm10 = vcmp.eq.s32.totalorder %v856_v49, %v6367_v16 }
 0x44b   :  { %5456 = vmatprep.subr.msk.bf16.mxu0 %vm5455_vm11, %v5988_v20  ;;  %5586 = vmatprep.subr.msk.bf16.mxu1 %vm5455_vm11, %v5988_v20  ;;  %vm996_vm11 = vcmp.eq.s32.totalorder %v857_v27, %v6367_v16 }
 0x44c   :  { %vm5467_vm13 = vmpackc.low %vm996_vm11, %vm994_vm10  ;;  %vm1001_vm11 = vcmp.eq.s32.totalorder %v860_v57, %v6376_v19 }
 0x44e   :  { %5458 = vmatpush1.bf16.msk.msra.mxu0 %vm5457_vm2, %v5988_v20  ;;  %5588 = vmatpush1.bf16.msk.msra.mxu1 %vm5457_vm2, %v5988_v20  ;;  %vm998_vm2 = vcmp.eq.s32.totalorder %v858_v60, %v6367_v16 }
 0x44f   :  { %5460 = vmatprep.subr.msk.bf16.mxu0 %vm5459_vm0, %v5988_v20  ;;  %5590 = vmatprep.subr.msk.bf16.mxu1 %vm5459_vm0, %v5988_v20  ;;  %vm1000_vm0 = vcmp.eq.s32.totalorder %v859_v55, %v6367_v16 }
 0x450   :  { %vm5471_vm7 = vmpackc.low %vm1000_vm0, %vm998_vm2  ;;  %vm7389_vm2 = vcmask 326656   ;;  %vm1690_vm0 = vcmp.lt.s32.totalorder %v6348_v4, 31 }
 0x452   :  { %5462 = vmatpush1.bf16.msk.msra.mxu0 %vm5461_vm5, %v5988_v20  ;;  %5592 = vmatpush1.bf16.msk.msra.mxu1 %vm5461_vm5, %v5988_v20  ;;  %vm999_vm5 = vcmp.eq.s32.totalorder %v859_v55, %v6376_v19 }
 0x453   :  { %5464 = vmatprep.subr.msk.bf16.mxu0 %vm5463_vm8, %v5988_v20  ;;  %5594 = vmatprep.subr.msk.bf16.mxu1 %vm5463_vm8, %v5988_v20  ;;  %vm1003_vm8 = vcmp.eq.s32.totalorder %v861_v56, %v6376_v19  ;;  %vm5473_vm10 = vmpackc.low %vm999_vm5, %vm997_vm6 }
 0x454   :  { %v1131_v8 = vsel %vm1003_vm8, 1.0, %v5984_v0 }
 0x455   :  { %v5478_v16 = vpack.c.bf16 %v1131_v8, %v5989_v29 }
 0x456   :  { %5466 = vmatpush1.bf16.msk.msra.mxu0 %vm5465_vm12, %v5988_v20  ;;  %5596 = vmatpush1.bf16.msk.msra.mxu1 %vm5465_vm12, %v5988_v20  ;;  %vm5476_vm12 = vmpackc.low %vm1179_vm1, %vm1002_vm9 }
 0x457   :  { %5468 = vmatprep.subr.msk.bf16.mxu0 %vm5467_vm13, %v5988_v20  ;;  %5598 = vmatprep.subr.msk.bf16.mxu1 %vm5467_vm13, %v5988_v20  ;;  %vm5479_vm13 = vmpackc.low %vm1179_vm1, %vm1001_vm11 }
 0x45a   :  { %5470 = vmatpush1.bf16.msk.msra.mxu0 %vm5469_vm4, %v5988_v20  ;;  %5600 = vmatpush1.bf16.msk.msra.mxu1 %vm5469_vm4, %v5988_v20 }
 0x45b   :  { %5472 = vmatprep.subr.msk.bf16.mxu0 %vm5471_vm7, %v5988_v20  ;;  %5602 = vmatprep.subr.msk.bf16.mxu1 %vm5471_vm7, %v5988_v20 }
 0x45e   :  { %5474 = vmatpush1.bf16.msk.msra.mxu0 %vm5473_vm10, %v5988_v20  ;;  %5604 = vmatpush1.bf16.msk.msra.mxu1 %vm5473_vm10, %v5988_v20 }
 0x45f   :  { %5477 = vmatprep.subr.msk.bf16.mxu0 %vm5476_vm12, %v5475_v3  ;;  %5607 = vmatprep.subr.msk.bf16.mxu1 %vm5476_vm12, %v5475_v3 }
 0x462   :  { %5480 = vmatpush1.bf16.msk.msra.mxu0 %vm5479_vm13, %v5478_v16  ;;  %5610 = vmatpush1.bf16.msk.msra.mxu1 %vm5479_vm13, %v5478_v16 }
 0x465   :  { %1322 = vmatmul.mubr.f32.vlgmr.msra.gmra.mrb[4].mxu0 %v1173_v43  ;;  %1509 = vmatmul.mubr.f32.vlgmr.msra.gmra.mrb[4].mxu1 %v1368_v52 }
 0x466   :  { %1639 = vmatprep.mubr.f32.mxu0 %v5984_v0 }
 0x538   :  { %v1323_v19 = vpop.f32.mrb[4].mxu0  ;;  %v1510_v59 = vpop.f32.mrb[4].mxu1 }
 0x539   :  { %1516 = vst.msk [vmem:[#allocation2] sm:$0x1f] %vm1515_vm14, %v1323_v19  ;;  %1536 = vst.msk [vmem:[#allocation2 + $0x8] sm:$0x1f] %vm1515_vm14, %v1510_v59  ;;  %v1325_v58 = vpop.f32.mrb[5].mxu0  ;;  %1539 = vrot.lane.b32.xlu0 %v1510_v59, %s5990_s9  ;;  %v1512_v61 = vpop.f32.mrb[5].mxu1 }
 0x53a   :  { %1531 = vst.msk [vmem:[#allocation2 + $0xc0] sm:$0x1f] %vm1515_vm14, %v1325_v58  ;;  %1550 = vst.msk [vmem:[#allocation2 + $0xc8] sm:$0x1f] %vm1515_vm14, %v1512_v61  ;;  %1541 = vrot.lane.b32.xlu1 %v1512_v61, %s5990_s9 }
 0x53d   :  { %1519 = vrot.lane.b32.xlu0 %v1323_v19, %s5990_s9 }
 0x53e   :  { %1521 = vrot.lane.b32.xlu1 %v1325_v58, %s5990_s9 }
 0x540   :  { %v1557_v1 = vld [vmem:[#allocation2 + $0x8] sm:$0xff]  ;;  %v1556_v6 = vld [vmem:[#allocation2] sm:$0xff] }
 0x541   :  { %1546 = vrot.lane.b32.xlu0 %v1510_v59, %s5985_s0  ;;  %v1563_v13 = vld [vmem:[#allocation2 + $0xc8] sm:$0xff]  ;;  %v1562_v42 = vld [vmem:[#allocation2 + $0xc0] sm:$0xff] }
 0x542   :  { %1527 = vrot.lane.b32.xlu1 %v1323_v19, %s5985_s0 }
 0x545   :  { %1551 = vrot.lane.b32.xlu0 %v1510_v59, %s5986_s5 }
 0x546   :  { %1532 = vrot.lane.b32.xlu1 %v1323_v19, %s5986_s5 }
 0x549   :  { %1569 = vperm.xlu0 %5855, %v1566_v34   ;;  %v1680_v34 = vld [vmem:[%s6052_s14] sm:$0x1f]  ;;  %s7395_s14 = sld [smem:[#allocation11_spill]] }
 0x5ab   :  { %v1540_v48 = vpop.permute.xlu0 %1539 }
 0x5ac   :  { %v1542_v52 = vpop.permute.xlu1 %1541 }
 0x5ad   :  { %v1543_v62 = vsel %vm1523_vm15, %v1540_v48, %v1542_v52 }
 0x5ae   :  { %1545 = vst.msk [vmem:[#allocation2 + $0x48] sm:$0x1f] %vm1515_vm14, %v1543_v62 }
 0x5af   :  { %v1520_v41 = vpop.permute.xlu0 %1519 }
 0x5b0   :  { %v1522_v51 = vpop.permute.xlu1 %1521 }
 0x5b1   :  { %v1524_v54 = vsel %vm1523_vm15, %v1520_v41, %v1522_v51 }
 0x5b2   :  { %1526 = vst.msk [vmem:[#allocation2 + $0x40] sm:$0x1f] %vm1515_vm14, %v1524_v54  ;;  %v4788_v54 = vadd.s32 4294967265, %v6348_v4 }
 0x5b3   :  { %v1547_v2 = vpop.permute.xlu0 %1546 }
 0x5b4   :  { %1549 = vst.msk [vmem:[#allocation2 + $0x88] sm:$0x1f] %vm1515_vm14, %v1547_v2  ;;  %v1528_v30 = vpop.permute.xlu1 %1527  ;;  %v1668_v2 = vld [vmem:[%s6047_s8] sm:$0x1f]  ;;  %s7394_s8 = sld [smem:[#allocation12_spill]] }
 0x5b5   :  { %1530 = vst.msk [vmem:[#allocation2 + $0x80] sm:$0x1f] %vm1515_vm14, %v1528_v30  ;;  %v1559_v43 = vld [vmem:[#allocation2 + $0x48] sm:$0xff] }
 0x5b6   :  { %v5611_v44 = vpack.c.bf16 %v1559_v43, %v1557_v1  ;;  %v1692_v43 = vmul.u32 4, %v4788_v54 }
 0x5b7   :  { %v1552_v50 = vpop.permute.xlu0 %1551 }
 0x5b8   :  { %1554 = vst.msk [vmem:[#allocation2 + $0x108] sm:$0x1f] %vm1515_vm14, %v1552_v50  ;;  %5612 = vmatprep.subr.bf16.mxu0 %v5611_v44  ;;  %v1533_v53 = vpop.permute.xlu1 %1532  ;;  %v1693_v44 = vadd.s32 2, %v1692_v43 }
 0x5b9   :  { %1535 = vst.msk [vmem:[#allocation2 + $0x100] sm:$0x1f] %vm1515_vm14, %v1533_v53  ;;  %v1558_v7 = vld [vmem:[#allocation2 + $0x40] sm:$0xff]  ;;  %v5991_v53 = vmov 0.0|0.0  }
 0x5ba   :  { %v5613_v10 = vpack.c.bf16 %v1558_v7, %v1556_v6  ;;  %v1694_v50 = vsel %vm1690_vm0, %v6355_v9, %v1693_v44  ;;  %5619 = vmatprep.subr.bf16.mxu1 %v5991_v53 }
 0x5bb   :  { %v1561_v12 = vld [vmem:[#allocation2 + $0x88] sm:$0xff]  ;;  %vm1695_vm3 = vcmp.eq.s32.totalorder %v6350_v5, %v1694_v50  ;;  %vm1696_vm4 = vcmp.eq.s32.totalorder %v6358_v11, %v1694_v50  ;;  %vm1697_vm6 = vcmp.eq.s32.totalorder %v6362_v14, %v1694_v50  ;;  %vm1698_vm5 = vcmp.eq.s32.totalorder %v6365_v15, %v1694_v50 }
 0x5bc   :  { %5614 = vmatpush1.bf16.msra.mxu0 %v5613_v10  ;;  %v5615_v39 = vpack.c.bf16 %v1563_v13, %v1561_v12  ;;  %v1560_v40 = vld [vmem:[#allocation2 + $0x80] sm:$0xff]  ;;  %vm5620_vm7 = vmpackc.low %vm1696_vm4, %vm1695_vm3  ;;  %vm1699_vm9 = vcmp.eq.s32.totalorder %v6370_v17, %v1694_v50  ;;  %vm1700_vm1 = vcmp.eq.s32.totalorder %v6373_v18, %v1694_v50  ;;  %vm1701_vm11 = vcmp.eq.s32.totalorder %v6401_v21, %v1694_v50 }
 0x5bd   :  { %v5617_v32 = vpack.c.bf16 %v1562_v42, %v1560_v40  ;;  %5621 = vmatpush3.bf16.msk.msra.mxu1 %vm5620_vm7, %v5988_v20  ;;  %vm5623_vm8 = vmpackc.low %vm1698_vm5, %vm1697_vm6  ;;  %vm1702_vm12 = vcmp.eq.s32.totalorder %v6404_v22, %v1694_v50  ;;  %vm1704_vm15 = vcmp.eq.s32.totalorder %v6425_v24, %v1694_v50  ;;  %vm1705_vm0 = vcmp.eq.s32.totalorder %v6440_v25, %v1694_v50 }
 0x5be   :  { %5616 = vmatprep.subr.bf16.mxu0 %v5615_v39  ;;  %5622 = vmatprep.subr.bf16.mxu1 %v5991_v53  ;;  %vm5626_vm10 = vmpackc.low %vm1700_vm1, %vm1699_vm9  ;;  %vm1706_vm3 = vcmp.eq.s32.totalorder %v6443_v26, %v1694_v50  ;;  %vm1707_vm6 = vcmp.eq.s32.totalorder %v6458_v35, %v1694_v50  ;;  %vm1709_vm9 = vcmp.eq.s32.totalorder %v6476_v37, %v1694_v50  ;;  %vm1740_vm1 = vcmask 1042432  }
 0x5bf   :  { %v1565_v63 = vld [vmem:[#allocation2 + $0x108] sm:$0xff]  ;;  %vm5629_vm13 = vmpackc.low %vm1702_vm12, %vm1701_vm11  ;;  %vm5992_vm11 = vmmov 0   ;;  %vm1736_vm12 = vcmask 1006592  }
 0x5c0   :  { %5618 = vmatpush1.bf16.msra.mxu0 %v5617_v32  ;;  %v1564_v46 = vld [vmem:[#allocation2 + $0x100] sm:$0xff]  ;;  %vm5635_vm4 = vmpackc.low %vm1706_vm3, %vm1705_vm0  ;;  %5045 = vmatprep.mubr.msk.f32.mxu1 %vm5992_vm11, %v5984_v0 }
 0x5c1   :  { %1583 = vmatprep.subr.mxu0 %v1565_v63  ;;  %5624 = vmatpush3.bf16.msk.msra.mxu1 %vm5623_vm8, %v5988_v20 }
 0x5c2   :  { %5625 = vmatprep.subr.bf16.mxu1 %v5991_v53 }
 0x5c4   :  { %1584 = vmatpush1.msra.mxu0 %v1564_v46 }
 0x5c5   :  { %4787 = vmatmul.mubr.msk.f32.vlgmr.msra.gmra.mrb[6].mxu0 %vm7389_vm2, %v1555_v45  ;;  %5644 = vmatprep.subr.bf16.mxu0 %v5991_v53  ;;  %v1944_v45 = vld [vmem:[%s6062_s24] sm:$0x1f]  ;;  %s7397_s24 = sld [smem:[#allocation15_spill]] }
 0x5c6   :  { %5646 = vmatpush3.bf16.msk.msra.mxu0 %vm5620_vm7, %v5988_v20  ;;  %5627 = vmatpush3.bf16.msk.msra.mxu1 %vm5626_vm10, %v5988_v20  ;;  %vm1708_vm7 = vcmp.eq.s32.totalorder %v6461_v36, %v1694_v50 }
 0x5c7   :  { %5647 = vmatprep.subr.bf16.mxu0 %v5991_v53  ;;  %5628 = vmatprep.subr.bf16.mxu1 %v5991_v53  ;;  %vm5638_vm5 = vmpackc.low %vm1708_vm7, %vm1707_vm6 }
 0x5c8   :  { %v1570_v47 = vpop.permute.xlu0 %1569  ;;  %5080 = vmatprep.mubr.msk.f32.mxu0 %vm5992_vm11, %v5984_v0 }
 0x5ca   :  { %5649 = vmatpush3.bf16.msk.msra.mxu0 %vm5623_vm8, %v5988_v20  ;;  %5630 = vmatpush3.bf16.msk.msra.mxu1 %vm5629_vm13, %v5988_v20  ;;  %vm1710_vm8 = vcmp.eq.s32.totalorder %v6479_v38, %v1694_v50 }
 0x5cb   :  { %5650 = vmatprep.subr.bf16.mxu0 %v5991_v53  ;;  %5631 = vmatprep.subr.bf16.mxu1 %v5991_v53  ;;  %v1726_v17 = vsel %vm1710_vm8, 1.0, %v5984_v0  ;;  %vm2249_vm8 = vcmask 36864  }
 0x5cc   :  { %v5641_v18 = vpack.c.bf16 %v1726_v17, %v5989_v29 }
 0x5ce   :  { %5652 = vmatpush3.bf16.msk.msra.mxu0 %vm5626_vm10, %v5988_v20  ;;  %vm5642_vm10 = vmpackc.low %vm1740_vm1, %vm1709_vm9 }
 0x5cf   :  { %5653 = vmatprep.subr.bf16.mxu0 %v5991_v53 }
 0x5d2   :  { %5655 = vmatpush3.bf16.msk.msra.mxu0 %vm5629_vm13, %v5988_v20  ;;  %vm1896_vm13 = vcmask 233472  }
 0x5d3   :  { %5656 = vmatprep.subr.bf16.mxu0 %v5991_v53 }
 0x698   :  { %v1641_v31 = vpop.f32.mrb[6].mxu0 }
 0x699   :  { %v1642_v33 = vadd.f32 %v1641_v31, %v1570_v47  ;;  %v1643_v49 = vpop.f32.mrb[7].mxu0 }
 0x69a   :  { %v1644_v27 = vadd.f32 %v1643_v49, %v1570_v47 }
 0x69b   :  { %v1646_v60 = vsel %vm1515_vm14, %v1642_v33, 0.0 }
 0x69c   :  { %1647 = vadd.xlane.f32.xlu1 %v1646_v60  ;;  %v1650_v55 = vsel %vm1515_vm14, %v1644_v27, 0.0 }
 0x69d   :  { %1651 = vadd.xlane.f32.xlu0 %v1650_v55 }
 0x729   :  { %v1648_v56 = vpop.xlane.xlu1 %1647 }
 0x72a   :  { %v1652_v57 = vpop.xlane.xlu0 %1651 }
 0x72b   :  { %v1653_v28 = vadd.f32 %v1652_v57, %v1648_v56 }
 0x72d   :  { %v1655_v3 = vmul.f32 0.004, %v1653_v28 }
 0x72f   :  { %v6931_v8 = vsub.f32 %v1642_v33, %v1655_v3  ;;  %v6933_v16 = vsub.f32 %v1644_v27, %v1655_v3 }
 0x731   :  { %v1663_v19 = vmul.f32 %v6933_v16, %v6933_v16  ;;  %v1658_v59 = vmul.f32 %v6931_v8, %v6931_v8 }
 0x733   :  { %v1664_v58 = vsel %vm1515_vm14, %v1663_v19, 0.0  ;;  %v1659_v61 = vsel %vm1515_vm14, %v1658_v59, 0.0  ;;  %vm1703_vm14 = vcmp.eq.s32.totalorder %v6422_v23, %v1694_v50 }
 0x734   :  { %1665 = vadd.xlane.f32.xlu1 %v1664_v58  ;;  %1660 = vadd.xlane.f32.xlu0 %v1659_v61  ;;  %vm5632_vm2 = vmpackc.low %vm1704_vm15, %vm1703_vm14  ;;  %vm7390_vm14 = vcmask 326656   ;;  %vm2068_vm15 = vcmp.lt.s32.totalorder %v6348_v4, 7 }
 0x735   :  { %5633 = vmatpush3.bf16.msk.msra.mxu1 %vm5632_vm2, %v5988_v20  ;;  %5658 = vmatpush3.bf16.msk.msra.mxu0 %vm5632_vm2, %v5988_v20  ;;  %vm7393_vm9 = vmmov %vm7390_vm14 }
 0x736   :  { %5634 = vmatprep.subr.bf16.mxu1 %v5991_v53  ;;  %5659 = vmatprep.subr.bf16.mxu0 %v5991_v53 }
 0x739   :  { %5636 = vmatpush3.bf16.msk.msra.mxu1 %vm5635_vm4, %v5988_v20  ;;  %5661 = vmatpush3.bf16.msk.msra.mxu0 %vm5635_vm4, %v5988_v20 }
 0x73a   :  { %5637 = vmatprep.subr.bf16.mxu1 %v5991_v53  ;;  %5662 = vmatprep.subr.bf16.mxu0 %v5991_v53 }
 0x73d   :  { %5639 = vmatpush3.bf16.msk.msra.mxu1 %vm5638_vm5, %v5988_v20  ;;  %5664 = vmatpush3.bf16.msk.msra.mxu0 %vm5638_vm5, %v5988_v20  ;;  %vm2090_vm5 = vcmask 220160  }
 0x73e   :  { %5640 = vmatprep.subr.bf16.mxu1 %v5991_v53  ;;  %5665 = vmatprep.subr.bf16.mxu0 %v5991_v53 }
 0x741   :  { %5643 = vmatpush3.bf16.msk.msra.mxu1 %vm5642_vm10, %v5641_v18  ;;  %5668 = vmatpush3.bf16.msk.msra.mxu0 %vm5642_vm10, %v5641_v18  ;;  %vm2421_vm10 = vcmp.lt.s32.totalorder %v6348_v4, 2 }
 0x742   :  { %5677 = vmatprep.subr.bf16.mxu0 %v5991_v53 }
 0x745   :  { %1683 = vperm.xlu1 %5856, %v1680_v34  }
 0x7c1   :  { %v1666_v48 = vpop.xlane.xlu1 %1665  ;;  %v1661_v52 = vpop.xlane.xlu0 %1660 }
 0x7c2   :  { %v1667_v62 = vadd.f32 %v1666_v48, %v1661_v52 }
 0x7c4   :  { %v1669_v41 = vmul.f32 0.004, %v1667_v62  ;;  %v1933_v62 = vld [vmem:[%s6057_s19] sm:$0x1f]  ;;  %s7396_s19 = sld [smem:[#allocation13_spill]] }
 0x7c5   :  { %v1684_v24 = vpop.permute.xlu1 %1683 }
 0x7c6   :  { %v1670_v51 = vadd.f32 1e-05, %v1669_v41 }
 0x7c8   :  { %5895 = vrsqrt.f32 %v1670_v51 }
 0x7d2   :  { %v5896_v30 = vpop.eup %5895 }
 0x7d3   :  { %v1672_v1 = vmul.f32 %v5896_v30, %v1668_v2 }
 0x7d5   :  { %1675 = vperm.xlu0 %5855, %v1672_v1  }
 0x854   :  { %v1676_v21 = vpop.permute.xlu0 %1675 }
 0x855   :  { %v1678_v22 = vmul.f32 %v1676_v21, %v6931_v8  ;;  %v1679_v23 = vmul.f32 %v1676_v21, %v6933_v16 }
 0x857   :  { %v1686_v25 = vadd.f32 %v1684_v24, %v1678_v22  ;;  %v1687_v26 = vadd.f32 %v1684_v24, %v1679_v23 }
 0x859   :  { %v1689_v35 = vmax.f32 %v1687_v26, 0.0  ;;  %v1688_v36 = vmax.f32 %v1686_v25, 0.0 }
 0x85b   :  { %1815 = vrot.lane.b32.xlu1 %v1689_v35, %s5985_s0  ;;  %1728 = vrot.lane.b32.xlu0 %v1688_v36, %s5985_s0 }
 0x85f   :  { %1819 = vrot.lane.b32.xlu1 %v1689_v35, %s5986_s5  ;;  %1732 = vrot.lane.b32.xlu0 %v1688_v36, %s5986_s5 }
 0x8cd   :  { %v1816_v37 = vpop.permute.xlu1 %1815  ;;  %v1729_v38 = vpop.permute.xlu0 %1728 }
 0x8ce   :  { %v1818_v6 = vmax.f32 %v1689_v35, %v1816_v37  ;;  %v1731_v7 = vmax.f32 %v1688_v36, %v1729_v38  ;;  %v2058_v36 = vld [vmem:[%s6072_s6] sm:$0x1f]  ;;  %s7399_s6 = sld [smem:[#allocation17_spill]] }
 0x8d1   :  { %v1820_v10 = vpop.permute.xlu1 %1819  ;;  %v1733_v12 = vpop.permute.xlu0 %1732 }
 0x8d2   :  { %v1822_v13 = vmax.f32 %v1818_v6, %v1820_v10  ;;  %v1735_v39 = vmax.f32 %v1731_v7, %v1733_v12  ;;  %v2046_v12 = vld [vmem:[%s6067_s30] sm:$0x1f]  ;;  %s7398_s30 = sld [smem:[#allocation14_spill]] }
 0x8d4   :  { %5046 = vmatmul.mubr.msk.f32.vlgmr.msra.gmra.mrb[6].mxu1 %vm1736_vm12, %v1735_v39  ;;  %5081 = vmatmul.mubr.msk.f32.vlgmr.msra.gmra.mrb[8].mxu0 %vm1736_vm12, %v1822_v13 }
 0x8d5   :  { %2017 = vmatprep.mubr.f32.mxu1 %v5984_v0  ;;  %5091 = vmatprep.mubr.msk.f32.mxu0 %vm5992_vm11, %v5984_v0 }
 0x9a7   :  { %v1810_v40 = vpop.f32.mrb[6].mxu1  ;;  %v1892_v42 = vpop.f32.mrb[8].mxu0 }
 0x9a8   :  { %1897 = vst.msk [vmem:[#allocation2] sm:$0x1f] %vm1896_vm13, %v1810_v40  ;;  %1915 = vst.msk [vmem:[#allocation2 + $0x8] sm:$0x1f] %vm1896_vm13, %v1892_v42  ;;  %1917 = vrot.lane.b32.xlu1 %v1892_v42, %s5993_s13  ;;  %v5082_v32 = vpop.f32.mrb[9].mxu0  ;;  %1899 = vrot.lane.b32.xlu0 %v1810_v40, %s5993_s13  ;;  %v5047_v63 = vpop.f32.mrb[7].mxu1 }
 0x9ac   :  { %1921 = vrot.lane.b32.xlu1 %v1892_v42, %s5985_s0  ;;  %1925 = vrot.lane.b32.xlu0 %v1892_v42, %s5994_s17 }
 0x9af   :  { %v1935_v49 = vld [vmem:[#allocation2 + $0x8] sm:$0xff]  ;;  %v1934_v56 = vld [vmem:[#allocation2] sm:$0xff] }
 0x9b0   :  { %1903 = vrot.lane.b32.xlu1 %v1810_v40, %s5985_s0  ;;  %1907 = vrot.lane.b32.xlu0 %v1810_v40, %s5994_s17 }
 0x9b4   :  { %1929 = vrot.lane.b32.xlu1 %v1892_v42, %s5986_s5  ;;  %1911 = vrot.lane.b32.xlu0 %v1810_v40, %s5986_s5  ;;  %v4824_v40 = vadd.s32 4294967289, %v6348_v4 }
 0x9b6   :  { %v2070_v42 = vmul.u32 4, %v4824_v40 }
 0x9b8   :  { %1947 = vperm.xlu1 %5856, %v1944_v45   ;;  %v2071_v32 = vadd.s32 2, %v2070_v42 }
 0x9ba   :  { %v2072_v63 = vsel %vm2068_vm15, %v6355_v9, %v2071_v32  ;;  %vm2992_vm15 = vcmask 261120  }
 0x9bb   :  { %vm2073_vm2 = vcmp.eq.s32.totalorder %v6350_v5, %v2072_v63  ;;  %vm2074_vm0 = vcmp.eq.s32.totalorder %v6358_v11, %v2072_v63  ;;  %vm2076_vm4 = vcmp.eq.s32.totalorder %v6365_v15, %v2072_v63  ;;  %vm2075_vm6 = vcmp.eq.s32.totalorder %v6362_v14, %v2072_v63 }
 0x9bc   :  { %vm5678_vm3 = vmpackc.low %vm2074_vm0, %vm2073_vm2  ;;  %v2080_v45 = vsel %vm2076_vm4, 1.0, %v5984_v0  ;;  %vm3540_vm2 = vcmask 57344  }
 0x9bd   :  { %5679 = vmatpush3.bf16.msk.msra.mxu0 %vm5678_vm3, %v5988_v20  ;;  %v5681_v9 = vpack.c.bf16 %v2080_v45, %v5989_v29  ;;  %vm5682_vm7 = vmpackc.low %vm1740_vm1, %vm2075_vm6 }
 0x9be   :  { %5680 = vmatprep.subr.bf16.mxu0 %v5991_v53 }
 0x9c1   :  { %5683 = vmatpush3.bf16.msk.msra.mxu0 %vm5682_vm7, %v5681_v9 }
 0xa1a   :  { %v1918_v46 = vpop.permute.xlu1 %1917  ;;  %v1900_v47 = vpop.permute.xlu0 %1899 }
 0xa1b   :  { %1920 = vst.msk [vmem:[#allocation2 + $0x48] sm:$0x1f] %vm1896_vm13, %v1918_v46  ;;  %1902 = vst.msk [vmem:[#allocation2 + $0x40] sm:$0x1f] %vm1896_vm13, %v1900_v47 }
 0xa1e   :  { %v1922_v31 = vpop.permute.xlu1 %1921  ;;  %v1926_v33 = vpop.permute.xlu0 %1925 }
 0xa1f   :  { %1924 = vst.msk [vmem:[#allocation2 + $0x88] sm:$0x1f] %vm1896_vm13, %v1922_v31  ;;  %1928 = vst.msk [vmem:[#allocation2 + $0xc8] sm:$0x1f] %vm1896_vm13, %v1926_v33 }
 0xa22   :  { %v1904_v27 = vpop.permute.xlu1 %1903  ;;  %v1908_v60 = vpop.permute.xlu0 %1907  ;;  %v1937_v55 = vld [vmem:[#allocation2 + $0x48] sm:$0xff]  ;;  %v1936_v57 = vld [vmem:[#allocation2 + $0x40] sm:$0xff] }
 0xa23   :  { %1906 = vst.msk [vmem:[#allocation2 + $0x80] sm:$0x1f] %vm1896_vm13, %v1904_v27  ;;  %1910 = vst.msk [vmem:[#allocation2 + $0xc0] sm:$0x1f] %vm1896_vm13, %v1908_v60  ;;  %v5669_v28 = vpack.c.bf16 %v1937_v55, %v1935_v49  ;;  %v5671_v3 = vpack.c.bf16 %v1936_v57, %v1934_v56 }
 0xa25   :  { %5670 = vmatprep.subr.bf16.mxu1 %v5669_v28 }
 0xa26   :  { %v1930_v8 = vpop.permute.xlu1 %1929  ;;  %v1912_v16 = vpop.permute.xlu0 %1911  ;;  %5672 = vmatpush1.bf16.msra.mxu1 %v5671_v3  ;;  %v1939_v19 = vld [vmem:[#allocation2 + $0x88] sm:$0xff] }
 0xa27   :  { %v1941_v59 = vld [vmem:[#allocation2 + $0xc8] sm:$0xff]  ;;  %1932 = vst.msk [vmem:[#allocation2 + $0x108] sm:$0x1f] %vm1896_vm13, %v1930_v8  ;;  %1914 = vst.msk [vmem:[#allocation2 + $0x100] sm:$0x1f] %vm1896_vm13, %v1912_v16 }
 0xa28   :  { %v5673_v58 = vpack.c.bf16 %v1941_v59, %v1939_v19  ;;  %v2297_v59 = vld [vmem:[%s7391_s21] sm:$0x1f] }
 0xa2a   :  { %5674 = vmatprep.subr.bf16.mxu1 %v5673_v58  ;;  %v1938_v61 = vld [vmem:[#allocation2 + $0x80] sm:$0xff] }
 0xa2b   :  { %v1940_v34 = vld [vmem:[#allocation2 + $0xc0] sm:$0xff] }
 0xa2c   :  { %v5675_v48 = vpack.c.bf16 %v1940_v34, %v1938_v61 }
 0xa2e   :  { %5676 = vmatpush1.bf16.msra.mxu1 %v5675_v48  ;;  %v1943_v52 = vld [vmem:[#allocation2 + $0x108] sm:$0xff]  ;;  %v1942_v41 = vld [vmem:[#allocation2 + $0x100] sm:$0xff] }
 0xa2f   :  { %1961 = vmatprep.subr.mxu1 %v1943_v52 }
 0xa32   :  { %1962 = vmatpush1.msra.mxu1 %v1942_v41 }
 0xa33   :  { %4823 = vmatmul.mubr.msk.f32.vlgmr.msra.gmra.mrb[8].mxu1 %vm7390_vm14, %v1933_v62  ;;  %5684 = vmatprep.subr.bf16.mxu1 %v5991_v53  ;;  %vm2599_vm14 = vcmask 15360  }
 0xa34   :  { %5102 = vmatprep.mubr.msk.f32.mxu1 %vm5992_vm11, %v5984_v0  ;;  %5686 = vmatpush3.bf16.msk.msra.mxu1 %vm5678_vm3, %v5988_v20 }
 0xa35   :  { %5687 = vmatprep.subr.bf16.mxu1 %v5991_v53 }
 0xa37   :  { %v1948_v51 = vpop.permute.xlu1 %1947 }
 0xa38   :  { %5690 = vmatpush3.bf16.msk.msra.mxu1 %vm5682_vm7, %v5681_v9 }
 0xa39   :  { %5110 = vmatprep.subr.mxu1 %v5984_v0 }
 0xb06   :  { %v2019_v54 = vpop.f32.mrb[8].mxu1 }
 0xb07   :  { %v2020_v2 = vadd.f32 %v2019_v54, %v1948_v51  ;;  %v2021_v30 = vpop.f32.mrb[9].mxu1 }
 0xb08   :  { %v2022_v1 = vadd.f32 %v2021_v30, %v1948_v51 }
 0xb09   :  { %v2024_v43 = vsel %vm1896_vm13, %v2020_v2, 0.0 }
 0xb0a   :  { %2025 = vadd.xlane.f32.xlu0 %v2024_v43  ;;  %v2028_v44 = vsel %vm1896_vm13, %v2022_v1, 0.0 }
 0xb0b   :  { %2029 = vadd.xlane.f32.xlu1 %v2028_v44 }
 0xb97   :  { %v2026_v50 = vpop.xlane.xlu0 %2025 }
 0xb98   :  { %v2030_v17 = vpop.xlane.xlu1 %2029 }
 0xb99   :  { %v2031_v18 = vadd.f32 %v2030_v17, %v2026_v50 }
 0xb9b   :  { %v2033_v21 = vmul.f32 0.01724138, %v2031_v18 }
 0xb9d   :  { %v2034_v22 = vsub.f32 %v2020_v2, %v2033_v21  ;;  %v2035_v23 = vsub.f32 %v2022_v1, %v2033_v21 }
 0xb9f   :  { %v2036_v24 = vmul.f32 %v2034_v22, %v2034_v22  ;;  %v2041_v26 = vmul.f32 %v2035_v23, %v2035_v23 }
 0xba1   :  { %v2037_v25 = vsel %vm1896_vm13, %v2036_v24, 0.0  ;;  %v2042_v35 = vsel %vm1896_vm13, %v2041_v26, 0.0  ;;  %vm2603_vm13 = vcmask 1041408  }
 0xba2   :  { %2038 = vadd.xlane.f32.xlu0 %v2037_v25  ;;  %v2286_v25 = vld [vmem:[%s7392_s3] sm:$0x1f] }
 0xba6   :  { %2043 = vadd.xlane.f32.xlu0 %v2042_v35 }
 0xbbc   :  { %2061 = vperm.xlu0 %5855, %v2058_v36  }
 0xc2f   :  { %v2039_v37 = vpop.xlane.xlu0 %2038 }
 0xc33   :  { %v2044_v38 = vpop.xlane.xlu0 %2043 }
 0xc34   :  { %v2045_v6 = vadd.f32 %v2044_v38, %v2039_v37 }
 0xc36   :  { %v2047_v7 = vmul.f32 0.01724138, %v2045_v6 }
 0xc38   :  { %v2048_v10 = vadd.f32 1e-05, %v2047_v7 }
 0xc3a   :  { %5897 = vrsqrt.f32 %v2048_v10 }
 0xc3b   :  { %v2062_v47 = vpop.permute.xlu0 %2061 }
 0xc44   :  { %v5898_v13 = vpop.eup %5897 }
 0xc45   :  { %v2050_v39 = vmul.f32 %v5898_v13, %v2046_v12 }
 0xc47   :  { %2053 = vperm.xlu1 %5856, %v2050_v39  }
 0xcc6   :  { %v2054_v11 = vpop.permute.xlu1 %2053 }
 0xcc7   :  { %v2056_v20 = vmul.f32 %v2054_v11, %v2034_v22  ;;  %v2057_v46 = vmul.f32 %v2054_v11, %v2035_v23 }
 0xcc9   :  { %v2065_v31 = vadd.f32 %v2062_v47, %v2057_v46  ;;  %v2064_v33 = vadd.f32 %v2062_v47, %v2056_v20  ;;  %v2411_v20 = vld [vmem:[%s7394_s8] sm:$0x1f] }
 0xccb   :  { %v2067_v49 = vmax.f32 %v2065_v31, 0.0  ;;  %v2066_v14 = vmax.f32 %v2064_v33, 0.0 }
 0xccd   :  { %2172 = vrot.lane.b32.xlu0 %v2067_v49, %s5986_s5  ;;  %2168 = vrot.lane.b32.xlu1 %v2067_v49, %s5985_s0 }
 0xcd1   :  { %2082 = vrot.lane.b32.xlu1 %v2066_v14, %s5985_s0 }
 0xcd5   :  { %2086 = vrot.lane.b32.xlu1 %v2066_v14, %s5986_s5 }
 0xd3f   :  { %v2169_v15 = vpop.permute.xlu1 %2168  ;;  %v2173_v27 = vpop.permute.xlu0 %2172 }
 0xd40   :  { %v2171_v29 = vmax.f32 %v2067_v49, %v2169_v15 }
 0xd42   :  { %v2175_v60 = vmax.f32 %v2171_v29, %v2173_v27  ;;  %v4836_v27 = vadd.s32 4294967294, %v6348_v4 }
 0xd43   :  { %v2083_v55 = vpop.permute.xlu1 %2082 }
 0xd44   :  { %5103 = vmatmul.mubr.msk.f32.vlgmr.msra.gmra.mrb[10].mxu1 %vm2090_vm5, %v2175_v60  ;;  %v2085_v56 = vmax.f32 %v2066_v14, %v2083_v55  ;;  %v2399_v14 = vld [vmem:[%s7395_s14] sm:$0x1f]  ;;  %v2422_v60 = vmul.u32 2, %v6348_v4  ;;  %v2424_v55 = vmul.u32 2, %v4836_v27 }
 0xd45   :  { %5112 = vmatprep.mubr.msk.f32.mxu1 %vm5992_vm11, %v5984_v0  ;;  %v3225_v27 = vld [vmem:[%s7402_s28] sm:$0xff] }
 0xd47   :  { %v2087_v57 = vpop.permute.xlu1 %2086 }
 0xd48   :  { %v2089_v28 = vmax.f32 %v2085_v56, %v2087_v57  ;;  %v2425_v56 = vsel %vm2421_vm10, %v2422_v60, %v2424_v55  ;;  %v3226_v60 = vld [vmem:[%s7402_s28 + $0x8] sm:$0xff] }
 0xd49   :  { %vm2426_vm12 = vcmp.eq.s32.totalorder %v6350_v5, %v2425_v56  ;;  %v7190_v55 = vpack.c.bf16 %v3226_v60, %v3225_v27  ;;  %v3071_v56 = vld [vmem:[%s7403_s1] sm:$0x1] }
 0xd4a   :  { %5092 = vmatmul.mubr.msk.f32.vlgmr.msra.gmra.mrb[10].mxu0 %vm2090_vm5, %v2089_v28  ;;  %v2427_v57 = vsel %vm2426_vm12, 1.0, %v5984_v0 }
 0xd4b   :  { %2370 = vmatprep.mubr.f32.mxu0 %v5984_v0  ;;  %5111 = vmatpush3.msk.msra.mxu1 %vm1740_vm1, %v2427_v57 }
 0xd4c   :  { %5115 = vmatprep.subr.mxu1 %v5984_v0 }
 0xe17   :  { %v2245_v3 = vpop.f32.mrb[10].mxu1 }
 0xe18   :  { %2268 = vst.msk [vmem:[#allocation2 + $0x8] sm:$0x1f] %vm2249_vm8, %v2245_v3  ;;  %2270 = vrot.lane.b32.xlu0 %v2245_v3, %s5995_s25  ;;  %v5104_v8 = vpop.f32.mrb[11].mxu1 }
 0xe1c   :  { %2274 = vrot.lane.b32.xlu0 %v2245_v3, %s5985_s0 }
 0xe1d   :  { %v2163_v16 = vpop.f32.mrb[10].mxu0 }
 0xe1e   :  { %2250 = vst.msk [vmem:[#allocation2] sm:$0x1f] %vm2249_vm8, %v2163_v16  ;;  %2252 = vrot.lane.b32.xlu1 %v2163_v16, %s5995_s25  ;;  %v5093_v19 = vpop.f32.mrb[11].mxu0 }
 0xe1f   :  { %v2288_v52 = vld [vmem:[#allocation2 + $0x8] sm:$0xff] }
 0xe20   :  { %2256 = vrot.lane.b32.xlu0 %v2163_v16, %s5985_s0 }
 0xe22   :  { %2278 = vrot.lane.b32.xlu1 %v2245_v3, %s5996_s29 }
 0xe24   :  { %2282 = vrot.lane.b32.xlu0 %v2245_v3, %s5986_s5 }
 0xe25   :  { %v2287_v30 = vld [vmem:[#allocation2] sm:$0xff] }
 0xe26   :  { %2260 = vrot.lane.b32.xlu1 %v2163_v16, %s5996_s29 }
 0xe28   :  { %2300 = vperm.xlu0 %5855, %v2297_v59  }
 0xe2a   :  { %2264 = vrot.lane.b32.xlu1 %v2163_v16, %s5986_s5 }
 0xe8a   :  { %v2271_v58 = vpop.permute.xlu0 %2270 }
 0xe8b   :  { %2273 = vst.msk [vmem:[#allocation2 + $0x48] sm:$0x1f] %vm2249_vm8, %v2271_v58 }
 0xe8e   :  { %v2275_v61 = vpop.permute.xlu0 %2274 }
 0xe8f   :  { %2277 = vst.msk [vmem:[#allocation2 + $0x88] sm:$0x1f] %vm2249_vm8, %v2275_v61 }
 0xe90   :  { %v2253_v34 = vpop.permute.xlu1 %2252 }
 0xe91   :  { %2255 = vst.msk [vmem:[#allocation2 + $0x40] sm:$0x1f] %vm2249_vm8, %v2253_v34 }
 0xe92   :  { %v2257_v48 = vpop.permute.xlu0 %2256  ;;  %v2290_v62 = vld [vmem:[#allocation2 + $0x48] sm:$0xff] }
 0xe93   :  { %2259 = vst.msk [vmem:[#allocation2 + $0x80] sm:$0x1f] %vm2249_vm8, %v2257_v48  ;;  %v5691_v41 = vpack.c.bf16 %v2290_v62, %v2288_v52 }
 0xe94   :  { %v2279_v51 = vpop.permute.xlu1 %2278 }
 0xe95   :  { %2281 = vst.msk [vmem:[#allocation2 + $0xc8] sm:$0x1f] %vm2249_vm8, %v2279_v51  ;;  %5692 = vmatprep.subr.bf16.mxu0 %v5691_v41 }
 0xe96   :  { %v2283_v54 = vpop.permute.xlu0 %2282  ;;  %v2292_v50 = vld [vmem:[#allocation2 + $0x88] sm:$0xff] }
 0xe97   :  { %2285 = vst.msk [vmem:[#allocation2 + $0x108] sm:$0x1f] %vm2249_vm8, %v2283_v54  ;;  %v7099_v54 = vld [vmem:[%s7396_s19] sm:$0xff] }
 0xe98   :  { %v2261_v2 = vpop.permute.xlu1 %2260  ;;  %v2289_v1 = vld [vmem:[#allocation2 + $0x40] sm:$0xff] }
 0xe99   :  { %2263 = vst.msk [vmem:[#allocation2 + $0xc0] sm:$0x1f] %vm2249_vm8, %v2261_v2  ;;  %v5693_v43 = vpack.c.bf16 %v2289_v1, %v2287_v30  ;;  %v2987_v2 = vld [vmem:[%s7397_s24] sm:$0xff]  ;;  %v2988_v30 = vld [vmem:[%s7397_s24 + $0x8] sm:$0xff] }
 0xe9a   :  { %v2291_v21 = vld [vmem:[#allocation2 + $0x80] sm:$0xff]  ;;  %v7108_v1 = vpack.c.bf16 %v2988_v30, %v2987_v2 }
 0xe9b   :  { %5694 = vmatpush1.bf16.msra.mxu0 %v5693_v43  ;;  %v2679_v43 = vrot.slane %v7099_v54, 2  ;;  %v3383_v30 = vld [vmem:[%s7406_s10] sm:$0xff] }
 0xe9c   :  { %v2265_v44 = vpop.permute.xlu1 %2264  ;;  %v2294_v17 = vld [vmem:[#allocation2 + $0xc8] sm:$0xff] }
 0xe9d   :  { %2267 = vst.msk [vmem:[#allocation2 + $0x100] sm:$0x1f] %vm2249_vm8, %v2265_v44  ;;  %v5695_v18 = vpack.c.bf16 %v2294_v17, %v2292_v50 }
 0xe9e   :  { %v2296_v24 = vld [vmem:[#allocation2 + $0x108] sm:$0xff] }
 0xe9f   :  { %5696 = vmatprep.subr.bf16.mxu0 %v5695_v18 }
 0xea0   :  { %v2293_v22 = vld [vmem:[#allocation2 + $0xc0] sm:$0xff] }
 0xea1   :  { %v5697_v23 = vpack.c.bf16 %v2293_v22, %v2291_v21  ;;  %v2756_v21 = vrot.slane %v7099_v54, 4 }
 0xea3   :  { %5698 = vmatpush1.bf16.msra.mxu0 %v5697_v23  ;;  %v2833_v23 = vrot.slane %v7099_v54, 6 }
 0xea4   :  { %2314 = vmatprep.subr.mxu0 %v2296_v24  ;;  %v2295_v26 = vld [vmem:[#allocation2 + $0x100] sm:$0xff] }
 0xea7   :  { %2315 = vmatpush1.msra.mxu0 %v2295_v26  ;;  %v2301_v35 = vpop.permute.xlu0 %2300  ;;  %v7139_v26 = vld [vmem:[%s7396_s19 + $0x8] sm:$0x3] }
 0xea8   :  { %4835 = vmatmul.mubr.msk.f32.vlgmr.msra.gmra.mrb[12].mxu0 %vm7393_vm9, %v2286_v25  ;;  %5105 = vmatprep.subr.mxu0 %v5984_v0 }
 0xea9   :  { %5107 = vmatprep.mubr.msk.f32.mxu0 %vm5992_vm11, %v5984_v0  ;;  %5106 = vmatpush3.msk.msra.mxu0 %vm1740_vm1, %v2427_v57  ;;  %vm2437_vm1 = vcmask 23552  }
 0xeaa   :  { %5699 = vmatprep.subr.bf16.mxu0 %v5991_v53 }
 0xf7b   :  { %v2372_v36 = vpop.f32.mrb[12].mxu0 }
 0xf7c   :  { %v2373_v37 = vadd.f32 %v2372_v36, %v2301_v35  ;;  %v2374_v38 = vpop.f32.mrb[13].mxu0  ;;  %v2989_v36 = vld [vmem:[%s7397_s24 + $0x10] sm:$0xff] }
 0xf7d   :  { %v2375_v6 = vadd.f32 %v2374_v38, %v2301_v35 }
 0xf7e   :  { %v2377_v7 = vsel %vm2249_vm8, %v2373_v37, 0.0 }
 0xf7f   :  { %2378 = vadd.xlane.f32.xlu1 %v2377_v7  ;;  %v2381_v10 = vsel %vm2249_vm8, %v2375_v6, 0.0  ;;  %v3067_v7 = vld [vmem:[%s7399_s6] sm:$0xff] }
 0xf80   :  { %2382 = vadd.xlane.f32.xlu0 %v2381_v10  ;;  %v3068_v10 = vld [vmem:[%s7399_s6 + $0x8] sm:$0xff] }
0x100c   :  { %v2379_v12 = vpop.xlane.xlu1 %2378 }
0x100d   :  { %v2383_v13 = vpop.xlane.xlu0 %2382 }
0x100e   :  { %v2384_v39 = vadd.f32 %v2383_v13, %v2379_v12 }
0x1010   :  { %v2386_v40 = vmul.f32 0.1, %v2384_v39 }
0x1012   :  { %v2387_v42 = vsub.f32 %v2373_v37, %v2386_v40  ;;  %v2388_v32 = vsub.f32 %v2375_v6, %v2386_v40  ;;  %v2990_v37 = vld [vmem:[%s7397_s24 + $0x18] sm:$0xff]  ;;  %v2598_v6 = vld [vmem:[%s7398_s30] sm:$0x1]  ;;  %v7159_v40 = vpack.c.bf16 %v3068_v10, %v3067_v7  ;;  %v3463_v10 = vld [vmem:[%s6167_s27 + $0x8] sm:$0xff] }
0x1013   :  { %v7152_v38 = vpack.c.bf16 %v2990_v37, %v2989_v36  ;;  %v3385_v36 = vld [vmem:[%s7406_s10 + $0x10] sm:$0xff]  ;;  %v3386_v37 = vld [vmem:[%s7406_s10 + $0x18] sm:$0xff]  ;;  %v3462_v7 = vld [vmem:[%s6167_s27] sm:$0xff] }
0x1014   :  { %v2394_v63 = vmul.f32 %v2388_v32, %v2388_v32  ;;  %v2389_v45 = vmul.f32 %v2387_v42, %v2387_v42 }
0x1016   :  { %v2395_v9 = vsel %vm2249_vm8, %v2394_v63, 0.0  ;;  %v2390_v11 = vsel %vm2249_vm8, %v2389_v45, 0.0  ;;  %v3070_v63 = vld [vmem:[%s7399_s6 + $0x18] sm:$0xff] }
0x1017   :  { %2396 = vadd.xlane.f32.xlu1 %v2395_v9  ;;  %2391 = vadd.xlane.f32.xlu0 %v2390_v11  ;;  %v2991_v9 = vld [vmem:[%s7400_s23] sm:$0x1] }
0x1018   :  { %v3146_v11 = vld [vmem:[%s7401_s26] sm:$0xff] }
0x1028   :  { %2414 = vperm.xlu1 %5856, %v2411_v20   ;;  %v3147_v20 = vld [vmem:[%s7401_s26 + $0x8] sm:$0xff] }
0x10a4   :  { %v2397_v46 = vpop.xlane.xlu1 %2396  ;;  %v2392_v47 = vpop.xlane.xlu0 %2391 }
0x10a5   :  { %v2398_v31 = vadd.f32 %v2397_v46, %v2392_v47 }
0x10a7   :  { %v2400_v33 = vmul.f32 0.1, %v2398_v31 }
0x10a8   :  { %v2415_v16 = vpop.permute.xlu1 %2414 }
0x10a9   :  { %v2401_v49 = vadd.f32 1e-05, %v2400_v33  ;;  %v7175_v33 = vpack.c.bf16 %v3147_v20, %v3146_v11 }
0x10ab   :  { %5899 = vrsqrt.f32 %v2401_v49 }
0x10b5   :  { %v5900_v15 = vpop.eup %5899 }
0x10b6   :  { %v2403_v29 = vmul.f32 %v5900_v15, %v2399_v14  ;;  %v3148_v14 = vld [vmem:[%s7401_s26 + $0x10] sm:$0xff]  ;;  %v3149_v15 = vld [vmem:[%s7401_s26 + $0x18] sm:$0xff] }
0x10b8   :  { %2406 = vperm.xlu0 %5855, %v2403_v29   ;;  %v7184_v29 = vpack.c.bf16 %v3149_v15, %v3148_v14 }
0x1137   :  { %v2407_v28 = vpop.permute.xlu0 %2406 }
0x1138   :  { %v2409_v3 = vmul.f32 %v2407_v28, %v2387_v42  ;;  %v2410_v8 = vmul.f32 %v2407_v28, %v2388_v32  ;;  %v3069_v32 = vld [vmem:[%s7399_s6 + $0x10] sm:$0xff] }
0x1139   :  { %v7168_v45 = vpack.c.bf16 %v3070_v63, %v3069_v32 }
0x113a   :  { %v2417_v19 = vadd.f32 %v2415_v16, %v2409_v3  ;;  %v2418_v59 = vadd.f32 %v2415_v16, %v2410_v8  ;;  %v3227_v16 = vld [vmem:[%s7402_s28 + $0x10] sm:$0xff] }
0x113c   :  { %v2419_v4 = vmax.f32 %v2417_v19, 0.0  ;;  %v2420_v5 = vmax.f32 %v2418_v59, 0.0  ;;  %v3228_v19 = vld [vmem:[%s7402_s28 + $0x18] sm:$0xff] }
0x113d   :  { %v7200_v59 = vpack.c.bf16 %v3228_v19, %v3227_v16 }
0x113e   :  { %2433 = vrot.lane.b32.xlu0 %v2419_v4, %s5986_s5  ;;  %2429 = vrot.lane.b32.xlu1 %v2419_v4, %s5985_s0 }
0x1142   :  { %2519 = vrot.lane.b32.xlu0 %v2420_v5, %s5986_s5  ;;  %2515 = vrot.lane.b32.xlu1 %v2420_v5, %s5985_s0 }
0x11b0   :  { %v2434_v58 = vpop.permute.xlu0 %2433  ;;  %v2430_v61 = vpop.permute.xlu1 %2429 }
0x11b1   :  { %v2432_v34 = vmax.f32 %v2419_v4, %v2430_v61  ;;  %v3304_v4 = vld [vmem:[%s7404_s2] sm:$0xff] }
0x11b2   :  { %v3150_v61 = vld [vmem:[%s7405_s7] sm:$0x1] }
0x11b3   :  { %v2436_v48 = vmax.f32 %v2432_v34, %v2434_v58 }
0x11b4   :  { %v2516_v52 = vpop.permute.xlu1 %2515  ;;  %v2520_v41 = vpop.permute.xlu0 %2519 }
0x11b5   :  { %v2518_v62 = vmax.f32 %v2420_v5, %v2516_v52  ;;  %5108 = vmatmul.mubr.msk.f32.vlgmr.msra.gmra.mrb[14].mxu0 %vm2437_vm1, %v2436_v48  ;;  %v3305_v5 = vld [vmem:[%s7404_s2 + $0x8] sm:$0xff] }
0x11b6   :  { %5148 = vmatprep.mubr.msk.f32.mxu0 %vm5992_vm11, %v5984_v0  ;;  %5701 = vmatpush3.bf16.msra.mxu0 %v7108_v1  ;;  %v7206_v58 = vpack.c.bf16 %v3305_v5, %v3304_v4 }
0x11b7   :  { %v2522_v51 = vmax.f32 %v2518_v62, %v2520_v41  ;;  %5702 = vmatprep.subr.bf16.mxu0 %v5991_v53  ;;  %v3306_v41 = vld [vmem:[%s7404_s2 + $0x10] sm:$0xff] }
0x11b9   :  { %5113 = vmatmul.mubr.msk.f32.vlgmr.msra.gmra.mrb[12].mxu1 %vm2437_vm1, %v2522_v51  ;;  %v3307_v51 = vld [vmem:[%s7404_s2 + $0x18] sm:$0xff] }
0x11ba   :  { %5116 = vmatpush3.msk.msra.mxu1 %vm2603_vm13, %v7099_v54  ;;  %5117 = vmatprep.mubr.msk.f32.mxu1 %vm5992_vm11, %v5984_v0  ;;  %v7216_v2 = vpack.c.bf16 %v3307_v51, %v3306_v41  ;;  %v4234_v51 = vld [vmem:[%s7408_s15] sm:$0x1] }
0x11bb   :  { %5120 = vmatprep.subr.mxu1 %v5984_v0  ;;  %5704 = vmatpush3.bf16.msra.mxu0 %v7152_v38 }
0x11bc   :  { %5705 = vmatprep.subr.bf16.mxu0 %v5991_v53 }
0x1288   :  { %v2510_v44 = vpop.f32.mrb[14].mxu0 }
0x1289   :  { %v5109_v50 = vpop.f32.mrb[15].mxu0  ;;  %5118 = vmatmul.mubr.msk.f32.vlgmr.msra.gmra.mrb[14].mxu1 %vm2599_vm14, %v2510_v44  ;;  %v2678_v22 = vrot.slane %v2510_v44, 1  ;;  %v2755_v24 = vrot.slane %v2510_v44, 2  ;;  %v2832_v25 = vrot.slane %v2510_v44, 3  ;;  %v2909_v35 = vrot.slane %v2510_v44, 4  ;;  %v3384_v44 = vld [vmem:[%s7406_s10 + $0x8] sm:$0xff] }
0x128a   :  { %5121 = vmatpush3.msk.msra.mxu1 %vm2603_vm13, %v2679_v43  ;;  %5122 = vmatprep.mubr.msk.f32.mxu1 %vm5992_vm11, %v5984_v0  ;;  %v7222_v50 = vpack.c.bf16 %v3384_v44, %v3383_v30 }
0x128b   :  { %5125 = vmatprep.subr.mxu1 %v5984_v0 }
0x128c   :  { %v7120_v17 = vpop.f32.mrb[12].mxu1 }
0x128d   :  { %v5114_v18 = vpop.f32.mrb[13].mxu1 }
0x128e   :  { %v3229_v18 = vld [vmem:[%s7407_s11] sm:$0x1] }
0x1291   :  { %5123 = vmatmul.mubr.msk.f32.vlgmr.msra.gmra.mrb[14].mxu1 %vm2599_vm14, %v2678_v22 }
0x1292   :  { %5126 = vmatpush3.msk.msra.mxu1 %vm2603_vm13, %v2756_v21  ;;  %5127 = vmatprep.mubr.msk.f32.mxu1 %vm5992_vm11, %v5984_v0 }
0x1293   :  { %5130 = vmatprep.subr.mxu1 %v5984_v0 }
0x1299   :  { %5128 = vmatmul.mubr.msk.f32.vlgmr.msra.gmra.mrb[14].mxu1 %vm2599_vm14, %v2755_v24 }
0x129a   :  { %5131 = vmatpush3.msk.msra.mxu1 %vm2603_vm13, %v2833_v23  ;;  %5132 = vmatprep.mubr.msk.f32.mxu1 %vm5992_vm11, %v5984_v0 }
0x129b   :  { %5135 = vmatprep.subr.mxu1 %v5984_v0 }
0x12a1   :  { %5133 = vmatmul.mubr.msk.f32.vlgmr.msra.gmra.mrb[14].mxu1 %vm2599_vm14, %v2832_v25 }
0x12a2   :  { %5136 = vmatpush3.msk.msra.mxu1 %vm2603_vm13, %v7139_v26  ;;  %5137 = vmatprep.mubr.msk.f32.mxu1 %vm5992_vm11, %v5984_v0 }
0x12a3   :  { %5717 = vmatprep.subr.bf16.mxu1 %v5991_v53 }
0x12a9   :  { %5138 = vmatmul.mubr.msk.f32.vlgmr.msra.gmra.mrb[14].mxu1 %vm2599_vm14, %v2909_v35 }
0x12aa   :  { %5181 = vmatprep.mubr.msk.f32.mxu1 %vm5992_vm11, %v5984_v0  ;;  %5719 = vmatpush3.bf16.msra.mxu1 %v7190_v55 }
0x12ab   :  { %5720 = vmatprep.subr.bf16.mxu1 %v5991_v53 }
0x12ae   :  { %5722 = vmatpush3.bf16.msra.mxu1 %v7200_v59 }
0x12af   :  { %5729 = vmatprep.subr.bf16.mxu1 %v5991_v53 }
0x137c   :  { %v2981_v12 = vpop.f32.mrb[14].mxu1 }
0x137d   :  { %v5783_v13 = vadd.f32 %v2981_v12, %v2598_v6  ;;  %v5139_v39 = vpop.f32.mrb[15].mxu1  ;;  %v7232_v6 = vpack.c.bf16 %v3386_v37, %v3385_v36  ;;  %v7238_v12 = vpack.c.bf16 %v3463_v10, %v3462_v7  ;;  %v4392_v36 = vld [vmem:[%s6172_s4] sm:$0x1] }
0x137f   :  { %v2986_v42 = vmax.f32 %v5783_v13, 0.0  ;;  %v3308_v13 = vld [vmem:[%s7408_s15] sm:$0x1] }
0x1381   :  { %5149 = vmatmul.mubr.msk.f32.vlgmr.msra.gmra.mrb[16].mxu0 %vm2992_vm15, %v2986_v42 }
0x1382   :  { %5707 = vmatpush3.bf16.msra.mxu0 %v7159_v40  ;;  %5159 = vmatprep.mubr.msk.f32.mxu0 %vm5992_vm11, %v5984_v0 }
0x1383   :  { %5708 = vmatprep.subr.bf16.mxu0 %v5991_v53 }
0x1386   :  { %5710 = vmatpush3.bf16.msra.mxu0 %v7168_v45 }
0x1387   :  { %5711 = vmatprep.subr.bf16.mxu0 %v5991_v53 }
0x1454   :  { %v3062_v46 = vpop.f32.mrb[16].mxu0 }
0x1455   :  { %v3063_v47 = vadd.f32 %v3062_v46, %v2991_v9  ;;  %v5150_v31 = vpop.f32.mrb[17].mxu0  ;;  %v3617_v9 = vrot.slane %v7120_v17, 1 }
0x1457   :  { %v3066_v49 = vmax.f32 %v3063_v47, 0.0 }
0x1459   :  { %5160 = vmatmul.mubr.msk.f32.vlgmr.msra.gmra.mrb[18].mxu0 %vm2992_vm15, %v3066_v49 }
0x145a   :  { %5713 = vmatpush3.bf16.msra.mxu0 %v7175_v33  ;;  %5170 = vmatprep.mubr.msk.f32.mxu0 %vm5992_vm11, %v5984_v0 }
0x145b   :  { %5714 = vmatprep.subr.bf16.mxu0 %v5991_v53 }
0x145e   :  { %5716 = vmatpush3.bf16.msra.mxu0 %v7184_v29 }
0x145f   :  { %5723 = vmatprep.subr.bf16.mxu0 %v5991_v53 }
0x152c   :  { %v3141_v57 = vpop.f32.mrb[18].mxu0 }
0x152d   :  { %v3142_v28 = vadd.f32 %v3141_v57, %v3071_v56  ;;  %v5161_v3 = vpop.f32.mrb[19].mxu0  ;;  %v3918_v56 = vld [vmem:[%s7400_s23] sm:$0x1] }
0x152f   :  { %v3145_v8 = vmax.f32 %v3142_v28, 0.0 }
0x1531   :  { %5171 = vmatmul.mubr.msk.f32.vlgmr.msra.gmra.mrb[20].mxu0 %vm2992_vm15, %v3145_v8 }
0x1532   :  { %5192 = vmatprep.mubr.msk.f32.mxu0 %vm5992_vm11, %v5984_v0  ;;  %5725 = vmatpush3.bf16.msra.mxu0 %v7206_v58 }
0x1533   :  { %5726 = vmatprep.subr.bf16.mxu0 %v5991_v53 }
0x1536   :  { %5728 = vmatpush3.bf16.msra.mxu0 %v7216_v2 }
0x1537   :  { %5735 = vmatprep.subr.bf16.mxu0 %v5991_v53 }
0x1604   :  { %v3220_v34 = vpop.f32.mrb[20].mxu0 }
0x1605   :  { %v3221_v48 = vadd.f32 %v3220_v34, %v3150_v61  ;;  %v5172_v52 = vpop.f32.mrb[21].mxu0 }
0x1607   :  { %v3224_v62 = vmax.f32 %v3221_v48, 0.0 }
0x1609   :  { %5182 = vmatmul.mubr.msk.f32.vlgmr.msra.gmra.mrb[16].mxu1 %vm2992_vm15, %v3224_v62 }
0x160a   :  { %5203 = vmatprep.mubr.msk.f32.mxu1 %vm5992_vm11, %v5984_v0  ;;  %5731 = vmatpush3.bf16.msra.mxu1 %v7222_v50 }
0x160b   :  { %5732 = vmatprep.subr.bf16.mxu1 %v5991_v53 }
0x160e   :  { %5734 = vmatpush3.bf16.msra.mxu1 %v7232_v6 }
0x160f   :  { %5217 = vmatprep.subr.mxu1 %v5984_v0 }
0x16dc   :  { %v3299_v22 = vpop.f32.mrb[16].mxu1 }
0x16dd   :  { %v3300_v24 = vadd.f32 %v3299_v22, %v3229_v18  ;;  %v5183_v25 = vpop.f32.mrb[17].mxu1  ;;  %v4313_v18 = vld [vmem:[%s6162_s20] sm:$0x1] }
0x16df   :  { %v3303_v35 = vmax.f32 %v3300_v24, 0.0 }
0x16e1   :  { %5193 = vmatmul.mubr.msk.f32.vlgmr.msra.gmra.mrb[22].mxu0 %vm2992_vm15, %v3303_v35 }
0x16e2   :  { %5214 = vmatprep.mubr.msk.f32.mxu0 %vm5992_vm11, %v5984_v0  ;;  %5737 = vmatpush3.bf16.msra.mxu0 %v7238_v12 }
0x16e3   :  { %5738 = vmatprep.subr.bf16.mxu0 %v5991_v53 }
0x17b4   :  { %v3378_v39 = vpop.f32.mrb[22].mxu0 }
0x17b5   :  { %v3379_v42 = vadd.f32 %v3378_v39, %v3308_v13  ;;  %v5194_v32 = vpop.f32.mrb[23].mxu0 }
0x17b7   :  { %v3382_v63 = vmax.f32 %v3379_v42, 0.0 }
0x17b9   :  { %5204 = vmatmul.mubr.msk.f32.vlgmr.msra.gmra.mrb[18].mxu1 %vm2992_vm15, %v3382_v63 }
0x17ba   :  { %5218 = vmatpush3.msk.msra.mxu1 %vm2603_vm13, %v7099_v54  ;;  %5219 = vmatprep.mubr.msk.f32.mxu1 %vm5992_vm11, %v5984_v0  ;;  %v3839_v54 = vrot.slane %v7120_v17, 4 }
0x17bb   :  { %5222 = vmatprep.subr.mxu1 %v5984_v0 }
0x17bd   :  { %5220 = vmatmul.mubr.msk.f32.vlgmr.msra.gmra.mrb[20].mxu1 %vm2599_vm14, %v7120_v17 }
0x17be   :  { %5223 = vmatpush3.msk.msra.mxu1 %vm2603_vm13, %v2679_v43  ;;  %5224 = vmatprep.mubr.msk.f32.mxu1 %vm5992_vm11, %v5984_v0  ;;  %v3691_v43 = vrot.slane %v7120_v17, 2 }
0x17bf   :  { %5227 = vmatprep.subr.mxu1 %v5984_v0 }
0x17c5   :  { %5225 = vmatmul.mubr.msk.f32.vlgmr.msra.gmra.mrb[20].mxu1 %vm2599_vm14, %v3617_v9 }
0x17c6   :  { %5228 = vmatpush3.msk.msra.mxu1 %vm2603_vm13, %v2756_v21  ;;  %5229 = vmatprep.mubr.msk.f32.mxu1 %vm5992_vm11, %v5984_v0  ;;  %v3765_v21 = vrot.slane %v7120_v17, 3  ;;  %v3387_v17 = vld [vmem:[%s6162_s20] sm:$0x1] }
0x17c7   :  { %5232 = vmatprep.subr.mxu1 %v5984_v0 }
0x17cd   :  { %5230 = vmatmul.mubr.msk.f32.vlgmr.msra.gmra.mrb[20].mxu1 %vm2599_vm14, %v3691_v43 }
0x17ce   :  { %5233 = vmatpush3.msk.msra.mxu1 %vm2603_vm13, %v2833_v23  ;;  %5234 = vmatprep.mubr.msk.f32.mxu1 %vm5992_vm11, %v5984_v0  ;;  %v3464_v23 = vld [vmem:[%s6167_s27 + $0x10] sm:$0xff] }
0x17cf   :  { %5237 = vmatprep.subr.mxu1 %v5984_v0 }
0x17d5   :  { %5235 = vmatmul.mubr.msk.f32.vlgmr.msra.gmra.mrb[20].mxu1 %vm2599_vm14, %v3765_v21 }
0x17d6   :  { %5238 = vmatpush3.msk.msra.mxu1 %vm2603_vm13, %v7139_v26  ;;  %5239 = vmatprep.mubr.msk.f32.mxu1 %vm5992_vm11, %v5984_v0  ;;  %v3465_v26 = vld [vmem:[%s6167_s27 + $0x18] sm:$0xff]  ;;  %s5997_s27 = smov [#allocation6]  }
0x17d7   :  { %5753 = vmatprep.subr.bf16.mxu1 %v5991_v53  ;;  %v7290_v11 = vpack.c.bf16 %v3465_v26, %v3464_v23  ;;  %s4473_s16 = sshll.u32 %s5997_s27, 4  ;;  %s4474_s16 = int_to_ptr.vmem [resolvable:$true] %s4473_s16 }
0x17d8   :  { %s5923_s18 = scalar_lea.vmem %s4474_s16, 32  ;;  %p5928_p9 = scmp.lt.s32.totalorder %s4474_s16, %s4474_s16 }
0x17d9   :  { %5740 = vmatpush3.bf16.msra.mxu0 %v7290_v11  ;;  %p5924_p8 = scmp.ne.s32.totalorder %s4474_s16, %s5923_s18  ;;  %p5929_p10 = scmp.lt.s32.totalorder %s5923_s18, %s5923_s18 }
0x17da   :  { %5741 = vmatprep.subr.bf16.mxu0 %v5991_v53 }
0x17db   :  { %p5930_p11 = por %p5929_p10, %p5928_p9 }
0x17dd   :  { %5240 = vmatmul.mubr.msk.f32.vlgmr.msra.gmra.mrb[20].mxu1 %vm2599_vm14, %v3839_v54  ;;  %p5931_p12 = pnand %p5930_p11, %p5924_p8 }
0x17de   :  { %5755 = vmatpush3.bf16.msra.mxu1 %v7175_v33  ;;  %5272 = vmatprep.mubr.msk.f32.mxu1 %vm5992_vm11, %v5984_v0  ;;  %v3542_v33 = vld [vmem:[%s7398_s30] sm:$0x1] }
0x17df   :  { %5756 = vmatprep.subr.bf16.mxu1 %v5991_v53 }
0x17e2   :  { %5758 = vmatpush3.bf16.msra.mxu1 %v7184_v29 }
0x17e3   :  { %5765 = vmatprep.subr.bf16.mxu1 %v5991_v53 }
0x188c   :  { %v3457_v20 = vpop.f32.mrb[18].mxu1 }
0x188d   :  { %v3458_v46 = vadd.f32 %v3457_v20, %v3387_v17  ;;  %v5205_v47 = vpop.f32.mrb[19].mxu1 }
0x188f   :  { %v3461_v31 = vmax.f32 %v3458_v46, 0.0 }
0x1891   :  { %5215 = vmatmul.mubr.msk.f32.vlgmr.msra.gmra.mrb[24].mxu0 %vm2992_vm15, %v3461_v31 }
0x1892   :  { %5743 = vmatpush3.bf16.msra.mxu0 %v7108_v1  ;;  %5250 = vmatprep.mubr.msk.f32.mxu0 %vm5992_vm11, %v5984_v0  ;;  %v3466_v1 = vld [vmem:[%s6172_s4] sm:$0x1] }
0x1893   :  { %5744 = vmatprep.subr.bf16.mxu0 %v5991_v53 }
0x1896   :  { %5746 = vmatpush3.bf16.msra.mxu0 %v7152_v38 }
0x1897   :  { %5747 = vmatprep.subr.bf16.mxu0 %v5991_v53 }
0x18b0   :  { %v3908_v49 = vpop.f32.mrb[20].mxu1 }
0x18b1   :  { %v5784_v14 = vadd.f32 %v3908_v49, %v3542_v33  ;;  %v5241_v15 = vpop.f32.mrb[21].mxu1 }
0x18b3   :  { %v3913_v29 = vmax.f32 %v5784_v14, 0.0 }
0x18b5   :  { %5251 = vmatmul.mubr.msk.f32.vlgmr.msra.gmra.mrb[26].mxu0 %vm2992_vm15, %v3913_v29 }
0x18b6   :  { %5749 = vmatpush3.bf16.msra.mxu0 %v7159_v40  ;;  %5261 = vmatprep.mubr.msk.f32.mxu0 %vm5992_vm11, %v5984_v0 }
0x18b7   :  { %5750 = vmatprep.subr.bf16.mxu0 %v5991_v53 }
0x18ba   :  { %5752 = vmatpush3.bf16.msra.mxu0 %v7168_v45  ;;  %v3997_v45 = vld [vmem:[%s7403_s1] sm:$0x1] }
0x18bb   :  { %5759 = vmatprep.subr.bf16.mxu0 %v5991_v53 }
0x1964   :  { %v3536_v38 = vpop.f32.mrb[24].mxu0 }
0x1965   :  { %v3537_v27 = vadd.f32 %v3536_v38, %v3466_v1  ;;  %v5216_v60 = vpop.f32.mrb[25].mxu0 }
0x1967   :  { %3541 = vst.msk [vmem:[#allocation6] sm:$0x1] %vm3540_vm2, %v3537_v27 }
0x1988   :  { %v3988_v57 = vpop.f32.mrb[26].mxu0 }
0x1989   :  { %v3989_v40 = vadd.f32 %v3988_v57, %v3918_v56  ;;  %v5252_v28 = vpop.f32.mrb[27].mxu0 }
0x198b   :  { %v3992_v3 = vmax.f32 %v3989_v40, 0.0 }
0x198d   :  { %5262 = vmatmul.mubr.msk.f32.vlgmr.msra.gmra.mrb[28].mxu0 %vm2992_vm15, %v3992_v3 }
0x198e   :  { %5761 = vmatpush3.bf16.msra.mxu0 %v7190_v55  ;;  %5283 = vmatprep.mubr.msk.f32.mxu0 %vm5992_vm11, %v5984_v0  ;;  %v4076_v55 = vld [vmem:[%s7405_s7] sm:$0x1] }
0x198f   :  { %5762 = vmatprep.subr.bf16.mxu0 %v5991_v53 }
0x1992   :  { %5764 = vmatpush3.bf16.msra.mxu0 %v7200_v59 }
0x1993   :  { %5771 = vmatprep.subr.bf16.mxu0 %v5991_v53 }
0x1a60   :  { %v4067_v8 = vpop.f32.mrb[28].mxu0 }
0x1a61   :  { %v4068_v16 = vadd.f32 %v4067_v8, %v3997_v45  ;;  %v5263_v19 = vpop.f32.mrb[29].mxu0 }
0x1a63   :  { %v4071_v4 = vmax.f32 %v4068_v16, 0.0 }
0x1a65   :  { %5273 = vmatmul.mubr.msk.f32.vlgmr.msra.gmra.mrb[22].mxu1 %vm2992_vm15, %v4071_v4 }
0x1a66   :  { %5767 = vmatpush3.bf16.msra.mxu1 %v7206_v58  ;;  %5294 = vmatprep.mubr.msk.f32.mxu1 %vm5992_vm11, %v5984_v0  ;;  %v4155_v58 = vld [vmem:[%s7407_s11] sm:$0x1] }
0x1a67   :  { %5768 = vmatprep.subr.bf16.mxu1 %v5991_v53 }
0x1a6a   :  { %5770 = vmatpush3.bf16.msra.mxu1 %v7216_v2 }
0x1a6b   :  { %5777 = vmatprep.subr.bf16.mxu1 %v5991_v53 }
0x1b38   :  { %v4146_v59 = vpop.f32.mrb[22].mxu1 }
0x1b39   :  { %v4147_v5 = vadd.f32 %v4146_v59, %v4076_v55  ;;  %v5274_v61 = vpop.f32.mrb[23].mxu1 }
0x1b3b   :  { %v4150_v34 = vmax.f32 %v4147_v5, 0.0 }
0x1b3d   :  { %5284 = vmatmul.mubr.msk.f32.vlgmr.msra.gmra.mrb[30].mxu0 %vm2992_vm15, %v4150_v34 }
0x1b3e   :  { %5773 = vmatpush3.bf16.msra.mxu0 %v7222_v50  ;;  %5305 = vmatprep.mubr.msk.f32.mxu0 %vm5992_vm11, %v5984_v0 }
0x1b3f   :  { %5774 = vmatprep.subr.bf16.mxu0 %v5991_v53 }
0x1b42   :  { %5776 = vmatpush3.bf16.msra.mxu0 %v7232_v6 }
0x1c10   :  { %v4225_v48 = vpop.f32.mrb[30].mxu0 }
0x1c11   :  { %v4226_v52 = vadd.f32 %v4225_v48, %v4155_v58  ;;  %v5285_v62 = vpop.f32.mrb[31].mxu0 }
0x1c13   :  { %v4229_v41 = vmax.f32 %v4226_v52, 0.0 }
0x1c15   :  { %5295 = vmatmul.mubr.msk.f32.vlgmr.msra.gmra.mrb[24].mxu1 %vm2992_vm15, %v4229_v41 }
0x1c16   :  { %5779 = vmatpush3.bf16.msra.mxu1 %v7238_v12  ;;  %5316 = vmatprep.mubr.msk.f32.mxu1 %vm5992_vm11, %v5984_v0 }
0x1c17   :  { %5780 = vmatprep.subr.bf16.mxu1 %v5991_v53 }
0x1c1a   :  { %5782 = vmatpush3.bf16.msra.mxu1 %v7290_v11 }
0x1ce8   :  { %v4304_v2 = vpop.f32.mrb[24].mxu1 }
0x1ce9   :  { %v4305_v30 = vadd.f32 %v4304_v2, %v4234_v51  ;;  %v5296_v44 = vpop.f32.mrb[25].mxu1 }
0x1ceb   :  { %v4308_v50 = vmax.f32 %v4305_v30, 0.0 }
0x1ced   :  { %5306 = vmatmul.mubr.msk.f32.vlgmr.msra.gmra.mrb[32].mxu0 %vm2992_vm15, %v4308_v50 }
0x1dc0   :  { %v4383_v22 = vpop.f32.mrb[32].mxu0 }
0x1dc1   :  { %v4384_v24 = vadd.f32 %v4383_v22, %v4313_v18  ;;  %v5307_v25 = vpop.f32.mrb[33].mxu0 }
0x1dc3   :  { %v4387_v35 = vmax.f32 %v4384_v24, 0.0 }
0x1dc5   :  { %5317 = vmatmul.mubr.msk.f32.vlgmr.msra.gmra.mrb[26].mxu1 %vm2992_vm15, %v4387_v35 }
0x1e98   :  { %v4462_v0 = vpop.f32.mrb[26].mxu1 }
0x1e99   :  { %v4463_v53 = vadd.f32 %v4462_v0, %v4392_v36  ;;  %v5318_v37 = vpop.f32.mrb[27].mxu1 }
0x1e9b   :  { %4467 = vst.msk [vmem:[#allocation6 + $0x1] sm:$0x1] %vm3540_vm2, %v4463_v53 }
0x1e9c   :  { %5934 = shalt.err (!%p5931_p12)
}
0x1e9d   :  { %s5935_s20 = scalar_lea.hbm %s6177_s12, 32 }
0x1e9e   :  { %p5936_p13 = scmp.ne.s32.totalorder %s6177_s12, %s5935_s20  ;;  %p5939_p0 = scmp.lt.u32.totalorder %s5935_s20, %s6177_s12 }
0x1ea0   :  { %p5941_p1 = pnand %p5939_p0, %p5936_p13 }
0x1ea2   :  { %5944 = shalt.err (!%p5941_p1)
}
0x1ea3   :  { %s5998_s4 = smov 16  }
0x1ea4   :  { %4479 = dma.vmem_to_hbm [thread:$0]  %s4474_s16, 32, %s6177_s12, [#allocation5], %s5998_s4, %s5998_s4, %s5990_s9  }
0x1ea5   :  { %5947 = dma.done.wait [#allocation5], 32  }
0x1ea6   :  { %5948 = vsyncadd [#allocation5], 4294967264 }
0x1ea7   :  { %4483 = vsyncpa [#allocation4], 1 }
0x1ea8   :  { %4484 = vsyncpa [#allocation5], 1 }

</bundles_post_ra>
